<compile_context>
chip_gen: v7x
topology: tpu7x:2x2x1
jax: 0.10.0
libtpu: 0.0.40
codegen_flags: <defaults>
</compile_context>

<pallas_src>
import jax
import jax.numpy as jnp
from jax.experimental import pallas as pl
from jax.experimental.pallas import tpu as pltpu


def pair_kernel(x_ref, we_ref, be_ref, wd_ref, bd_ref, z_ref, loss_ref):
    x = x_ref[...]                          # (TB, D_in) f32 tile
    x_bf = x.astype(jnp.bfloat16)           # bf16 into the MXU only

    # ---- encoder: Linear + ReLU (bf16 MXU, f32 accumulation) ----
    z = jnp.dot(x_bf, we_ref[...], preferred_element_type=jnp.float32)
    z = jnp.maximum(z + be_ref[...], 0.0)   # f32 VPU math
    z_ref[...] = z.astype(z_ref.dtype)

    # ---- decoder: Linear (bf16 MXU, f32 accumulation) ----
    x_hat = jnp.dot(z.astype(jnp.bfloat16), wd_ref[...],
                    preferred_element_type=jnp.float32)
    x_hat = x_hat + bd_ref[...]

    # ---- per-tile sum of squared errors, emitted as an independent partial ----
    diff = x - x_hat                        # f32 diff against the f32 input
    partial = jnp.sum(diff * diff)          # one XLU reduce per tile
    # Lane-dense scalar splat; wrapper reads [i, 0, 0] per tile.
    loss_ref[...] = jnp.full((1, 8, 128), partial, dtype=jnp.float32)


def pair_forward(x, w_enc, b_enc, w_dec, b_dec, *, tb=256):
    """Fused encoder/decoder/MSE. Returns (z, loss)."""
    B, D_in = x.shape
    D_z = w_enc.shape[1]
    tb = min(tb, B)
    assert B % tb == 0 and tb % 8 == 0, "batch tile must be a multiple of 8 dividing B"
    assert D_in % 128 == 0 and D_z % 128 == 0, "feature dims should be lane-dense"
    n_tiles = B // tb
    inv_n = 1.0 / float(B * D_in)

    flops = 2 * B * D_in * D_z * 2              # two matmuls
    bytes_accessed = (x.size * 4                # x (f32 in)
                      + w_enc.size * 2 + w_dec.size * 2        # bf16 weights
                      + b_enc.size * 4 + b_dec.size * 4        # f32 biases
                      + B * D_z * 4                            # z out
                      + n_tiles * 8 * 128 * 4)                 # partial losses

    z, partials = pl.pallas_call(
        pair_kernel,
        out_shape=(
            jax.ShapeDtypeStruct((B, D_z), jnp.float32),            # z
            jax.ShapeDtypeStruct((n_tiles, 8, 128), jnp.float32),   # per-tile SSE
        ),
        grid_spec=pltpu.PrefetchScalarGridSpec(
            num_scalar_prefetch=0,
            grid=(n_tiles,),
            in_specs=[
                pl.BlockSpec((tb, D_in), lambda i: (i, 0)),   # x tile (pipelined)
                pl.BlockSpec((D_in, D_z), lambda i: (0, 0)),  # W_enc (resident)
                pl.BlockSpec((1, D_z), lambda i: (0, 0)),     # b_enc (resident)
                pl.BlockSpec((D_z, D_in), lambda i: (0, 0)),  # W_dec (resident)
                pl.BlockSpec((1, D_in), lambda i: (0, 0)),    # b_dec (resident)
            ],
            out_specs=(
                pl.BlockSpec((tb, D_z), lambda i: (i, 0)),      # z tile
                pl.BlockSpec((1, 8, 128), lambda i: (i, 0, 0)),  # per-tile partial
            ),
        ),
        compiler_params=pltpu.CompilerParams(
            # Every grid step writes disjoint z / partial-loss blocks, so the
            # batch axis is fully parallel (sharded across TCs on v7x).
            dimension_semantics=("parallel",),
            vmem_limit_bytes=48 * 1024 * 1024,
        ),
        cost_estimate=pl.CostEstimate(
            flops=flops, transcendentals=0, bytes_accessed=bytes_accessed),
    )(x, w_enc, b_enc, w_dec, b_dec)

    # mean = (sum of per-tile partial SSEs) * 1/N   (tiny XLA epilogue)
    loss = jnp.sum(partials[:, 0, 0]) * inv_n

    # Mirror z.detach().clone(): block gradients through the returned latent.
    return jax.lax.stop_gradient(z), loss


def _reference(x, w_enc, b_enc, w_dec, b_dec):
    """Pure-JAX reference mirroring the kernel's bf16-input / f32-accumulate path."""
    xb = x.astype(jnp.bfloat16).astype(jnp.float32)
    we = w_enc.astype(jnp.float32)
    wd = w_dec.astype(jnp.float32)
    z = jnp.maximum(
        jnp.dot(xb, we, precision=jax.lax.Precision.HIGHEST) + b_enc, 0.0)
    zb = z.astype(jnp.bfloat16).astype(jnp.float32)
    x_hat = jnp.dot(zb, wd, precision=jax.lax.Precision.HIGHEST) + b_dec
    loss = jnp.mean((x - x_hat) ** 2)
    return z, loss


if __name__ == "__main__":
    key = jax.random.PRNGKey(0)
    # Lane-dense sizes: D_in, D_z multiples of 256 (fills the v6e/v7x MXU);
    # batch tiled by TB=256 -> grid=(2,).
    B, D_in, D_z, TB = 512, 512, 256, 256

    k_x, k_we, k_be, k_wd, k_bd = jax.random.split(key, 5)
    x = jax.random.normal(k_x, (B, D_in), dtype=jnp.float32)

    # Deterministic synthetic parameters; weights stored bf16 for the MXU,
    # biases f32 (elementwise path stays f32).
    w_enc = (jax.random.normal(k_we, (D_in, D_z), dtype=jnp.float32) * 0.05
             ).astype(jnp.bfloat16)
    b_enc = jax.random.normal(k_be, (1, D_z), dtype=jnp.float32) * 0.01
    w_dec = (jax.random.normal(k_wd, (D_z, D_in), dtype=jnp.float32) * 0.05
             ).astype(jnp.bfloat16)
    b_dec = jax.random.normal(k_bd, (1, D_in), dtype=jnp.float32) * 0.01

    fwd = jax.jit(lambda *a: pair_forward(*a, tb=TB))
    z, loss = fwd(x, w_enc, b_enc, w_dec, b_dec)
    jax.block_until_ready((z, loss))

    z_ref, loss_ref = _reference(x, w_enc, b_enc, w_dec, b_dec)
    assert z.shape == (B, D_z)
    assert jnp.allclose(z, z_ref, atol=1e-3, rtol=1e-3), float(
        jnp.max(jnp.abs(z - z_ref)))
    assert jnp.allclose(loss, loss_ref, atol=1e-3, rtol=1e-3), (
        float(loss), float(loss_ref))

    print("KERNEL_OK")
</pallas_src>

<mosaic_0001>
module attributes {stable_mosaic.version = 11 : i64} {
  func.func @pair_kernel(%arg0: i32, %arg1: memref<256x512xf32, #tpu.memory_space<vmem>>, %arg2: memref<512x256xbf16, #tpu.memory_space<vmem>>, %arg3: memref<1x256xf32, #tpu.memory_space<vmem>>, %arg4: memref<256x512xbf16, #tpu.memory_space<vmem>>, %arg5: memref<1x512xf32, #tpu.memory_space<vmem>>, %arg6: memref<256x256xf32, #tpu.memory_space<vmem>>, %arg7: memref<1x8x128xf32, #tpu.memory_space<vmem>>) attributes {dimension_semantics = [#tpu.dimension_semantics<parallel>], iteration_bounds = array<i64: 2>, scalar_prefetch = 0 : i64, scratch_operands = 0 : i64, tpu.core_type = #tpu.core_type<tc>, window_params = [{transform_indices = @transform_0, window_bounds = array<i64: 256, 512>}, {pipeline_mode = #tpu.pipeline_mode<synchronous>, transform_indices = @transform_1, window_bounds = array<i64: 512, 256>}, {pipeline_mode = #tpu.pipeline_mode<synchronous>, transform_indices = @transform_2, window_bounds = array<i64: 1, 256>}, {pipeline_mode = #tpu.pipeline_mode<synchronous>, transform_indices = @transform_3, window_bounds = array<i64: 256, 512>}, {pipeline_mode = #tpu.pipeline_mode<synchronous>, transform_indices = @transform_4, window_bounds = array<i64: 1, 512>}, {transform_indices = @transform_5, window_bounds = array<i64: 256, 256>}, {transform_indices = @transform_6, window_bounds = array<i64: 1, 8, 128>}]} {
    %c0 = arith.constant 0 : index
    %c0_0 = arith.constant 0 : index
    %0 = vector.load %arg1[%c0, %c0_0] : memref<256x512xf32, #tpu.memory_space<vmem>>, vector<256x512xf32>
    %1 = arith.truncf %0 : vector<256x512xf32> to vector<256x512xbf16>
    %c0_1 = arith.constant 0 : index
    %c0_2 = arith.constant 0 : index
    %2 = vector.load %arg2[%c0_1, %c0_2] : memref<512x256xbf16, #tpu.memory_space<vmem>>, vector<512x256xbf16>
    %cst = arith.constant dense<0.000000e+00> : vector<256x256xf32>
    %3 = tpu.matmul %1, %2, %cst {dimension_numbers = #tpu.dot_dimension_numbers<[1], [0], [0], [1], [0, 0, 1, 1], [], []>} : vector<256x512xbf16>, vector<512x256xbf16>, vector<256x256xf32> -> vector<256x256xf32>
    %c0_3 = arith.constant 0 : index
    %c0_4 = arith.constant 0 : index
    %4 = vector.load %arg3[%c0_3, %c0_4] : memref<1x256xf32, #tpu.memory_space<vmem>>, vector<1x256xf32>
    %5 = vector.broadcast %4 : vector<1x256xf32> to vector<256x256xf32>
    %6 = arith.addf %3, %5 : vector<256x256xf32>
    %cst_5 = arith.constant 0.000000e+00 : f32
    %7 = vector.broadcast %cst_5 : f32 to vector<256x256xf32>
    %8 = arith.maximumf %6, %7 : vector<256x256xf32>
    %c0_6 = arith.constant 0 : index
    %c0_7 = arith.constant 0 : index
    %9 = vector.load %arg6[%c0_6, %c0_7] : memref<256x256xf32, #tpu.memory_space<vmem>>, vector<256x256xf32>
    tpu.vector_store %arg6[%c0_6, %c0_7], %8 {strides = array<i32>} : memref<256x256xf32, #tpu.memory_space<vmem>>, vector<256x256xf32>,
    %10 = arith.truncf %8 : vector<256x256xf32> to vector<256x256xbf16>
    %c0_8 = arith.constant 0 : index
    %c0_9 = arith.constant 0 : index
    %11 = vector.load %arg4[%c0_8, %c0_9] : memref<256x512xbf16, #tpu.memory_space<vmem>>, vector<256x512xbf16>
    %cst_10 = arith.constant dense<0.000000e+00> : vector<256x512xf32>
    %12 = tpu.matmul %10, %11, %cst_10 {dimension_numbers = #tpu.dot_dimension_numbers<[1], [0], [0], [1], [0, 0, 1, 1], [], []>} : vector<256x256xbf16>, vector<256x512xbf16>, vector<256x512xf32> -> vector<256x512xf32>
    %c0_11 = arith.constant 0 : index
    %c0_12 = arith.constant 0 : index
    %13 = vector.load %arg5[%c0_11, %c0_12] : memref<1x512xf32, #tpu.memory_space<vmem>>, vector<1x512xf32>
    %14 = vector.broadcast %13 : vector<1x512xf32> to vector<256x512xf32>
    %15 = arith.addf %12, %14 : vector<256x512xf32>
    %16 = arith.subf %0, %15 : vector<256x512xf32>
    %17 = arith.mulf %16, %16 : vector<256x512xf32>
    %18 = vector.shape_cast %17 : vector<256x512xf32> to vector<1x256x512xf32>
    %cst_13 = arith.constant dense<0.000000e+00> : vector<1xf32>
    %19 = vector.multi_reduction <add>, %18, %cst_13 [1, 2] : vector<1x256x512xf32> to vector<1xf32>
    %20 = vector.shape_cast %19 : vector<1xf32> to vector<1x1x1xf32>
    %21 = vector.extract %20[0, 0, 0] : f32 from vector<1x1x1xf32>
    %22 = vector.broadcast %21 : f32 to vector<1x8x128xf32>
    %c0_14 = arith.constant 0 : index
    %c0_15 = arith.constant 0 : index
    %c0_16 = arith.constant 0 : index
    %23 = vector.load %arg7[%c0_14, %c0_15, %c0_16] : memref<1x8x128xf32, #tpu.memory_space<vmem>>, vector<1x8x128xf32>
    tpu.vector_store %arg7[%c0_14, %c0_15, %c0_16], %22 {strides = array<i32>} : memref<1x8x128xf32, #tpu.memory_space<vmem>>, vector<1x8x128xf32>,
    return
  }
  func.func @transform_0(%arg0: i32) -> (i32, i32) {
    %c0_i32 = arith.constant 0 : i32
    %c0_i32_0 = arith.constant 0 : i32
    return %arg0, %c0_i32 : i32, i32
  }
  func.func @transform_1(%arg0: i32) -> (i32, i32) {
    %c0_i32 = arith.constant 0 : i32
    %c0_i32_0 = arith.constant 0 : i32
    %c0_i32_1 = arith.constant 0 : i32
    return %c0_i32, %c0_i32_0 : i32, i32
  }
  func.func @transform_2(%arg0: i32) -> (i32, i32) {
    %c0_i32 = arith.constant 0 : i32
    %c0_i32_0 = arith.constant 0 : i32
    %c0_i32_1 = arith.constant 0 : i32
    return %c0_i32, %c0_i32_0 : i32, i32
  }
  func.func @transform_3(%arg0: i32) -> (i32, i32) {
    %c0_i32 = arith.constant 0 : i32
    %c0_i32_0 = arith.constant 0 : i32
    %c0_i32_1 = arith.constant 0 : i32
    return %c0_i32, %c0_i32_0 : i32, i32
  }
  func.func @transform_4(%arg0: i32) -> (i32, i32) {
    %c0_i32 = arith.constant 0 : i32
    %c0_i32_0 = arith.constant 0 : i32
    %c0_i32_1 = arith.constant 0 : i32
    return %c0_i32, %c0_i32_0 : i32, i32
  }
  func.func @transform_5(%arg0: i32) -> (i32, i32) {
    %c0_i32 = arith.constant 0 : i32
    %c0_i32_0 = arith.constant 0 : i32
    return %arg0, %c0_i32 : i32, i32
  }
  func.func @transform_6(%arg0: i32) -> (i32, i32, i32) {
    %c0_i32 = arith.constant 0 : i32
    %c0_i32_0 = arith.constant 0 : i32
    %c0_i32_1 = arith.constant 0 : i32
    return %arg0, %c0_i32, %c0_i32_0 : i32, i32, i32
  }
}

</mosaic_0001>

<bundles_post_ra>
// kernel: _lambda_.1
= control target key start
LH: loop header
LB: loop body
LE: loop exit
PB: predicated region body
PF: predicated region fallthrough
CT: control target
= control target key end

     0   :  { %s5005_s0 = inlined_call_operand.hbm [shape: f32[512,512], index: 0, kind: input, shape index: {}]   ;;  %s5006_s1 = inlined_call_operand.hbm [shape: bf16[512,256], index: 1, kind: input, shape index: {}]   ;;  %s5007_s2 = inlined_call_operand.vmem [shape: f32[1,256], index: 2, kind: input, shape index: {}]   ;;  %s5008_s3 = inlined_call_operand.hbm [shape: bf16[256,512], index: 3, kind: input, shape index: {}]   ;;  %s5009_s4 = inlined_call_operand.hbm [shape: f32[1,512], index: 4, kind: input, shape index: {}]   ;;  %s5010_s5 = inlined_call_operand.hbm [shape: f32[512,256], index: 5, kind: output, shape index: {0}]   ;;  %s5011_s6 = inlined_call_operand.vmem [shape: f32[2,8,128], index: 6, kind: output, shape index: {1}]  }
   0x1   :  { %5015 = sst [smem:[#allocation38_spill]] %s5006_s1 }
   0x2   :  { %12 = vsyncpa [#allocation3], 0 }
   0x3   :  { %14 = vsyncpa [#allocation3 + $0x1], 0 }
   0x4   :  { %15 = vsyncpa [#allocation6], 0 }
   0x5   :  { %16 = vsyncpa [#allocation9], 0 }
   0x6   :  { %17 = vsyncpa [#allocation4], 0 }
   0x7   :  { %19 = vsyncpa [#allocation4 + $0x1], 0  ;;  %s3722_s21 = smov 0   ;;  %s3724_s22 = smov 0  }
   0x8   :  { %s3726_s23 = smov 0   ;;  %s3728_s24 = smov 0  }
   0x9 LB: > { %s3743_s25 = sadd.s32 4294967295, %s3672_s24   ;;  %s2794_s26 = sadd.s32 4294967294, %s3672_s24   ;;  %s3672_s24 = sphi %s3728_s24, %s5082_s24   ;;  %s3668_s23 = sphi %s3726_s23, %s5081_s23   ;;  %s3664_s22 = sphi %s3724_s22, %s5080_s22   ;;  %s3660_s21 = sphi %s3722_s21, %s5079_s21  }
   0xa   : > { %p45_p0 = scmp.ne.s32.totalorder %s3664_s22, %s3660_s21  ;;  %p5012_p1 = scmp.eq.s32.totalorder %s3743_s25, 0 }
   0xb   : > { %p159_p3 = scmp.eq.s32.totalorder %s2794_s26, 1  ;;  %p2795_p5 = scmp.ge.s32.totalorder %s3672_s24, 1 }
   0xc   : > { %p3752_p4 = por %p5012_p1, %p45_p0  ;;  %p192_p7 = scmp.lt.s32.totalorder %s3672_s24, 3 }
   0xd   : > { %p3757_p6 = por %p159_p3, %p45_p0  ;;  %s3674_s30 = smov [#allocation5]  }
   0xe   : > { %s5016_s27 = scalar_select %p3752_p4, 1, 0 }
   0xf   : > { %s5017_s28 = scalar_select %p3757_p6, 1, 0 }
  0x10   : > { %p3762_p8 = pnand %p2795_p5, %p192_p7  ;;  %s204_s7 = sshll.u32 %s3674_s30, 4  ;;  %s3766_s7 = int_to_ptr.vmem [resolvable:$true] %s204_s7 }
  0x11   : > { %s3675_s9 = smov [#allocation7]   ;;  %s5020_s1 = sld [smem:[#allocation38_spill]] }
  0x12   : > { %s5018_s29 = scalar_select %p3762_p8, 1, 0 }
  0x13   : > { %p3095_p9 = pneg %p3762_p8  ;;  %s220_s10 = sshll.u32 %s3675_s9, 4  ;;  %s3777_s10 = int_to_ptr.vmem [resolvable:$true] %s220_s10 }
  0x15   : > { %p3773_p11 = pnand %p3095_p9, %p5012_p1 }
  0x17   : > { %s3484_s13 = scalar_lea.hbm %s5020_s1, 8192  ;;  %p3787_p13 = pneg %p3773_p11 }
  0x18   : > { %p3485_p12 = scmp.ne.s32.totalorder %s5020_s1, %s3484_s13  ;;  %p3491_p5 = scmp.lt.u32.totalorder %s3484_s13, %s5020_s1 }
  0x1a   : > { %p3487_p0 = pnand %p3787_p13, %p3485_p12 }
  0x1c   : > { %p3488_p3 = pneg %p3487_p0 }
  0x1e   : > { %p3493_p7 = pnand %p3491_p5, %p3488_p3 }
  0x20   : > { %3496 = shalt.err (!%p3493_p7)
}
  0x21   : > { %s3497_s19 = scalar_lea.vmem %s3766_s7, 8192  ;;  %p3505_p2 = scmp.lt.s32.totalorder %s3766_s7, %s3766_s7 }
  0x22   : > { %p3498_p9 = scmp.ne.s32.totalorder %s3766_s7, %s3497_s19  ;;  %p3506_p6 = scmp.lt.s32.totalorder %s3497_s19, %s3497_s19 }
  0x24   : > { %p3500_p10 = pnand %p3498_p9, %p3787_p13  ;;  %p3507_p12 = por %p3506_p6, %p3505_p2 }
  0x26   : > { %p3501_p1 = pneg %p3500_p10 }
  0x28   : > { %p3508_p0 = pnand %p3507_p12, %p3501_p1 }
  0x2a   : > { %3511 = shalt.err (!%p3508_p0)
}
  0x2b   : > { %s3676_s20 = smov 128   ;;  %s3677_s26 = smov 8  }
  0x2c   : > { %3098 = dma.hbm_to_vmem [thread:$0]  (!%p3773_p11), %s5020_s1, 8192, %s3766_s7, [#allocation6], %s3676_s20, %s3676_s20, %s3677_s26  }
  0x2d   : > { %s3512_s13 = scalar_lea.hbm %s5008_s3, 8192 }
  0x2e   : > { %p3513_p2 = scmp.ne.s32.totalorder %s5008_s3, %s3512_s13  ;;  %p3519_p10 = scmp.lt.u32.totalorder %s3512_s13, %s5008_s3 }
  0x30   : > { %p3515_p1 = pnand %p3513_p2, %p3787_p13 }
  0x32   : > { %p3516_p6 = pneg %p3515_p1 }
  0x34   : > { %p3521_p3 = pnand %p3519_p10, %p3516_p6 }
  0x36   : > { %3524 = shalt.err (!%p3521_p3)
}
  0x37   : > { %s3525_s7 = scalar_lea.vmem %s3777_s10, 8192  ;;  %p3533_p12 = scmp.lt.s32.totalorder %s3777_s10, %s3777_s10 }
  0x38   : > { %p3526_p5 = scmp.ne.s32.totalorder %s3777_s10, %s3525_s7  ;;  %p3534_p0 = scmp.lt.s32.totalorder %s3525_s7, %s3525_s7 }
  0x3a   : > { %p3528_p7 = pnand %p3526_p5, %p3787_p13  ;;  %p3535_p2 = por %p3534_p0, %p3533_p12 }
  0x3c   : > { %p3529_p9 = pneg %p3528_p7 }
  0x3e   : > { %p3536_p1 = pnand %p3535_p2, %p3529_p9 }
  0x40   : > { %3539 = shalt.err (!%p3536_p1)
}
  0x41   : > { %s3678_s19 = smov 256   ;;  %s3679_s20 = smov 16  }
  0x42   : > { %3101 = dma.hbm_to_vmem [thread:$0]  (!%p3773_p11), %s5008_s3, 8192, %s3777_s10, [#allocation6], %s3678_s19, %s3678_s19, %s3679_s20  }
  0x43   : > { %s3680_s9 = smov [#allocation8]   ;;  %s3832_s12 = sadd.s32 1, %s3672_s24  }
  0x44   : > { %s234_s11 = sshll.u32 %s3680_s9, 4  ;;  %s3540_s15 = scalar_lea.hbm %s5009_s4, 64  ;;  %s235_s11 = int_to_ptr.vmem [resolvable:$true] %s234_s11 }
  0x45   : > { %p3541_p6 = scmp.ne.s32.totalorder %s5009_s4, %s3540_s15  ;;  %p3547_p5 = scmp.lt.u32.totalorder %s3540_s15, %s5009_s4 }
  0x47   : > { %p3543_p10 = pnand %p3541_p6, %p3787_p13 }
  0x49   : > { %p3544_p3 = pneg %p3543_p10 }
  0x4b   : > { %p3549_p7 = pnand %p3547_p5, %p3544_p3 }
  0x4d   : > { %3552 = shalt.err (!%p3549_p7)
}
  0x4e   : > { %s3553_s10 = scalar_lea.vmem %s235_s11, 64  ;;  %p3561_p2 = scmp.lt.s32.totalorder %s235_s11, %s235_s11 }
  0x4f   : > { %p3554_p9 = scmp.ne.s32.totalorder %s235_s11, %s3553_s10  ;;  %p3562_p1 = scmp.lt.s32.totalorder %s3553_s10, %s3553_s10 }
  0x51   : > { %p3556_p12 = pnand %p3554_p9, %p3787_p13  ;;  %p3563_p4 = por %p3562_p1, %p3561_p2 }
  0x53   : > { %p3557_p0 = pneg %p3556_p12 }
  0x55   : > { %p3564_p8 = pnand %p3563_p4, %p3557_p0 }
  0x57   : > { %3567 = shalt.err (!%p3564_p8)
}
  0x58   : > { %3104 = dma.hbm_to_vmem [thread:$0]  (!%p3773_p11), %s5009_s4, 64, %s235_s11, [#allocation9]  }
  0x59   : > { %s29_s1 = ssub.s32 %s3672_s24, %s3832_s12  ;;  %s32_s16 = sadd.s32 1, %s3668_s23 }
  0x5a   : > { %p30_p4 = scmp.eq.s32.totalorder %s29_s1, 0  ;;  %p39_p8 = scmp.ne.s32.totalorder %s3668_s23, %s3664_s22 }
  0x5b   : > { %p40_p13 = scmp.eq.s32.totalorder %s3672_s24, 0  ;;  %p3116_p6 = scmp.lt.s32.totalorder %s3672_s24, 2 }
  0x5c   : > { %s3860_s8 = scalar_select %p30_p4, %s3668_s23, %s32_s16  }
  0x5d   : > { %p41_p10 = por %p40_p13, %p39_p8  ;;  %p5022_p3 = scmp.eq.s32.totalorder %s3743_s25, 1 }
  0x5e   : > { %s245_s30 = sand.u32 1, %s3668_s23   ;;  %s2946_s9 = sshll.u32 %s3672_s24, 14 }
  0x5f   : > { %p3864_p5 = por %p5022_p3, %p39_p8  ;;  %s2800_s13 = sshll.u32 %s245_s30, 10 }
  0x60   : > { %s3873_s11 = scalar_lea.hbm %s5005_s0, %s2946_s9  ;;  %s249_s17 = scalar_lea.vmem [#allocation2], %s2800_s13 }
  0x61   : > { %s257_s18 = sshll.u32 %s249_s17, 4  ;;  %p3875_p11 = pnand %p3116_p6, %p41_p10  ;;  %s3879_s18 = int_to_ptr.vmem [resolvable:$true] %s257_s18 }
  0x62   : > { %s3881_s10 = scalar_lea.sflag [#allocation3], %s245_s30  ;;  %s3568_s19 = scalar_lea.hbm %s3873_s11, 16384 }
  0x63   : > { %p3569_p7 = scmp.ne.s32.totalorder %s3873_s11, %s3568_s19  ;;  %p3570_p9 = pneg %p3875_p11 }
  0x64   : > { %s3573_s16 = scalar_lea.hbm %s5005_s0, 32768  ;;  %p3574_p2 = scmp.lt.u32.totalorder %s3873_s11, %s5005_s0 }
  0x65   : > { %p3571_p12 = pnand %p3570_p9, %p3569_p7  ;;  %p3575_p1 = scmp.lt.u32.totalorder %s3573_s16, %s3568_s19 }
  0x66   : > { %p3577_p8 = scmp.lt.u32.totalorder %s3568_s19, %s3873_s11 }
  0x67   : > { %p3572_p0 = pneg %p3571_p12  ;;  %p3576_p4 = por %p3575_p1, %p3574_p2 }
  0x69   : > { %p3578_p13 = por %p3577_p8, %p3576_p4 }
  0x6b   : > { %p3579_p6 = pnand %p3578_p13, %p3572_p0 }
  0x6d   : > { %3582 = shalt.err (!%p3579_p6)
}
  0x6e   : > { %s3583_s30 = scalar_lea.vmem %s3879_s18, 16384  ;;  %s3681_s14 = smov [#allocation2]  }
  0x6f   : > { %p3584_p10 = scmp.ne.s32.totalorder %s3879_s18, %s3583_s30  ;;  %s3588_s15 = sshll.u32 %s3681_s14, 4  ;;  %s3589_s15 = int_to_ptr.vmem [resolvable:$false] %s3588_s15 }
  0x70   : > { %s3590_s17 = scalar_lea.vmem %s3589_s15, 32768  ;;  %p3591_p12 = scmp.lt.s32.totalorder %s3879_s18, %s3589_s15 }
  0x71   : > { %p3586_p3 = pnand %p3584_p10, %p3570_p9  ;;  %p3592_p2 = scmp.lt.s32.totalorder %s3590_s17, %s3583_s30 }
  0x73   : > { %p3587_p7 = pneg %p3586_p3  ;;  %p3593_p1 = por %p3592_p2, %p3591_p12 }
  0x75   : > { %p3594_p4 = pnand %p3593_p1, %p3587_p7 }
  0x77   : > { %3597 = shalt.err (!%p3594_p4)
}
  0x78   : > { %s3682_s19 = smov 512   ;;  %s3683_s20 = smov 32  }
  0x79   : > { %3108 = dma.hbm_to_vmem [thread:$0]  (!%p3875_p11), %s3873_s11, 16384, %s3879_s18, %s3881_s10, %s3682_s19, %s3682_s19, %s3683_s20  }
  0x7a   : > { %p5025_p9 = scmp.ne.s32.totalorder %s5018_s29, 0 }
  0x7c   : > { %269 = sbr.rel (%p5025_p9) target bundleno = 1361 (0x551), region = 40 }
  0x83   : > { %s3912_s1 = sand.u32 1, %s3664_s22   ;;  %p5026_p0 = scmp.ne.s32.totalorder %s5016_s27, 0 }
  0x84   : > { %s2805_s16 = sshll.u32 %s3912_s1, 10  ;;  %s272_s9 = scalar_lea.sflag [#allocation3], %s3912_s1 }
  0x85   : > { %s3916_s13 = scalar_lea.vmem [#allocation2], %s2805_s16 }
  0x86   : > { %3643 = dma.done.wait (%p5026_p0), %s272_s9, 16384  }
  0x87   : > { %3645 = vsyncadd (%p5026_p0), %s272_s9, 4294950912  ;;  %p5027_p11 = scmp.eq.s32.totalorder %s3743_s25, 0 }
  0x89   : > { %3647 = dma.done.wait (%p5027_p11), [#allocation6], 16384   ;;  %p5028_p8 = pmov %p5027_p11 }
  0x8b   : > { %3649 = vsyncadd (%p5028_p8), [#allocation6], 4294950912  ;;  %p5029_p13 = pmov %p5028_p8 }
  0x8c   : > { %p5030_p6 = pmov %p5028_p8 }
  0x8d   : > { %3651 = dma.done.wait (%p5029_p13), [#allocation9], 64  }
  0x8e   : > { %3653 = vsyncadd (%p5030_p6), [#allocation9], 4294967232  ;;  %v3164_v0 = vld [vmem:[#allocation5 + $0x4] ss:$8 sps:$4 sm:$0xff]   ;;  %v3166_v1 = vld [vmem:[#allocation5] ss:$8 sps:$4 sm:$0xff]  }
  0x8f   : > { %914 = vmatprep.subr.bf16.mxu0 %v3164_v0  ;;  %v3167_v2 = vld [vmem:[#allocation5 + $0x14] ss:$8 sps:$4 sm:$0xff]   ;;  %v3169_v3 = vld [vmem:[#allocation5 + $0x10] ss:$8 sps:$4 sm:$0xff]   ;;  %v3170_v4 = vld [vmem:[#allocation5 + $0x24] ss:$8 sps:$4 sm:$0xff]  }
  0x90   : > { %915 = vmatpush1.bf16.msra.mxu0 %v3166_v1  ;;  %v3172_v5 = vld [vmem:[#allocation5 + $0x20] ss:$8 sps:$4 sm:$0xff]   ;;  %v3173_v6 = vld [vmem:[#allocation5 + $0x34] ss:$8 sps:$4 sm:$0xff]   ;;  %v3175_v7 = vld [vmem:[#allocation5 + $0x30] ss:$8 sps:$4 sm:$0xff]  }
  0x91   : > { %916 = vmatprep.subr.bf16.mxu0 %v3167_v2  ;;  %v3176_v8 = vld [vmem:[#allocation5 + $0x44] ss:$8 sps:$4 sm:$0xff]   ;;  %v3178_v9 = vld [vmem:[#allocation5 + $0x40] ss:$8 sps:$4 sm:$0xff]   ;;  %v3179_v10 = vld [vmem:[#allocation5 + $0x54] ss:$8 sps:$4 sm:$0xff]  }
  0x92   : > { %v3181_v11 = vld [vmem:[#allocation5 + $0x50] ss:$8 sps:$4 sm:$0xff]   ;;  %v3182_v12 = vld [vmem:[#allocation5 + $0x64] ss:$8 sps:$4 sm:$0xff]   ;;  %v3184_v16 = vld [vmem:[#allocation5 + $0x60] ss:$8 sps:$4 sm:$0xff]  }
  0x93   : > { %v327_v13 = vld [vmem:[%s3916_s13 + $0x8] sm:$0xff]  ;;  %v3185_v17 = vld [vmem:[#allocation5 + $0x74] ss:$8 sps:$4 sm:$0xff]   ;;  %v3187_v18 = vld [vmem:[#allocation5 + $0x70] ss:$8 sps:$4 sm:$0xff]   ;;  %s2809_s11 = sshll.u32 %s3912_s1, 9 }
  0x94   : > { %917 = vmatpush1.bf16.msra.mxu0 %v3169_v3  ;;  %v331_v14 = vld [vmem:[%s3916_s13 + $0x28] sm:$0xff]  ;;  %v3191_v21 = vld [vmem:[#allocation5 + $0x94] ss:$8 sps:$4 sm:$0xff]   ;;  %v3193_v22 = vld [vmem:[#allocation5 + $0x90] ss:$8 sps:$4 sm:$0xff]   ;;  %s4078_s18 = scalar_lea.vmem [#allocation10], %s2809_s11 }
  0x95   : > { %918 = vmatprep.subr.bf16.mxu0 %v3170_v4  ;;  %v455_v15 = vpack.c.bf16 %v331_v14, %v327_v13  ;;  %v3188_v19 = vld [vmem:[#allocation5 + $0x84] ss:$8 sps:$4 sm:$0xff]   ;;  %v3190_v20 = vld [vmem:[#allocation5 + $0x80] ss:$8 sps:$4 sm:$0xff]   ;;  %v3197_v25 = vld [vmem:[#allocation5 + $0xb4] ss:$8 sps:$4 sm:$0xff]  }
  0x96   : > { %v3194_v23 = vld [vmem:[#allocation5 + $0xa4] ss:$8 sps:$4 sm:$0xff]   ;;  %v3196_v24 = vld [vmem:[#allocation5 + $0xa0] ss:$8 sps:$4 sm:$0xff]   ;;  %v3199_v26 = vld [vmem:[#allocation5 + $0xb0] ss:$8 sps:$4 sm:$0xff]  }
  0x97   : > { %946 = vmatprep.mubr.bf16.mxu0 %v455_v15  ;;  %v3200_v27 = vld [vmem:[#allocation5 + $0xc4] ss:$8 sps:$4 sm:$0xff]   ;;  %v3202_v28 = vld [vmem:[#allocation5 + $0xc0] ss:$8 sps:$4 sm:$0xff]   ;;  %v3203_v29 = vld [vmem:[#allocation5 + $0xd4] ss:$8 sps:$4 sm:$0xff]  }
  0x98   : > { %919 = vmatpush1.bf16.msra.mxu0 %v3172_v5  ;;  %v3205_v30 = vld [vmem:[#allocation5 + $0xd0] ss:$8 sps:$4 sm:$0xff]   ;;  %v3206_v31 = vld [vmem:[#allocation5 + $0xe4] ss:$8 sps:$4 sm:$0xff]   ;;  %v3208_v32 = vld [vmem:[#allocation5 + $0xe0] ss:$8 sps:$4 sm:$0xff]  }
  0x99   : > { %920 = vmatprep.subr.bf16.mxu0 %v3173_v6  ;;  %v3209_v33 = vld [vmem:[#allocation5 + $0xf4] ss:$8 sps:$4 sm:$0xff]   ;;  %v3211_v34 = vld [vmem:[#allocation5 + $0xf0] ss:$8 sps:$4 sm:$0xff]   ;;  %v326_v35 = vld [vmem:[%s3916_s13] sm:$0xff]  ;;  %s2948_s7 = sshll.u32 %s3743_s25, 13 }
  0x9a   : > { %v330_v36 = vld [vmem:[%s3916_s13 + $0x20] sm:$0xff]  ;;  %v335_v38 = vld [vmem:[%s3916_s13 + $0x48] sm:$0xff]  ;;  %v3217_v43 = vld [vmem:[#allocation5 + $0x114] ss:$8 sps:$4 sm:$0xff]   ;;  %s2665_s10 = sshll.u32 %s4078_s18, 4  ;;  %s4954_s15 = scalar_lea.hbm %s5010_s5, %s2948_s7  ;;  %s4956_s10 = int_to_ptr.vmem [resolvable:$true] %s2665_s10 }
  0x9b   : > { %v3214_v37 = vld [vmem:[#allocation5 + $0x104] ss:$8 sps:$4 sm:$0xff]   ;;  %v454_v40 = vpack.c.bf16 %v330_v36, %v326_v35  ;;  %v3212_v41 = vld [vmem:[#allocation5 + $0x100] ss:$8 sps:$4 sm:$0xff]   ;;  %v3215_v46 = vld [vmem:[#allocation5 + $0x110] ss:$8 sps:$4 sm:$0xff]  }
  0x9c   : > { %921 = vmatpush1.bf16.msra.mxu0 %v3175_v7  ;;  %v339_v39 = vld [vmem:[%s3916_s13 + $0x68] sm:$0xff]  ;;  %v334_v44 = vld [vmem:[%s3916_s13 + $0x40] sm:$0xff]  ;;  %v3223_v52 = vld [vmem:[#allocation5 + $0x134] ss:$8 sps:$4 sm:$0xff]   ;;  %s2647_s17 = scalar_lea.sflag [#allocation4], %s3912_s1  ;;  %s3598_s19 = scalar_lea.vmem %s4956_s10, 8192 }
  0x9d   : > { %922 = vmatprep.subr.bf16.mxu0 %v3176_v8  ;;  %v459_v42 = vpack.c.bf16 %v339_v39, %v335_v38  ;;  %v338_v45 = vld [vmem:[%s3916_s13 + $0x60] sm:$0xff]  ;;  %v343_v47 = vld [vmem:[%s3916_s13 + $0x88] sm:$0xff]  ;;  %v3221_v58 = vld [vmem:[#allocation5 + $0x130] ss:$8 sps:$4 sm:$0xff]   ;;  %p3599_p10 = scmp.ne.s32.totalorder %s4956_s10, %s3598_s19  ;;  %s3684_s20 = smov [#allocation10]  }
  0x9e   : > { %v347_v48 = vld [vmem:[%s3916_s13 + $0xa8] sm:$0xff]  ;;  %v458_v51 = vpack.c.bf16 %v338_v45, %v334_v44  ;;  %v342_v54 = vld [vmem:[%s3916_s13 + $0x80] sm:$0xff]  ;;  %v3229_v62 = vld [vmem:[#allocation5 + $0x154] ss:$8 sps:$4 sm:$0xff]   ;;  %s3602_s16 = sshll.u32 %s3684_s20, 4  ;;  %s3603_s16 = int_to_ptr.vmem [resolvable:$false] %s3602_s16 }
  0x9f   : > { %v3220_v49 = vld [vmem:[#allocation5 + $0x124] ss:$8 sps:$4 sm:$0xff]   ;;  %v3218_v50 = vld [vmem:[#allocation5 + $0x120] ss:$8 sps:$4 sm:$0xff]   ;;  %v463_v53 = vpack.c.bf16 %v347_v48, %v343_v47  ;;  %v3227_v4 = vld [vmem:[#allocation5 + $0x150] ss:$8 sps:$4 sm:$0xff]   ;;  %p3600_p3 = pnand %p3599_p10, %p3864_p5  ;;  %p3605_p12 = scmp.lt.s32.totalorder %s4956_s10, %s3603_s16 }
  0xa0   : > { %923 = vmatpush1.bf16.msra.mxu0 %v3178_v9  ;;  %v346_v55 = vld [vmem:[%s3916_s13 + $0xa0] sm:$0xff]  ;;  %v351_v56 = vld [vmem:[%s3916_s13 + $0xc8] sm:$0xff]  ;;  %v3235_v8 = vld [vmem:[#allocation5 + $0x174] ss:$8 sps:$4 sm:$0xff]   ;;  %s3604_s9 = scalar_lea.vmem %s3603_s16, 16384 }
  0xa1   : > { %924 = vmatprep.subr.bf16.mxu0 %v3179_v10  ;;  %v355_v57 = vld [vmem:[%s3916_s13 + $0xe8] sm:$0xff]  ;;  %v462_v61 = vpack.c.bf16 %v346_v55, %v342_v54  ;;  %v350_v0 = vld [vmem:[%s3916_s13 + $0xc0] sm:$0xff]  ;;  %v3253_v39 = vld [vmem:[#allocation5 + $0x1d4] ss:$8 sps:$4 sm:$0xff]   ;;  %p3601_p7 = pneg %p3600_p3  ;;  %p3606_p2 = scmp.lt.s32.totalorder %s3604_s9, %s3598_s19 }
  0xa2   : > { %v3226_v59 = vld [vmem:[#allocation5 + $0x144] ss:$8 sps:$4 sm:$0xff]   ;;  %v3224_v60 = vld [vmem:[#allocation5 + $0x140] ss:$8 sps:$4 sm:$0xff]   ;;  %v467_v63 = vpack.c.bf16 %v355_v57, %v351_v56 }
  0xa3   : > { %v354_v1 = vld [vmem:[%s3916_s13 + $0xe0] sm:$0xff]  ;;  %v359_v2 = vld [vmem:[%s3916_s13 + $0x108] sm:$0xff]  ;;  %p3607_p1 = por %p3606_p2, %p3605_p12 }
  0xa4   : > { %925 = vmatpush1.bf16.msra.mxu0 %v3181_v11  ;;  %v363_v3 = vld [vmem:[%s3916_s13 + $0x128] sm:$0xff]  ;;  %v466_v7 = vpack.c.bf16 %v354_v1, %v350_v0  ;;  %v358_v10 = vld [vmem:[%s3916_s13 + $0x100] sm:$0xff] }
  0xa5   : > { %926 = vmatprep.subr.bf16.mxu0 %v3182_v12  ;;  %v3232_v5 = vld [vmem:[#allocation5 + $0x164] ss:$8 sps:$4 sm:$0xff]   ;;  %v3230_v6 = vld [vmem:[#allocation5 + $0x160] ss:$8 sps:$4 sm:$0xff]   ;;  %v471_v9 = vpack.c.bf16 %v363_v3, %v359_v2  ;;  %v3233_v12 = vld [vmem:[#allocation5 + $0x170] ss:$8 sps:$4 sm:$0xff]   ;;  %p3608_p4 = pnand %p3607_p1, %p3601_p7 }
  0xa6   : > { %v362_v11 = vld [vmem:[%s3916_s13 + $0x120] sm:$0xff]  ;;  %v367_v13 = vld [vmem:[%s3916_s13 + $0x148] sm:$0xff] }
  0xa7   : > { %v371_v14 = vld [vmem:[%s3916_s13 + $0x168] sm:$0xff]  ;;  %v398_v57 = vld [vmem:[%s3916_s13 + $0x240] sm:$0xff] }
  0xa8   : > { %927 = vmatpush1.bf16.msra.mxu0 %v3184_v16  ;;  %v3238_v15 = vld [vmem:[#allocation5 + $0x184] ss:$8 sps:$4 sm:$0xff]   ;;  %v470_v16 = vpack.c.bf16 %v362_v11, %v358_v10  ;;  %v3248_v38 = vld [vmem:[#allocation5 + $0x1c0] ss:$8 sps:$4 sm:$0xff]  }
  0xa9   : > { %928 = vmatprep.subr.bf16.mxu0 %v3185_v17  ;;  %v475_v17 = vpack.c.bf16 %v371_v14, %v367_v13  ;;  %v3250_v35 = vld [vmem:[#allocation5 + $0x1c4] ss:$8 sps:$4 sm:$0xff]   ;;  %v3254_v48 = vld [vmem:[#allocation5 + $0x1e0] ss:$8 sps:$4 sm:$0xff]  }
  0xaa   : > { %v395_v44 = vld [vmem:[%s3916_s13 + $0x228] sm:$0xff]  ;;  %v410_v0 = vld [vmem:[%s3916_s13 + $0x2a0] sm:$0xff] }
  0xab   : > { %v3256_v45 = vld [vmem:[#allocation5 + $0x1e4] ss:$8 sps:$4 sm:$0xff]  }
  0xac   : > { %929 = vmatpush1.bf16.msra.mxu0 %v3187_v18  ;;  %v3236_v18 = vld [vmem:[#allocation5 + $0x180] ss:$8 sps:$4 sm:$0xff]  }
  0xad   : > { %930 = vmatprep.subr.bf16.mxu0 %v3188_v19  ;;  %v3241_v19 = vld [vmem:[#allocation5 + $0x194] ss:$8 sps:$4 sm:$0xff]   ;;  %v403_v54 = vld [vmem:[%s3916_s13 + $0x268] sm:$0xff]  ;;  %v422_v11 = vld [vmem:[%s3916_s13 + $0x300] sm:$0xff] }
  0xae   : > { %v415_v1 = vld [vmem:[%s3916_s13 + $0x2c8] sm:$0xff] }
  0xaf   : > { %v419_v2 = vld [vmem:[%s3916_s13 + $0x2e8] sm:$0xff] }
  0xb0   : > { %931 = vmatpush1.bf16.msra.mxu0 %v3190_v20  ;;  %v366_v20 = vld [vmem:[%s3916_s13 + $0x140] sm:$0xff]  ;;  %v431_v13 = vld [vmem:[%s3916_s13 + $0x348] sm:$0xff] }
  0xb1   : > { %932 = vmatprep.subr.bf16.mxu0 %v3191_v21  ;;  %v370_v21 = vld [vmem:[%s3916_s13 + $0x160] sm:$0xff]  ;;  %v435_v14 = vld [vmem:[%s3916_s13 + $0x368] sm:$0xff] }
  0xb4   : > { %933 = vmatpush1.bf16.msra.mxu0 %v3193_v22  ;;  %v3239_v22 = vld [vmem:[#allocation5 + $0x190] ss:$8 sps:$4 sm:$0xff]  }
  0xb5   : > { %934 = vmatprep.subr.bf16.mxu0 %v3194_v23  ;;  %v375_v23 = vld [vmem:[%s3916_s13 + $0x188] sm:$0xff] }
  0xb8   : > { %935 = vmatpush1.bf16.msra.mxu0 %v3196_v24  ;;  %v379_v24 = vld [vmem:[%s3916_s13 + $0x1a8] sm:$0xff] }
  0xb9   : > { %936 = vmatprep.subr.bf16.mxu0 %v3197_v25  ;;  %v3244_v25 = vld [vmem:[#allocation5 + $0x1a4] ss:$8 sps:$4 sm:$0xff]  }
  0xbc   : > { %937 = vmatpush1.bf16.msra.mxu0 %v3199_v26  ;;  %v474_v26 = vpack.c.bf16 %v370_v21, %v366_v20  ;;  %v443_v20 = vld [vmem:[%s3916_s13 + $0x3a8] sm:$0xff] }
  0xbd   : > { %938 = vmatprep.subr.bf16.mxu0 %v3200_v27  ;;  %v479_v27 = vpack.c.bf16 %v379_v24, %v375_v23  ;;  %v438_v23 = vld [vmem:[%s3916_s13 + $0x380] sm:$0xff] }
  0xbe   : > { %v442_v24 = vld [vmem:[%s3916_s13 + $0x3a0] sm:$0xff] }
  0xc0   : > { %939 = vmatpush1.bf16.msra.mxu0 %v3202_v28  ;;  %v3242_v28 = vld [vmem:[#allocation5 + $0x1a0] ss:$8 sps:$4 sm:$0xff]  }
  0xc1   : > { %940 = vmatprep.subr.bf16.mxu0 %v3203_v29  ;;  %v3247_v29 = vld [vmem:[#allocation5 + $0x1b4] ss:$8 sps:$4 sm:$0xff]  }
  0xc4   : > { %941 = vmatpush1.bf16.msra.mxu0 %v3205_v30  ;;  %v374_v30 = vld [vmem:[%s3916_s13 + $0x180] sm:$0xff] }
  0xc5   : > { %942 = vmatprep.subr.bf16.mxu0 %v3206_v31  ;;  %v378_v31 = vld [vmem:[%s3916_s13 + $0x1a0] sm:$0xff] }
  0xc6   : > { %v478_v36 = vpack.c.bf16 %v378_v31, %v374_v30  ;;  %v450_v30 = vld [vmem:[%s3916_s13 + $0x3e0] sm:$0xff]  ;;  %v329_v31 = vld [vmem:[%s3916_s13 + $0x18] sm:$0xff] }
  0xc8   : > { %943 = vmatpush1.bf16.msra.mxu0 %v3208_v32  ;;  %v3245_v32 = vld [vmem:[#allocation5 + $0x1b0] ss:$8 sps:$4 sm:$0xff]  }
  0xc9   : > { %944 = vmatprep.subr.bf16.mxu0 %v3209_v33  ;;  %v383_v33 = vld [vmem:[%s3916_s13 + $0x1c8] sm:$0xff] }
  0xcc   : > { %945 = vmatpush1.bf16.msra.mxu0 %v3211_v34  ;;  %v387_v34 = vld [vmem:[%s3916_s13 + $0x1e8] sm:$0xff] }
  0xcd   : > { %1107 = vmatprep.subr.bf16.mxu0 %v3214_v37  ;;  %v483_v37 = vpack.c.bf16 %v387_v34, %v383_v33 }
  0xcf   : > { %947 = vmatmul.mubr.bf16.vlgmr.msra.gmra.mrb[0].mxu0 %v454_v40  ;;  %v382_v40 = vld [vmem:[%s3916_s13 + $0x1c0] sm:$0xff] }
  0xd0   : > { %1108 = vmatpush1.bf16.msra.mxu0 %v3212_v41  ;;  %956 = vmatprep.mubr.bf16.mxu0 %v459_v42  ;;  %v386_v41 = vld [vmem:[%s3916_s13 + $0x1e0] sm:$0xff]  ;;  %v3251_v42 = vld [vmem:[#allocation5 + $0x1d0] ss:$8 sps:$4 sm:$0xff]  }
  0xd1   : > { %1109 = vmatprep.subr.bf16.mxu0 %v3217_v43  ;;  %v391_v43 = vld [vmem:[%s3916_s13 + $0x208] sm:$0xff] }
  0xd2   : > { %v487_v47 = vpack.c.bf16 %v395_v44, %v391_v43  ;;  %v3266_v44 = vld [vmem:[#allocation7 + $0x44] ss:$16 sps:$4 sm:$0xff]  }
  0xd4   : > { %1110 = vmatpush1.bf16.msra.mxu0 %v3215_v46  ;;  %v482_v46 = vpack.c.bf16 %v386_v41, %v382_v40  ;;  %v337_v40 = vld [vmem:[%s3916_s13 + $0x58] sm:$0xff] }
  0xd5   : > { %1111 = vmatprep.subr.bf16.mxu0 %v3220_v49  ;;  %v3259_v49 = vld [vmem:[#allocation5 + $0x1f4] ss:$8 sps:$4 sm:$0xff]  }
  0xd6   : > { %v341_v41 = vld [vmem:[%s3916_s13 + $0x78] sm:$0xff] }
  0xd7   : > { %957 = vmatmul.mubr.bf16.gmra.mrb[4].mxu0 %v458_v51  ;;  %v394_v51 = vld [vmem:[%s3916_s13 + $0x220] sm:$0xff] }
  0xd8   : > { %966 = vmatprep.mubr.bf16.mxu0 %v463_v53  ;;  %1112 = vmatpush1.bf16.msra.mxu0 %v3218_v50  ;;  %v390_v50 = vld [vmem:[%s3916_s13 + $0x200] sm:$0xff]  ;;  %v399_v53 = vld [vmem:[%s3916_s13 + $0x248] sm:$0xff] }
  0xd9   : > { %1113 = vmatprep.subr.bf16.mxu0 %v3223_v52  ;;  %v3257_v52 = vld [vmem:[#allocation5 + $0x1f0] ss:$8 sps:$4 sm:$0xff]   ;;  %v486_v55 = vpack.c.bf16 %v394_v51, %v390_v50  ;;  %v491_v56 = vpack.c.bf16 %v403_v54, %v399_v53  ;;  %v3272_v54 = vld [vmem:[#allocation7 + $0x84] ss:$16 sps:$4 sm:$0xff]  }
  0xda   : > { %v345_v50 = vld [vmem:[%s3916_s13 + $0x98] sm:$0xff] }
  0xdb   : > { %v349_v51 = vld [vmem:[%s3916_s13 + $0xb8] sm:$0xff] }
  0xdc   : > { %1114 = vmatpush1.bf16.msra.mxu0 %v3221_v58  ;;  %v402_v58 = vld [vmem:[%s3916_s13 + $0x260] sm:$0xff] }
  0xdd   : > { %1115 = vmatprep.subr.bf16.mxu0 %v3226_v59  ;;  %v407_v59 = vld [vmem:[%s3916_s13 + $0x288] sm:$0xff] }
  0xdf   : > { %967 = vmatmul.mubr.bf16.gmra.mrb[8].mxu0 %v462_v61  ;;  %v490_v61 = vpack.c.bf16 %v402_v58, %v398_v57  ;;  %v3275_v57 = vld [vmem:[#allocation7 + $0xa4] ss:$16 sps:$4 sm:$0xff]  }
  0xe0   : > { %976 = vmatprep.mubr.bf16.mxu0 %v467_v63  ;;  %1116 = vmatpush1.bf16.msra.mxu0 %v3224_v60  ;;  %v411_v60 = vld [vmem:[%s3916_s13 + $0x2a8] sm:$0xff]  ;;  %v406_v63 = vld [vmem:[%s3916_s13 + $0x280] sm:$0xff]  ;;  %v344_v58 = vld [vmem:[%s3916_s13 + $0x90] sm:$0xff] }
  0xe1   : > { %1117 = vmatprep.subr.bf16.mxu0 %v3229_v62  ;;  %v495_v62 = vpack.c.bf16 %v411_v60, %v407_v59  ;;  %v494_v3 = vpack.c.bf16 %v410_v0, %v406_v63  ;;  %v348_v59 = vld [vmem:[%s3916_s13 + $0xb0] sm:$0xff]  ;;  %v353_v60 = vld [vmem:[%s3916_s13 + $0xd8] sm:$0xff] }
  0xe2   : > { %v464_v63 = vpack.c.bf16 %v348_v59, %v344_v58  ;;  %v3278_v0 = vld [vmem:[#allocation7 + $0xc4] ss:$16 sps:$4 sm:$0xff]  }
  0xe3   : > { %v408_v58 = vld [vmem:[%s3916_s13 + $0x290] sm:$0xff] }
  0xe4   : > { %1118 = vmatpush1.bf16.msra.mxu0 %v3227_v4  ;;  %v499_v4 = vpack.c.bf16 %v419_v2, %v415_v1  ;;  %v3280_v2 = vld [vmem:[#allocation7 + $0xc0] ss:$16 sps:$4 sm:$0xff]  }
  0xe5   : > { %1119 = vmatprep.subr.bf16.mxu0 %v3232_v5  ;;  %v414_v5 = vld [vmem:[%s3916_s13 + $0x2c0] sm:$0xff]  ;;  %v412_v59 = vld [vmem:[%s3916_s13 + $0x2b0] sm:$0xff] }
  0xe7   : > { %977 = vmatmul.mubr.bf16.gmra.mrb[12].mxu0 %v466_v7  ;;  %v423_v7 = vld [vmem:[%s3916_s13 + $0x308] sm:$0xff] }
  0xe8   : > { %986 = vmatprep.mubr.bf16.mxu0 %v471_v9  ;;  %1120 = vmatpush1.bf16.msra.mxu0 %v3230_v6  ;;  %v418_v6 = vld [vmem:[%s3916_s13 + $0x2e0] sm:$0xff] }
  0xe9   : > { %1121 = vmatprep.subr.bf16.mxu0 %v3235_v8  ;;  %v427_v8 = vld [vmem:[%s3916_s13 + $0x328] sm:$0xff]  ;;  %v498_v9 = vpack.c.bf16 %v418_v6, %v414_v5  ;;  %v356_v5 = vld [vmem:[%s3916_s13 + $0xf0] sm:$0xff]  ;;  %v361_v6 = vld [vmem:[%s3916_s13 + $0x118] sm:$0xff] }
  0xea   : > { %v503_v10 = vpack.c.bf16 %v427_v8, %v423_v7  ;;  %v365_v7 = vld [vmem:[%s3916_s13 + $0x138] sm:$0xff]  ;;  %v3283_v8 = vld [vmem:[#allocation7 + $0xe0] ss:$16 sps:$4 sm:$0xff]  }
  0xec   : > { %1122 = vmatpush1.bf16.msra.mxu0 %v3233_v12  ;;  %v426_v12 = vld [vmem:[%s3916_s13 + $0x320] sm:$0xff] }
  0xed   : > { %1123 = vmatprep.subr.bf16.mxu0 %v3238_v15  ;;  %v502_v15 = vpack.c.bf16 %v426_v12, %v422_v11  ;;  %v473_v11 = vpack.c.bf16 %v365_v7, %v361_v6  ;;  %v3286_v12 = vld [vmem:[#allocation7 + $0x100] ss:$16 sps:$4 sm:$0xff]   ;;  %v3302_v6 = vld [vmem:[#allocation7 + $0x1c4] ss:$16 sps:$4 sm:$0xff]  }
  0xef   : > { %987 = vmatmul.mubr.bf16.gmra.mrb[16].mxu0 %v470_v16  ;;  %v507_v16 = vpack.c.bf16 %v435_v14, %v431_v13  ;;  %v3287_v13 = vld [vmem:[#allocation7 + $0x124] ss:$16 sps:$4 sm:$0xff]  }
  0xf0   : > { %996 = vmatprep.mubr.bf16.mxu0 %v475_v17  ;;  %1124 = vmatpush1.bf16.msra.mxu0 %v3236_v18  ;;  %v430_v17 = vld [vmem:[%s3916_s13 + $0x340] sm:$0xff]  ;;  %v360_v14 = vld [vmem:[%s3916_s13 + $0x110] sm:$0xff] }
  0xf1   : > { %1125 = vmatprep.subr.bf16.mxu0 %v3241_v19  ;;  %v434_v18 = vld [vmem:[%s3916_s13 + $0x360] sm:$0xff]  ;;  %v439_v19 = vld [vmem:[%s3916_s13 + $0x388] sm:$0xff] }
  0xf2   : > { %v506_v21 = vpack.c.bf16 %v434_v18, %v430_v17  ;;  %v373_v17 = vld [vmem:[%s3916_s13 + $0x178] sm:$0xff]  ;;  %v3289_v18 = vld [vmem:[#allocation7 + $0x120] ss:$16 sps:$4 sm:$0xff]  }
  0xf4   : > { %1126 = vmatpush1.bf16.msra.mxu0 %v3239_v22  ;;  %v511_v22 = vpack.c.bf16 %v443_v20, %v439_v19  ;;  %v3290_v20 = vld [vmem:[#allocation7 + $0x144] ss:$16 sps:$4 sm:$0xff]  }
  0xf5   : > { %1127 = vmatprep.subr.bf16.mxu0 %v3244_v25  ;;  %v447_v25 = vld [vmem:[%s3916_s13 + $0x3c8] sm:$0xff] }
  0xf7   : > { %997 = vmatmul.mubr.bf16.gmra.mrb[20].mxu0 %v474_v26  ;;  %v451_v26 = vld [vmem:[%s3916_s13 + $0x3e8] sm:$0xff] }
  0xf8   : > { %1006 = vmatprep.mubr.bf16.mxu0 %v479_v27  ;;  %1128 = vmatpush1.bf16.msra.mxu0 %v3242_v28  ;;  %v510_v27 = vpack.c.bf16 %v442_v24, %v438_v23  ;;  %v515_v28 = vpack.c.bf16 %v451_v26, %v447_v25  ;;  %v3293_v23 = vld [vmem:[#allocation7 + $0x164] ss:$16 sps:$4 sm:$0xff]   ;;  %v377_v26 = vld [vmem:[%s3916_s13 + $0x198] sm:$0xff] }
  0xf9   : > { %1129 = vmatprep.subr.bf16.mxu0 %v3247_v29  ;;  %v446_v29 = vld [vmem:[%s3916_s13 + $0x3c0] sm:$0xff]  ;;  %v368_v24 = vld [vmem:[%s3916_s13 + $0x150] sm:$0xff] }
  0xfa   : > { %v514_v33 = vpack.c.bf16 %v450_v30, %v446_v29  ;;  %v372_v25 = vld [vmem:[%s3916_s13 + $0x170] sm:$0xff] }
  0xfb   : > { %v476_v29 = vpack.c.bf16 %v372_v25, %v368_v24  ;;  %v3296_v30 = vld [vmem:[#allocation7 + $0x184] ss:$16 sps:$4 sm:$0xff]  }
  0xfc   : > { %1130 = vmatpush1.bf16.msra.mxu0 %v3245_v32  ;;  %v333_v32 = vld [vmem:[%s3916_s13 + $0x38] sm:$0xff]  ;;  %v440_v24 = vld [vmem:[%s3916_s13 + $0x390] sm:$0xff] }
  0xfd   : > { %1131 = vmatprep.subr.bf16.mxu0 %v3250_v35  ;;  %v457_v34 = vpack.c.bf16 %v333_v32, %v329_v31  ;;  %v3260_v35 = vld [vmem:[#allocation7 + $0x4] ss:$16 sps:$4 sm:$0xff]   ;;  %v3298_v32 = vld [vmem:[#allocation7 + $0x180] ss:$16 sps:$4 sm:$0xff]  }
  0xfe   : > { %1866 = vmatprep.subr.bf16.mxu1 %v3260_v35  ;;  %v380_v35 = vld [vmem:[%s3916_s13 + $0x1b0] sm:$0xff] }
  0xff   : > { %1007 = vmatmul.mubr.bf16.gmra.mrb[24].mxu0 %v478_v36  ;;  %v3262_v36 = vld [vmem:[#allocation7] ss:$16 sps:$4 sm:$0xff]  }
 0x100   : > { %1016 = vmatprep.mubr.bf16.mxu0 %v483_v37  ;;  %1132 = vmatpush1.bf16.msra.mxu0 %v3248_v38  ;;  %v3263_v37 = vld [vmem:[#allocation7 + $0x24] ss:$16 sps:$4 sm:$0xff]  }
 0x101   : > { %1133 = vmatprep.subr.bf16.mxu0 %v3253_v39  ;;  %v328_v38 = vld [vmem:[%s3916_s13 + $0x10] sm:$0xff]  ;;  %1867 = vmatpush1.bf16.msra.mxu1 %v3262_v36  ;;  %v385_v36 = vld [vmem:[%s3916_s13 + $0x1d8] sm:$0xff] }
 0x102   : > { %v332_v39 = vld [vmem:[%s3916_s13 + $0x30] sm:$0xff]  ;;  %1868 = vmatprep.subr.bf16.mxu1 %v3263_v37  ;;  %v389_v37 = vld [vmem:[%s3916_s13 + $0x1f8] sm:$0xff] }
 0x103   : > { %v456_v43 = vpack.c.bf16 %v332_v39, %v328_v38  ;;  %v485_v39 = vpack.c.bf16 %v389_v37, %v385_v36  ;;  %v444_v25 = vld [vmem:[%s3916_s13 + $0x3b0] sm:$0xff]  ;;  %v582_v36 = vld [vmem:[%s5007_s2] sm:$0x3] }
 0x104   : > { %1134 = vmatpush1.bf16.msra.mxu0 %v3251_v42  ;;  %v3265_v42 = vld [vmem:[#allocation7 + $0x20] ss:$16 sps:$4 sm:$0xff]  }
 0x105   : > { %1135 = vmatprep.subr.bf16.mxu0 %v3256_v45  ;;  %v461_v45 = vpack.c.bf16 %v341_v41, %v337_v40  ;;  %1869 = vmatpush1.bf16.msra.mxu1 %v3265_v42  ;;  %v384_v40 = vld [vmem:[%s3916_s13 + $0x1d0] sm:$0xff]  ;;  %v393_v42 = vld [vmem:[%s3916_s13 + $0x218] sm:$0xff] }
 0x106   : > { %1870 = vmatprep.subr.bf16.mxu1 %v3266_v44  ;;  %v388_v41 = vld [vmem:[%s3916_s13 + $0x1f0] sm:$0xff] }
 0x107   : > { %1017 = vmatmul.mubr.bf16.gmra.mrb[28].mxu0 %v482_v46  ;;  %v3268_v46 = vld [vmem:[#allocation7 + $0x40] ss:$16 sps:$4 sm:$0xff]   ;;  %v484_v44 = vpack.c.bf16 %v388_v41, %v384_v40 }
 0x108   : > { %1026 = vmatprep.mubr.bf16.mxu0 %v487_v47  ;;  %1136 = vmatpush1.bf16.msra.mxu0 %v3254_v48  ;;  %v3269_v47 = vld [vmem:[#allocation7 + $0x64] ss:$16 sps:$4 sm:$0xff]  }
 0x109   : > { %1137 = vmatprep.subr.bf16.mxu0 %v3259_v49  ;;  %v336_v48 = vld [vmem:[%s3916_s13 + $0x50] sm:$0xff]  ;;  %1871 = vmatpush1.bf16.msra.mxu1 %v3268_v46 }
 0x10a   : > { %v340_v49 = vld [vmem:[%s3916_s13 + $0x70] sm:$0xff]  ;;  %1872 = vmatprep.subr.bf16.mxu1 %v3269_v47 }
 0x10b   : > { %v460_v53 = vpack.c.bf16 %v340_v49, %v336_v48  ;;  %v392_v46 = vld [vmem:[%s3916_s13 + $0x210] sm:$0xff]  ;;  %v401_v48 = vld [vmem:[%s3916_s13 + $0x258] sm:$0xff] }
 0x10c   : > { %1138 = vmatpush1.bf16.msra.mxu0 %v3257_v52  ;;  %v3271_v52 = vld [vmem:[#allocation7 + $0x60] ss:$16 sps:$4 sm:$0xff]   ;;  %v405_v49 = vld [vmem:[%s3916_s13 + $0x278] sm:$0xff] }
 0x10d   : > { %1873 = vmatpush1.bf16.msra.mxu1 %v3271_v52  ;;  %v396_v47 = vld [vmem:[%s3916_s13 + $0x230] sm:$0xff] }
 0x10e   : > { %1874 = vmatprep.subr.bf16.mxu1 %v3272_v54  ;;  %v400_v52 = vld [vmem:[%s3916_s13 + $0x250] sm:$0xff]  ;;  %v409_v54 = vld [vmem:[%s3916_s13 + $0x298] sm:$0xff] }
 0x10f   : > { %1027 = vmatmul.mubr.bf16.gmra.mrb[32].mxu0 %v486_v55  ;;  %v465_v55 = vpack.c.bf16 %v349_v51, %v345_v50  ;;  %v488_v50 = vpack.c.bf16 %v396_v47, %v392_v46  ;;  %v493_v51 = vpack.c.bf16 %v405_v49, %v401_v48 }
 0x110   : > { %1036 = vmatprep.mubr.bf16.mxu0 %v491_v56  ;;  %v3274_v56 = vld [vmem:[#allocation7 + $0x80] ss:$16 sps:$4 sm:$0xff]  }
 0x111   : > { %1875 = vmatpush1.bf16.msra.mxu1 %v3274_v56 }
 0x112   : > { %1876 = vmatprep.subr.bf16.mxu1 %v3275_v57 }
 0x117   : > { %1037 = vmatmul.mubr.bf16.gmra.mrb[36].mxu0 %v490_v61  ;;  %v357_v61 = vld [vmem:[%s3916_s13 + $0xf8] sm:$0xff] }
 0x118   : > { %1046 = vmatprep.mubr.bf16.mxu0 %v495_v62  ;;  %v3277_v62 = vld [vmem:[#allocation7 + $0xa0] ss:$16 sps:$4 sm:$0xff]   ;;  %v469_v1 = vpack.c.bf16 %v357_v61, %v353_v60  ;;  %v417_v60 = vld [vmem:[%s3916_s13 + $0x2d8] sm:$0xff] }
 0x119   : > { %1877 = vmatpush1.bf16.msra.mxu1 %v3277_v62  ;;  %v421_v61 = vld [vmem:[%s3916_s13 + $0x2f8] sm:$0xff]  ;;  %v496_v62 = vpack.c.bf16 %v412_v59, %v408_v58 }
 0x11a   : > { %1878 = vmatprep.subr.bf16.mxu1 %v3278_v0  ;;  %v416_v0 = vld [vmem:[%s3916_s13 + $0x2d0] sm:$0xff]  ;;  %v3313_v58 = vld [vmem:[#allocation7 + $0x2c] ss:$16 sps:$4 sm:$0xff]  }
 0x11d   : > { %1879 = vmatpush1.bf16.msra.mxu1 %v3280_v2  ;;  %v3301_v2 = vld [vmem:[#allocation7 + $0x1a0] ss:$16 sps:$4 sm:$0xff]  }
 0x11f   : > { %1047 = vmatmul.mubr.bf16.gmra.mrb[40].mxu0 %v494_v3  ;;  %v3281_v3 = vld [vmem:[#allocation7 + $0xe4] ss:$16 sps:$4 sm:$0xff]  }
 0x120   : > { %1056 = vmatprep.mubr.bf16.mxu0 %v499_v4  ;;  %v352_v4 = vld [vmem:[%s3916_s13 + $0xd0] sm:$0xff]  ;;  %1880 = vmatprep.subr.bf16.mxu1 %v3281_v3  ;;  %v425_v3 = vld [vmem:[%s3916_s13 + $0x318] sm:$0xff] }
 0x121   : > { %1881 = vmatpush1.bf16.msra.mxu1 %v3283_v8  ;;  %v3304_v8 = vld [vmem:[#allocation7 + $0x1c0] ss:$16 sps:$4 sm:$0xff]  }
 0x127   : > { %1057 = vmatmul.mubr.bf16.gmra.mrb[44].mxu0 %v498_v9  ;;  %v468_v9 = vpack.c.bf16 %v356_v5, %v352_v4  ;;  %v429_v4 = vld [vmem:[%s3916_s13 + $0x338] sm:$0xff] }
 0x128   : > { %1066 = vmatprep.mubr.bf16.mxu0 %v503_v10  ;;  %v3284_v10 = vld [vmem:[#allocation7 + $0x104] ss:$16 sps:$4 sm:$0xff]   ;;  %v505_v7 = vpack.c.bf16 %v429_v4, %v425_v3  ;;  %v3316_v4 = vld [vmem:[#allocation7 + $0x4c] ss:$16 sps:$4 sm:$0xff]  }
 0x129   : > { %1882 = vmatprep.subr.bf16.mxu1 %v3284_v10  ;;  %v424_v10 = vld [vmem:[%s3916_s13 + $0x310] sm:$0xff] }
 0x12a   : > { %1883 = vmatpush1.bf16.msra.mxu1 %v3286_v12  ;;  %v3307_v12 = vld [vmem:[#allocation7 + $0x1e0] ss:$16 sps:$4 sm:$0xff]  }
 0x12b   : > { %1884 = vmatprep.subr.bf16.mxu1 %v3287_v13  ;;  %v433_v13 = vld [vmem:[%s3916_s13 + $0x358] sm:$0xff] }
 0x12e   : > { %1885 = vmatpush1.bf16.msra.mxu1 %v3289_v18  ;;  %v436_v18 = vld [vmem:[%s3916_s13 + $0x370] sm:$0xff] }
 0x12f   : > { %1067 = vmatmul.mubr.bf16.gmra.mrb[48].mxu0 %v502_v15  ;;  %v364_v15 = vld [vmem:[%s3916_s13 + $0x130] sm:$0xff]  ;;  %1886 = vmatprep.subr.bf16.mxu1 %v3290_v20  ;;  %v445_v20 = vld [vmem:[%s3916_s13 + $0x3b8] sm:$0xff] }
 0x130   : > { %1076 = vmatprep.mubr.bf16.mxu0 %v507_v16  ;;  %v369_v16 = vld [vmem:[%s3916_s13 + $0x158] sm:$0xff]  ;;  %v472_v19 = vpack.c.bf16 %v364_v15, %v360_v14 }
 0x131   : > { %v437_v14 = vld [vmem:[%s3916_s13 + $0x378] sm:$0xff] }
 0x137   : > { %1077 = vmatmul.mubr.bf16.gmra.mrb[52].mxu0 %v506_v21  ;;  %v477_v21 = vpack.c.bf16 %v373_v17, %v369_v16  ;;  %v509_v16 = vpack.c.bf16 %v437_v14, %v433_v13  ;;  %v432_v17 = vld [vmem:[%s3916_s13 + $0x350] sm:$0xff] }
 0x138   : > { %1086 = vmatprep.mubr.bf16.mxu0 %v511_v22  ;;  %v3292_v22 = vld [vmem:[#allocation7 + $0x140] ss:$16 sps:$4 sm:$0xff]  }
 0x139   : > { %1887 = vmatpush1.bf16.msra.mxu1 %v3292_v22  ;;  %v508_v22 = vpack.c.bf16 %v436_v18, %v432_v17 }
 0x13a   : > { %1888 = vmatprep.subr.bf16.mxu1 %v3293_v23 }
 0x13f   : > { %1087 = vmatmul.mubr.bf16.gmra.mrb[56].mxu0 %v510_v27  ;;  %v381_v27 = vld [vmem:[%s3916_s13 + $0x1b8] sm:$0xff] }
 0x140   : > { %1096 = vmatprep.mubr.bf16.mxu0 %v515_v28  ;;  %v3295_v28 = vld [vmem:[#allocation7 + $0x160] ss:$16 sps:$4 sm:$0xff]   ;;  %v481_v31 = vpack.c.bf16 %v381_v27, %v377_v26  ;;  %v449_v26 = vld [vmem:[%s3916_s13 + $0x3d8] sm:$0xff] }
 0x141   : > { %1889 = vmatpush1.bf16.msra.mxu1 %v3295_v28  ;;  %v453_v27 = vld [vmem:[%s3916_s13 + $0x3f8] sm:$0xff]  ;;  %v512_v28 = vpack.c.bf16 %v444_v25, %v440_v24 }
 0x142   : > { %1890 = vmatprep.subr.bf16.mxu1 %v3296_v30  ;;  %v448_v30 = vld [vmem:[%s3916_s13 + $0x3d0] sm:$0xff] }
 0x145   : > { %1891 = vmatpush1.bf16.msra.mxu1 %v3298_v32 }
 0x147   : > { %1097 = vmatmul.mubr.bf16.gmra.mrb[60].mxu0 %v514_v33  ;;  %v3299_v33 = vld [vmem:[#allocation7 + $0x1a4] ss:$16 sps:$4 sm:$0xff]  }
 0x148   : > { %1139 = vmatprep.mubr.bf16.mxu0 %v457_v34  ;;  %v376_v34 = vld [vmem:[%s3916_s13 + $0x190] sm:$0xff]  ;;  %1892 = vmatprep.subr.bf16.mxu1 %v3299_v33  ;;  %v584_v33 = vlaneseq }
 0x149   : > { %v480_v38 = vpack.c.bf16 %v380_v35, %v376_v34  ;;  %1893 = vmatpush1.bf16.msra.mxu1 %v3301_v2  ;;  %v3311_v2 = vld [vmem:[#allocation7 + $0x28] ss:$16 sps:$4 sm:$0xff]  }
 0x14a   : > { %1894 = vmatprep.subr.bf16.mxu1 %v3302_v6  ;;  %v4058_v34 = vshrl.u32 %v584_v33, 7 }
 0x14c   : > { %v586_v35 = vsub.s32 0, %v4058_v34  ;;  %v590_v37 = vsub.s32 1, %v4058_v34 }
 0x14d   : > { %1895 = vmatpush1.bf16.msra.mxu1 %v3304_v8 }
 0x14f   : > { %1140 = vmatmul.mubr.bf16.vlgmr.msra.gmra.mrb[0].mxu0 %v456_v43  ;;  %v397_v43 = vld [vmem:[%s3916_s13 + $0x238] sm:$0xff] }
 0x150   : > { %1149 = vmatprep.mubr.bf16.mxu0 %v461_v45  ;;  %v489_v45 = vpack.c.bf16 %v397_v43, %v393_v42 }
 0x157   : > { %1150 = vmatmul.mubr.bf16.gmra.mrb[4].mxu0 %v460_v53  ;;  %v404_v53 = vld [vmem:[%s3916_s13 + $0x270] sm:$0xff] }
 0x158   : > { %1159 = vmatprep.mubr.bf16.mxu0 %v465_v55  ;;  %v413_v55 = vld [vmem:[%s3916_s13 + $0x2b8] sm:$0xff]  ;;  %v492_v56 = vpack.c.bf16 %v404_v53, %v400_v52 }
 0x159   : > { %v497_v57 = vpack.c.bf16 %v413_v55, %v409_v54  ;;  %v3308_v55 = vld [vmem:[#allocation7 + $0x8] ss:$16 sps:$4 sm:$0xff]  }
 0x15f   : > { %1160 = vmatmul.mubr.bf16.gmra.mrb[8].mxu0 %v464_v63  ;;  %v501_v63 = vpack.c.bf16 %v421_v61, %v417_v60 }
 0x160   : > { %1169 = vmatprep.mubr.bf16.mxu0 %v469_v1  ;;  %v420_v1 = vld [vmem:[%s3916_s13 + $0x2f0] sm:$0xff] }
 0x161   : > { %v500_v5 = vpack.c.bf16 %v420_v1, %v416_v0 }
 0x167   : > { %1170 = vmatmul.mubr.bf16.gmra.mrb[12].mxu0 %v468_v9  ;;  %v3305_v9 = vld [vmem:[#allocation7 + $0x1e4] ss:$16 sps:$4 sm:$0xff]  }
 0x168   : > { %1179 = vmatprep.mubr.bf16.mxu0 %v473_v11  ;;  %v428_v11 = vld [vmem:[%s3916_s13 + $0x330] sm:$0xff]  ;;  %1896 = vmatprep.subr.bf16.mxu1 %v3305_v9  ;;  %v3314_v9 = vld [vmem:[#allocation7 + $0x48] ss:$16 sps:$4 sm:$0xff]  }
 0x169   : > { %1897 = vmatpush1.bf16.msra.mxu1 %v3307_v12  ;;  %v504_v15 = vpack.c.bf16 %v428_v11, %v424_v10  ;;  %v3319_v12 = vld [vmem:[#allocation7 + $0x6c] ss:$16 sps:$4 sm:$0xff]  }
 0x16f   : > { %1180 = vmatmul.mubr.bf16.gmra.mrb[16].mxu0 %v472_v19  ;;  %v441_v19 = vld [vmem:[%s3916_s13 + $0x398] sm:$0xff] }
 0x170   : > { %1189 = vmatprep.mubr.bf16.mxu0 %v477_v21  ;;  %v3310_v21 = vld [vmem:[#allocation7 + $0xc] ss:$16 sps:$4 sm:$0xff]   ;;  %v513_v23 = vpack.c.bf16 %v445_v20, %v441_v19  ;;  %v3317_v20 = vld [vmem:[#allocation7 + $0x68] ss:$16 sps:$4 sm:$0xff]  }
 0x171   : > { %2059 = vmatprep.subr.bf16.mxu1 %v3310_v21 }
 0x177   : > { %1190 = vmatmul.mubr.bf16.gmra.mrb[20].mxu0 %v476_v29  ;;  %v517_v29 = vpack.c.bf16 %v453_v27, %v449_v26  ;;  %v3320_v27 = vld [vmem:[#allocation7 + $0x88] ss:$16 sps:$4 sm:$0xff]  }
 0x178   : > { %1199 = vmatprep.mubr.bf16.mxu0 %v481_v31  ;;  %v452_v31 = vld [vmem:[%s3916_s13 + $0x3f0] sm:$0xff] }
 0x179   : > { %v516_v32 = vpack.c.bf16 %v452_v31, %v448_v30  ;;  %v3325_v30 = vld [vmem:[#allocation7 + $0xac] ss:$16 sps:$4 sm:$0xff]  }
 0x17f   : > { %1200 = vmatmul.mubr.bf16.gmra.mrb[24].mxu0 %v480_v38  ;;  %v4067_v38 = vrot.slane %v582_v36, %v586_v35 }
 0x180   : > { %1209 = vmatprep.mubr.bf16.mxu0 %v485_v39  ;;  %v4071_v39 = vrot.slane %v582_v36, %v590_v37 }
 0x187   : > { %1210 = vmatmul.mubr.bf16.gmra.mrb[28].mxu0 %v484_v44 }
 0x188   : > { %1219 = vmatprep.mubr.bf16.mxu0 %v489_v45 }
 0x18f   : > { %1220 = vmatmul.mubr.bf16.gmra.mrb[32].mxu0 %v488_v50 }
 0x190   : > { %1229 = vmatprep.mubr.bf16.mxu0 %v493_v51 }
 0x197   : > { %1230 = vmatmul.mubr.bf16.gmra.mrb[36].mxu0 %v492_v56 }
 0x198   : > { %1239 = vmatprep.mubr.bf16.mxu0 %v497_v57 }
 0x19f   : > { %1240 = vmatmul.mubr.bf16.gmra.mrb[40].mxu0 %v496_v62 }
 0x1a0   : > { %1249 = vmatprep.mubr.bf16.mxu0 %v501_v63 }
 0x1a7   : > { %1250 = vmatmul.mubr.bf16.gmra.mrb[44].mxu0 %v500_v5 }
 0x1a8   : > { %1259 = vmatprep.mubr.bf16.mxu0 %v505_v7 }
 0x1af   : > { %1260 = vmatmul.mubr.bf16.gmra.mrb[48].mxu0 %v504_v15 }
 0x1b0   : > { %1269 = vmatprep.mubr.bf16.mxu0 %v509_v16 }
 0x1b7   : > { %1270 = vmatmul.mubr.bf16.gmra.mrb[52].mxu0 %v508_v22  ;;  %v3322_v22 = vld [vmem:[#allocation7 + $0x8c] ss:$16 sps:$4 sm:$0xff]  }
 0x1b8   : > { %1279 = vmatprep.mubr.bf16.mxu0 %v513_v23 }
 0x1bf   : > { %1280 = vmatmul.mubr.bf16.gmra.mrb[56].mxu0 %v512_v28 }
 0x1c0   : > { %1289 = vmatprep.mubr.bf16.mxu0 %v517_v29 }
 0x1c7   : > { %1290 = vmatmul.mubr.bf16.gmra.mrb[60].mxu0 %v516_v32 }
 0x222   : > { %v1141_v40 = vpop.f32.mrb[0].mxu0 }
 0x223   : > { %v2949_v41 = vadd.f32 %v1141_v40, %v4067_v38  ;;  %v1143_v42 = vpop.f32.mrb[1].mxu0 }
 0x224   : > { %v2950_v43 = vadd.f32 %v1143_v42, %v4071_v39  ;;  %v1145_v44 = vpop.f32.mrb[2].mxu0 }
 0x225   : > { %v1300_v45 = vmax.f32 %v2949_v41, 0.0  ;;  %v2951_v46 = vadd.f32 %v1145_v44, %v4067_v38  ;;  %v1147_v47 = vpop.f32.mrb[3].mxu0 }
 0x226   : > { %v1301_v48 = vmax.f32 %v2950_v43, 0.0  ;;  %v2952_v49 = vadd.f32 %v1147_v47, %v4071_v39  ;;  %v3323_v43 = vld [vmem:[#allocation7 + $0xa8] ss:$16 sps:$4 sm:$0xff]  }
 0x227   : > { %1364 = vst [vmem:[%s4078_s18] sm:$0xff] %v1300_v45  ;;  %v1302_v50 = vmax.f32 %v2951_v46, 0.0 }
 0x228   : > { %1365 = vst [vmem:[%s4078_s18 + $0x8] sm:$0xff] %v1301_v48  ;;  %v1303_v51 = vmax.f32 %v2952_v49, 0.0 }
 0x229   : > { %1366 = vst [vmem:[%s4078_s18 + $0x10] sm:$0xff] %v1302_v50  ;;  %v4083_v52 = vpack.c.bf16 %v1302_v50, %v1300_v45  ;;  %v3328_v45 = vld [vmem:[#allocation7 + $0xcc] ss:$16 sps:$4 sm:$0xff]   ;;  %v3326_v50 = vld [vmem:[#allocation7 + $0xc8] ss:$16 sps:$4 sm:$0xff]  }
 0x22a   : > { %1367 = vst [vmem:[%s4078_s18 + $0x18] sm:$0xff] %v1303_v51  ;;  %v1151_v53 = vpop.f32.mrb[4].mxu0  ;;  %v4086_v54 = vpack.c.bf16 %v1303_v51, %v1301_v48 }
 0x22b   : > { %v2953_v56 = vadd.f32 %v1151_v53, %v4067_v38  ;;  %v1153_v57 = vpop.f32.mrb[5].mxu0 }
 0x22c   : > { %v2954_v59 = vadd.f32 %v1153_v57, %v4071_v39  ;;  %v1155_v60 = vpop.f32.mrb[6].mxu0  ;;  %1898 = vmatprep.mubr.bf16.mxu1 %v4086_v54 }
 0x22d   : > { %v1304_v61 = vmax.f32 %v2953_v56, 0.0  ;;  %v2955_v62 = vadd.f32 %v1155_v60, %v4067_v38  ;;  %v1157_v63 = vpop.f32.mrb[7].mxu0  ;;  %1899 = vmatmul.mubr.bf16.vlgmr.msra.gmra.mrb[0].mxu1 %v4083_v52 }
 0x22e   : > { %v1305_v0 = vmax.f32 %v2954_v59, 0.0  ;;  %v2956_v1 = vadd.f32 %v1157_v63, %v4071_v39  ;;  %2060 = vmatpush1.bf16.msra.mxu1 %v3308_v55  ;;  %v3331_v55 = vld [vmem:[#allocation7 + $0xec] ss:$16 sps:$4 sm:$0xff]   ;;  %v3329_v63 = vld [vmem:[#allocation7 + $0xe8] ss:$16 sps:$4 sm:$0xff]  }
 0x22f   : > { %1368 = vst [vmem:[%s4078_s18 + $0x20] sm:$0xff] %v1304_v61  ;;  %v1306_v3 = vmax.f32 %v2955_v62, 0.0  ;;  %2061 = vmatprep.subr.bf16.mxu1 %v3313_v58 }
 0x230   : > { %1369 = vst [vmem:[%s4078_s18 + $0x28] sm:$0xff] %v1305_v0  ;;  %v1307_v5 = vmax.f32 %v2956_v1, 0.0  ;;  %v3334_v1 = vld [vmem:[#allocation7 + $0x10c] ss:$16 sps:$4 sm:$0xff]  }
 0x231   : > { %1370 = vst [vmem:[%s4078_s18 + $0x30] sm:$0xff] %v1306_v3  ;;  %v4097_v6 = vpack.c.bf16 %v1306_v3, %v1304_v61 }
 0x232   : > { %1371 = vst [vmem:[%s4078_s18 + $0x38] sm:$0xff] %v1307_v5  ;;  %v4100_v7 = vpack.c.bf16 %v1307_v5, %v1305_v0  ;;  %v1161_v8 = vpop.f32.mrb[8].mxu0  ;;  %2062 = vmatpush1.bf16.msra.mxu1 %v3311_v2 }
 0x233   : > { %v2957_v10 = vadd.f32 %v1161_v8, %v4067_v38  ;;  %v1163_v11 = vpop.f32.mrb[9].mxu0  ;;  %2063 = vmatprep.subr.bf16.mxu1 %v3316_v4  ;;  %v3332_v8 = vld [vmem:[#allocation7 + $0x108] ss:$16 sps:$4 sm:$0xff]  }
 0x234   : > { %v2958_v13 = vadd.f32 %v1163_v11, %v4071_v39  ;;  %v1165_v14 = vpop.f32.mrb[10].mxu0  ;;  %1908 = vmatprep.mubr.bf16.mxu1 %v4100_v7  ;;  %v3337_v11 = vld [vmem:[#allocation7 + $0x12c] ss:$16 sps:$4 sm:$0xff]  }
 0x235   : > { %v1308_v15 = vmax.f32 %v2957_v10, 0.0  ;;  %v2959_v16 = vadd.f32 %v1165_v14, %v4067_v38  ;;  %v1167_v17 = vpop.f32.mrb[11].mxu0  ;;  %1909 = vmatmul.mubr.bf16.gmra.mrb[4].mxu1 %v4097_v6 }
 0x236   : > { %v1309_v18 = vmax.f32 %v2958_v13, 0.0  ;;  %v2960_v19 = vadd.f32 %v1167_v17, %v4071_v39  ;;  %2064 = vmatpush1.bf16.msra.mxu1 %v3314_v9 }
 0x237   : > { %1372 = vst [vmem:[%s4078_s18 + $0x40] sm:$0xff] %v1308_v15  ;;  %v1310_v21 = vmax.f32 %v2959_v16, 0.0  ;;  %2065 = vmatprep.subr.bf16.mxu1 %v3319_v12 }
 0x238   : > { %1373 = vst [vmem:[%s4078_s18 + $0x48] sm:$0xff] %v1309_v18  ;;  %v1311_v23 = vmax.f32 %v2960_v19, 0.0  ;;  %v3335_v19 = vld [vmem:[#allocation7 + $0x128] ss:$16 sps:$4 sm:$0xff]  }
 0x239   : > { %1374 = vst [vmem:[%s4078_s18 + $0x50] sm:$0xff] %v1310_v21  ;;  %v4111_v24 = vpack.c.bf16 %v1310_v21, %v1308_v15  ;;  %v3340_v21 = vld [vmem:[#allocation7 + $0x14c] ss:$16 sps:$4 sm:$0xff]  }
 0x23a   : > { %1375 = vst [vmem:[%s4078_s18 + $0x58] sm:$0xff] %v1311_v23  ;;  %v4114_v25 = vpack.c.bf16 %v1311_v23, %v1309_v18  ;;  %v1171_v26 = vpop.f32.mrb[12].mxu0  ;;  %2066 = vmatpush1.bf16.msra.mxu1 %v3317_v20 }
 0x23b   : > { %v2961_v28 = vadd.f32 %v1171_v26, %v4067_v38  ;;  %v1173_v29 = vpop.f32.mrb[13].mxu0  ;;  %2067 = vmatprep.subr.bf16.mxu1 %v3322_v22 }
 0x23c   : > { %v2962_v31 = vadd.f32 %v1173_v29, %v4071_v39  ;;  %v1175_v32 = vpop.f32.mrb[14].mxu0  ;;  %1918 = vmatprep.mubr.bf16.mxu1 %v4114_v25 }
 0x23d   : > { %v1312_v33 = vmax.f32 %v2961_v28, 0.0  ;;  %v2963_v36 = vadd.f32 %v1175_v32, %v4067_v38  ;;  %v1177_v40 = vpop.f32.mrb[15].mxu0  ;;  %1919 = vmatmul.mubr.bf16.gmra.mrb[8].mxu1 %v4111_v24  ;;  %v3338_v28 = vld [vmem:[#allocation7 + $0x148] ss:$16 sps:$4 sm:$0xff]  }
 0x23e   : > { %v1313_v41 = vmax.f32 %v2962_v31, 0.0  ;;  %v2964_v42 = vadd.f32 %v1177_v40, %v4071_v39  ;;  %2068 = vmatpush1.bf16.msra.mxu1 %v3320_v27  ;;  %v3343_v31 = vld [vmem:[#allocation7 + $0x16c] ss:$16 sps:$4 sm:$0xff]  }
 0x23f   : > { %1376 = vst [vmem:[%s4078_s18 + $0x60] sm:$0xff] %v1312_v33  ;;  %v1314_v44 = vmax.f32 %v2963_v36, 0.0  ;;  %2069 = vmatprep.subr.bf16.mxu1 %v3325_v30 }
 0x240   : > { %1377 = vst [vmem:[%s4078_s18 + $0x68] sm:$0xff] %v1313_v41  ;;  %v1315_v46 = vmax.f32 %v2964_v42, 0.0 }
 0x241   : > { %1378 = vst [vmem:[%s4078_s18 + $0x70] sm:$0xff] %v1314_v44  ;;  %v4125_v47 = vpack.c.bf16 %v1314_v44, %v1312_v33  ;;  %v3341_v44 = vld [vmem:[#allocation7 + $0x168] ss:$16 sps:$4 sm:$0xff]  }
 0x242   : > { %1379 = vst [vmem:[%s4078_s18 + $0x78] sm:$0xff] %v1315_v46  ;;  %v4128_v48 = vpack.c.bf16 %v1315_v46, %v1313_v41  ;;  %v1181_v49 = vpop.f32.mrb[16].mxu0  ;;  %2070 = vmatpush1.bf16.msra.mxu1 %v3323_v43  ;;  %v3346_v46 = vld [vmem:[#allocation7 + $0x18c] ss:$16 sps:$4 sm:$0xff]  }
 0x243   : > { %v2965_v51 = vadd.f32 %v1181_v49, %v4067_v38  ;;  %v1183_v53 = vpop.f32.mrb[17].mxu0  ;;  %2071 = vmatprep.subr.bf16.mxu1 %v3328_v45 }
 0x244   : > { %v2966_v56 = vadd.f32 %v1183_v53, %v4071_v39  ;;  %v1185_v57 = vpop.f32.mrb[18].mxu0  ;;  %1928 = vmatprep.mubr.bf16.mxu1 %v4128_v48 }
 0x245   : > { %v1316_v58 = vmax.f32 %v2965_v51, 0.0  ;;  %v2967_v59 = vadd.f32 %v1185_v57, %v4067_v38  ;;  %v1187_v60 = vpop.f32.mrb[19].mxu0  ;;  %1929 = vmatmul.mubr.bf16.gmra.mrb[12].mxu1 %v4125_v47 }
 0x246   : > { %v1317_v61 = vmax.f32 %v2966_v56, 0.0  ;;  %v2968_v62 = vadd.f32 %v1187_v60, %v4071_v39  ;;  %2072 = vmatpush1.bf16.msra.mxu1 %v3326_v50 }
 0x247   : > { %1380 = vst [vmem:[%s4078_s18 + $0x80] sm:$0xff] %v1316_v58  ;;  %v1318_v0 = vmax.f32 %v2967_v59, 0.0  ;;  %2073 = vmatprep.subr.bf16.mxu1 %v3331_v55  ;;  %v3344_v55 = vld [vmem:[#allocation7 + $0x188] ss:$16 sps:$4 sm:$0xff]  }
 0x248   : > { %1381 = vst [vmem:[%s4078_s18 + $0x88] sm:$0xff] %v1317_v61  ;;  %v1319_v2 = vmax.f32 %v2968_v62, 0.0 }
 0x249   : > { %1382 = vst [vmem:[%s4078_s18 + $0x90] sm:$0xff] %v1318_v0  ;;  %v4139_v3 = vpack.c.bf16 %v1318_v0, %v1316_v58  ;;  %v3349_v58 = vld [vmem:[#allocation7 + $0x1ac] ss:$16 sps:$4 sm:$0xff]  }
 0x24a   : > { %1383 = vst [vmem:[%s4078_s18 + $0x98] sm:$0xff] %v1319_v2  ;;  %v4142_v4 = vpack.c.bf16 %v1319_v2, %v1317_v61  ;;  %v1191_v5 = vpop.f32.mrb[20].mxu0  ;;  %2074 = vmatpush1.bf16.msra.mxu1 %v3329_v63  ;;  %v3347_v2 = vld [vmem:[#allocation7 + $0x1a8] ss:$16 sps:$4 sm:$0xff]  }
 0x24b   : > { %v2969_v9 = vadd.f32 %v1191_v5, %v4067_v38  ;;  %v1193_v10 = vpop.f32.mrb[21].mxu0  ;;  %2075 = vmatprep.subr.bf16.mxu1 %v3334_v1 }
 0x24c   : > { %v2970_v12 = vadd.f32 %v1193_v10, %v4071_v39  ;;  %v1195_v13 = vpop.f32.mrb[22].mxu0  ;;  %1938 = vmatprep.mubr.bf16.mxu1 %v4142_v4 }
 0x24d   : > { %v1320_v14 = vmax.f32 %v2969_v9, 0.0  ;;  %v2971_v15 = vadd.f32 %v1195_v13, %v4067_v38  ;;  %v1197_v16 = vpop.f32.mrb[23].mxu0  ;;  %1939 = vmatmul.mubr.bf16.gmra.mrb[16].mxu1 %v4139_v3  ;;  %v3350_v13 = vld [vmem:[#allocation7 + $0x1c8] ss:$16 sps:$4 sm:$0xff]  }
 0x24e   : > { %v1321_v17 = vmax.f32 %v2970_v12, 0.0  ;;  %v2972_v18 = vadd.f32 %v1197_v16, %v4071_v39  ;;  %2076 = vmatpush1.bf16.msra.mxu1 %v3332_v8  ;;  %v3352_v8 = vld [vmem:[#allocation7 + $0x1cc] ss:$16 sps:$4 sm:$0xff]  }
 0x24f   : > { %1384 = vst [vmem:[%s4078_s18 + $0xa0] sm:$0xff] %v1320_v14  ;;  %v1322_v20 = vmax.f32 %v2971_v15, 0.0  ;;  %2077 = vmatprep.subr.bf16.mxu1 %v3337_v11  ;;  %v3355_v16 = vld [vmem:[#allocation7 + $0x1ec] ss:$16 sps:$4 sm:$0xff]  }
 0x250   : > { %1385 = vst [vmem:[%s4078_s18 + $0xa8] sm:$0xff] %v1321_v17  ;;  %v1323_v22 = vmax.f32 %v2972_v18, 0.0 }
 0x251   : > { %1386 = vst [vmem:[%s4078_s18 + $0xb0] sm:$0xff] %v1322_v20  ;;  %v4153_v23 = vpack.c.bf16 %v1322_v20, %v1320_v14 }
 0x252   : > { %1387 = vst [vmem:[%s4078_s18 + $0xb8] sm:$0xff] %v1323_v22  ;;  %v4156_v26 = vpack.c.bf16 %v1323_v22, %v1321_v17  ;;  %v1201_v27 = vpop.f32.mrb[24].mxu0  ;;  %2078 = vmatpush1.bf16.msra.mxu1 %v3335_v19 }
 0x253   : > { %v2973_v29 = vadd.f32 %v1201_v27, %v4067_v38  ;;  %v1203_v30 = vpop.f32.mrb[25].mxu0  ;;  %2079 = vmatprep.subr.bf16.mxu1 %v3340_v21 }
 0x254   : > { %v2974_v32 = vadd.f32 %v1203_v30, %v4071_v39  ;;  %v1205_v33 = vpop.f32.mrb[26].mxu0  ;;  %1948 = vmatprep.mubr.bf16.mxu1 %v4156_v26 }
 0x255   : > { %v1324_v36 = vmax.f32 %v2973_v29, 0.0  ;;  %v2975_v40 = vadd.f32 %v1205_v33, %v4067_v38  ;;  %v1207_v41 = vpop.f32.mrb[27].mxu0  ;;  %1949 = vmatmul.mubr.bf16.gmra.mrb[20].mxu1 %v4153_v23 }
 0x256   : > { %v1325_v42 = vmax.f32 %v2974_v32, 0.0  ;;  %v2976_v43 = vadd.f32 %v1207_v41, %v4071_v39  ;;  %2080 = vmatpush1.bf16.msra.mxu1 %v3338_v28  ;;  %v3353_v28 = vld [vmem:[#allocation7 + $0x1e8] ss:$16 sps:$4 sm:$0xff]  }
 0x257   : > { %1388 = vst [vmem:[%s4078_s18 + $0xc0] sm:$0xff] %v1324_v36  ;;  %v1326_v45 = vmax.f32 %v2975_v40, 0.0  ;;  %2081 = vmatprep.subr.bf16.mxu1 %v3343_v31 }
 0x258   : > { %1389 = vst [vmem:[%s4078_s18 + $0xc8] sm:$0xff] %v1325_v42  ;;  %v1327_v49 = vmax.f32 %v2976_v43, 0.0 }
 0x259   : > { %1390 = vst [vmem:[%s4078_s18 + $0xd0] sm:$0xff] %v1326_v45  ;;  %v4167_v50 = vpack.c.bf16 %v1326_v45, %v1324_v36 }
 0x25a   : > { %1391 = vst [vmem:[%s4078_s18 + $0xd8] sm:$0xff] %v1327_v49  ;;  %v4170_v51 = vpack.c.bf16 %v1327_v49, %v1325_v42  ;;  %v1211_v53 = vpop.f32.mrb[28].mxu0  ;;  %2082 = vmatpush1.bf16.msra.mxu1 %v3341_v44 }
 0x25b   : > { %v2977_v56 = vadd.f32 %v1211_v53, %v4067_v38  ;;  %v1213_v57 = vpop.f32.mrb[29].mxu0  ;;  %2083 = vmatprep.subr.bf16.mxu1 %v3346_v46 }
 0x25c   : > { %v2978_v59 = vadd.f32 %v1213_v57, %v4071_v39  ;;  %v1215_v60 = vpop.f32.mrb[30].mxu0  ;;  %1958 = vmatprep.mubr.bf16.mxu1 %v4170_v51 }
 0x25d   : > { %v1328_v61 = vmax.f32 %v2977_v56, 0.0  ;;  %v2979_v62 = vadd.f32 %v1215_v60, %v4067_v38  ;;  %v1217_v63 = vpop.f32.mrb[31].mxu0  ;;  %1959 = vmatmul.mubr.bf16.gmra.mrb[24].mxu1 %v4167_v50 }
 0x25e   : > { %v1329_v0 = vmax.f32 %v2978_v59, 0.0  ;;  %v2980_v1 = vadd.f32 %v1217_v63, %v4071_v39  ;;  %2084 = vmatpush1.bf16.msra.mxu1 %v3344_v55 }
 0x25f   : > { %1392 = vst [vmem:[%s4078_s18 + $0xe0] sm:$0xff] %v1328_v61  ;;  %v1330_v5 = vmax.f32 %v2979_v62, 0.0  ;;  %2085 = vmatprep.subr.bf16.mxu1 %v3349_v58 }
 0x260   : > { %1393 = vst [vmem:[%s4078_s18 + $0xe8] sm:$0xff] %v1329_v0  ;;  %v1331_v9 = vmax.f32 %v2980_v1, 0.0 }
 0x261   : > { %1394 = vst [vmem:[%s4078_s18 + $0xf0] sm:$0xff] %v1330_v5  ;;  %v4181_v10 = vpack.c.bf16 %v1330_v5, %v1328_v61 }
 0x262   : > { %1395 = vst [vmem:[%s4078_s18 + $0xf8] sm:$0xff] %v1331_v9  ;;  %v4184_v11 = vpack.c.bf16 %v1331_v9, %v1329_v0  ;;  %v1221_v12 = vpop.f32.mrb[32].mxu0  ;;  %2086 = vmatpush1.bf16.msra.mxu1 %v3347_v2 }
 0x263   : > { %v2981_v14 = vadd.f32 %v1221_v12, %v4067_v38  ;;  %v1223_v15 = vpop.f32.mrb[33].mxu0  ;;  %2087 = vmatprep.subr.bf16.mxu1 %v3352_v8 }
 0x264   : > { %v2982_v17 = vadd.f32 %v1223_v15, %v4071_v39  ;;  %v1225_v18 = vpop.f32.mrb[34].mxu0  ;;  %1968 = vmatprep.mubr.bf16.mxu1 %v4184_v11 }
 0x265   : > { %v1332_v19 = vmax.f32 %v2981_v14, 0.0  ;;  %v2983_v20 = vadd.f32 %v1225_v18, %v4067_v38  ;;  %v1227_v21 = vpop.f32.mrb[35].mxu0  ;;  %1969 = vmatmul.mubr.bf16.gmra.mrb[28].mxu1 %v4181_v10 }
 0x266   : > { %v1333_v22 = vmax.f32 %v2982_v17, 0.0  ;;  %v2984_v27 = vadd.f32 %v1227_v21, %v4071_v39  ;;  %2088 = vmatpush1.bf16.msra.mxu1 %v3350_v13 }
 0x267   : > { %1396 = vst [vmem:[%s4078_s18 + $0x100] sm:$0xff] %v1332_v19  ;;  %v1334_v29 = vmax.f32 %v2983_v20, 0.0  ;;  %2089 = vmatprep.subr.bf16.mxu1 %v3355_v16 }
 0x268   : > { %1397 = vst [vmem:[%s4078_s18 + $0x108] sm:$0xff] %v1333_v22  ;;  %v1335_v30 = vmax.f32 %v2984_v27, 0.0 }
 0x269   : > { %1398 = vst [vmem:[%s4078_s18 + $0x110] sm:$0xff] %v1334_v29  ;;  %v4195_v31 = vpack.c.bf16 %v1334_v29, %v1332_v19 }
 0x26a   : > { %1399 = vst [vmem:[%s4078_s18 + $0x118] sm:$0xff] %v1335_v30  ;;  %v4198_v32 = vpack.c.bf16 %v1335_v30, %v1333_v22  ;;  %v1231_v33 = vpop.f32.mrb[36].mxu0  ;;  %2090 = vmatpush1.bf16.msra.mxu1 %v3353_v28 }
 0x26b   : > { %v2985_v36 = vadd.f32 %v1231_v33, %v4067_v38  ;;  %v1233_v40 = vpop.f32.mrb[37].mxu0 }
 0x26c   : > { %v2986_v41 = vadd.f32 %v1233_v40, %v4071_v39  ;;  %v1235_v42 = vpop.f32.mrb[38].mxu0  ;;  %1978 = vmatprep.mubr.bf16.mxu1 %v4198_v32 }
 0x26d   : > { %v1336_v43 = vmax.f32 %v2985_v36, 0.0  ;;  %v2987_v44 = vadd.f32 %v1235_v42, %v4067_v38  ;;  %v1237_v45 = vpop.f32.mrb[39].mxu0  ;;  %1979 = vmatmul.mubr.bf16.gmra.mrb[32].mxu1 %v4195_v31 }
 0x26e   : > { %v1337_v46 = vmax.f32 %v2986_v41, 0.0  ;;  %v2988_v49 = vadd.f32 %v1237_v45, %v4071_v39 }
 0x26f   : > { %1400 = vst [vmem:[%s4078_s18 + $0x120] sm:$0xff] %v1336_v43  ;;  %v1338_v53 = vmax.f32 %v2987_v44, 0.0 }
 0x270   : > { %1401 = vst [vmem:[%s4078_s18 + $0x128] sm:$0xff] %v1337_v46  ;;  %v1339_v55 = vmax.f32 %v2988_v49, 0.0 }
 0x271   : > { %1402 = vst [vmem:[%s4078_s18 + $0x130] sm:$0xff] %v1338_v53  ;;  %v4209_v56 = vpack.c.bf16 %v1338_v53, %v1336_v43 }
 0x272   : > { %1403 = vst [vmem:[%s4078_s18 + $0x138] sm:$0xff] %v1339_v55  ;;  %v4212_v57 = vpack.c.bf16 %v1339_v55, %v1337_v46  ;;  %v1241_v58 = vpop.f32.mrb[40].mxu0 }
 0x273   : > { %v2989_v59 = vadd.f32 %v1241_v58, %v4067_v38  ;;  %v1243_v60 = vpop.f32.mrb[41].mxu0 }
 0x274   : > { %v2990_v61 = vadd.f32 %v1243_v60, %v4071_v39  ;;  %v1245_v62 = vpop.f32.mrb[42].mxu0  ;;  %1988 = vmatprep.mubr.bf16.mxu1 %v4212_v57 }
 0x275   : > { %v1340_v63 = vmax.f32 %v2989_v59, 0.0  ;;  %v2991_v0 = vadd.f32 %v1245_v62, %v4067_v38  ;;  %v1247_v1 = vpop.f32.mrb[43].mxu0  ;;  %1989 = vmatmul.mubr.bf16.gmra.mrb[36].mxu1 %v4209_v56 }
 0x276   : > { %v1341_v2 = vmax.f32 %v2990_v61, 0.0  ;;  %v2992_v5 = vadd.f32 %v1247_v1, %v4071_v39 }
 0x277   : > { %1404 = vst [vmem:[%s4078_s18 + $0x140] sm:$0xff] %v1340_v63  ;;  %v1342_v8 = vmax.f32 %v2991_v0, 0.0 }
 0x278   : > { %1405 = vst [vmem:[%s4078_s18 + $0x148] sm:$0xff] %v1341_v2  ;;  %v1343_v9 = vmax.f32 %v2992_v5, 0.0 }
 0x279   : > { %1406 = vst [vmem:[%s4078_s18 + $0x150] sm:$0xff] %v1342_v8  ;;  %v4223_v12 = vpack.c.bf16 %v1342_v8, %v1340_v63 }
 0x27a   : > { %1407 = vst [vmem:[%s4078_s18 + $0x158] sm:$0xff] %v1343_v9  ;;  %v4226_v13 = vpack.c.bf16 %v1343_v9, %v1341_v2  ;;  %v1251_v14 = vpop.f32.mrb[44].mxu0 }
 0x27b   : > { %v2993_v15 = vadd.f32 %v1251_v14, %v4067_v38  ;;  %v1253_v16 = vpop.f32.mrb[45].mxu0 }
 0x27c   : > { %v2994_v17 = vadd.f32 %v1253_v16, %v4071_v39  ;;  %v1255_v18 = vpop.f32.mrb[46].mxu0  ;;  %1998 = vmatprep.mubr.bf16.mxu1 %v4226_v13 }
 0x27d   : > { %v1344_v19 = vmax.f32 %v2993_v15, 0.0  ;;  %v2995_v20 = vadd.f32 %v1255_v18, %v4067_v38  ;;  %v1257_v21 = vpop.f32.mrb[47].mxu0  ;;  %1999 = vmatmul.mubr.bf16.gmra.mrb[40].mxu1 %v4223_v12 }
 0x27e   : > { %v1345_v22 = vmax.f32 %v2994_v17, 0.0  ;;  %v2996_v27 = vadd.f32 %v1257_v21, %v4071_v39 }
 0x27f   : > { %1408 = vst [vmem:[%s4078_s18 + $0x160] sm:$0xff] %v1344_v19  ;;  %v1346_v28 = vmax.f32 %v2995_v20, 0.0 }
 0x280   : > { %1409 = vst [vmem:[%s4078_s18 + $0x168] sm:$0xff] %v1345_v22  ;;  %v1347_v29 = vmax.f32 %v2996_v27, 0.0 }
 0x281   : > { %1410 = vst [vmem:[%s4078_s18 + $0x170] sm:$0xff] %v1346_v28  ;;  %v4237_v30 = vpack.c.bf16 %v1346_v28, %v1344_v19 }
 0x282   : > { %1411 = vst [vmem:[%s4078_s18 + $0x178] sm:$0xff] %v1347_v29  ;;  %v4240_v33 = vpack.c.bf16 %v1347_v29, %v1345_v22  ;;  %v1261_v36 = vpop.f32.mrb[48].mxu0 }
 0x283   : > { %v2997_v40 = vadd.f32 %v1261_v36, %v4067_v38  ;;  %v1263_v41 = vpop.f32.mrb[49].mxu0 }
 0x284   : > { %v2998_v42 = vadd.f32 %v1263_v41, %v4071_v39  ;;  %v1265_v43 = vpop.f32.mrb[50].mxu0  ;;  %2008 = vmatprep.mubr.bf16.mxu1 %v4240_v33 }
 0x285   : > { %v1348_v44 = vmax.f32 %v2997_v40, 0.0  ;;  %v2999_v45 = vadd.f32 %v1265_v43, %v4067_v38  ;;  %v1267_v46 = vpop.f32.mrb[51].mxu0  ;;  %2009 = vmatmul.mubr.bf16.gmra.mrb[44].mxu1 %v4237_v30 }
 0x286   : > { %v1349_v49 = vmax.f32 %v2998_v42, 0.0  ;;  %v3000_v53 = vadd.f32 %v1267_v46, %v4071_v39 }
 0x287   : > { %1412 = vst [vmem:[%s4078_s18 + $0x180] sm:$0xff] %v1348_v44  ;;  %v1350_v55 = vmax.f32 %v2999_v45, 0.0 }
 0x288   : > { %1413 = vst [vmem:[%s4078_s18 + $0x188] sm:$0xff] %v1349_v49  ;;  %v1351_v58 = vmax.f32 %v3000_v53, 0.0 }
 0x289   : > { %1414 = vst [vmem:[%s4078_s18 + $0x190] sm:$0xff] %v1350_v55  ;;  %v4251_v59 = vpack.c.bf16 %v1350_v55, %v1348_v44 }
 0x28a   : > { %1415 = vst [vmem:[%s4078_s18 + $0x198] sm:$0xff] %v1351_v58  ;;  %v4254_v60 = vpack.c.bf16 %v1351_v58, %v1349_v49  ;;  %v1271_v61 = vpop.f32.mrb[52].mxu0 }
 0x28b   : > { %v3001_v62 = vadd.f32 %v1271_v61, %v4067_v38  ;;  %v1273_v63 = vpop.f32.mrb[53].mxu0 }
 0x28c   : > { %v3002_v0 = vadd.f32 %v1273_v63, %v4071_v39  ;;  %v1275_v1 = vpop.f32.mrb[54].mxu0  ;;  %2018 = vmatprep.mubr.bf16.mxu1 %v4254_v60 }
 0x28d   : > { %v1352_v2 = vmax.f32 %v3001_v62, 0.0  ;;  %v3003_v5 = vadd.f32 %v1275_v1, %v4067_v38  ;;  %v1277_v8 = vpop.f32.mrb[55].mxu0  ;;  %2019 = vmatmul.mubr.bf16.gmra.mrb[48].mxu1 %v4251_v59 }
 0x28e   : > { %v1353_v9 = vmax.f32 %v3002_v0, 0.0  ;;  %v3004_v14 = vadd.f32 %v1277_v8, %v4071_v39 }
 0x28f   : > { %1416 = vst [vmem:[%s4078_s18 + $0x1a0] sm:$0xff] %v1352_v2  ;;  %v1354_v15 = vmax.f32 %v3003_v5, 0.0 }
 0x290   : > { %1417 = vst [vmem:[%s4078_s18 + $0x1a8] sm:$0xff] %v1353_v9  ;;  %v1355_v16 = vmax.f32 %v3004_v14, 0.0 }
 0x291   : > { %1418 = vst [vmem:[%s4078_s18 + $0x1b0] sm:$0xff] %v1354_v15  ;;  %v4265_v17 = vpack.c.bf16 %v1354_v15, %v1352_v2 }
 0x292   : > { %1419 = vst [vmem:[%s4078_s18 + $0x1b8] sm:$0xff] %v1355_v16  ;;  %v4268_v18 = vpack.c.bf16 %v1355_v16, %v1353_v9  ;;  %v1281_v19 = vpop.f32.mrb[56].mxu0 }
 0x293   : > { %v3005_v20 = vadd.f32 %v1281_v19, %v4067_v38  ;;  %v1283_v21 = vpop.f32.mrb[57].mxu0 }
 0x294   : > { %v3006_v22 = vadd.f32 %v1283_v21, %v4071_v39  ;;  %v1285_v27 = vpop.f32.mrb[58].mxu0  ;;  %2028 = vmatprep.mubr.bf16.mxu1 %v4268_v18 }
 0x295   : > { %v1356_v28 = vmax.f32 %v3005_v20, 0.0  ;;  %v3007_v29 = vadd.f32 %v1285_v27, %v4067_v38  ;;  %v1287_v36 = vpop.f32.mrb[59].mxu0  ;;  %2029 = vmatmul.mubr.bf16.gmra.mrb[52].mxu1 %v4265_v17 }
 0x296   : > { %v1357_v40 = vmax.f32 %v3006_v22, 0.0  ;;  %v3008_v41 = vadd.f32 %v1287_v36, %v4071_v39 }
 0x297   : > { %1420 = vst [vmem:[%s4078_s18 + $0x1c0] sm:$0xff] %v1356_v28  ;;  %v1358_v42 = vmax.f32 %v3007_v29, 0.0 }
 0x298   : > { %1421 = vst [vmem:[%s4078_s18 + $0x1c8] sm:$0xff] %v1357_v40  ;;  %v1359_v43 = vmax.f32 %v3008_v41, 0.0 }
 0x299   : > { %1422 = vst [vmem:[%s4078_s18 + $0x1d0] sm:$0xff] %v1358_v42  ;;  %v4279_v44 = vpack.c.bf16 %v1358_v42, %v1356_v28 }
 0x29a   : > { %1423 = vst [vmem:[%s4078_s18 + $0x1d8] sm:$0xff] %v1359_v43  ;;  %v4282_v45 = vpack.c.bf16 %v1359_v43, %v1357_v40  ;;  %v1291_v46 = vpop.f32.mrb[60].mxu0 }
 0x29b   : > { %v3009_v49 = vadd.f32 %v1291_v46, %v4067_v38  ;;  %v1293_v53 = vpop.f32.mrb[61].mxu0 }
 0x29c   : > { %v3010_v55 = vadd.f32 %v1293_v53, %v4071_v39  ;;  %v1295_v58 = vpop.f32.mrb[62].mxu0  ;;  %2038 = vmatprep.mubr.bf16.mxu1 %v4282_v45 }
 0x29d   : > { %v1360_v61 = vmax.f32 %v3009_v49, 0.0  ;;  %v3011_v62 = vadd.f32 %v1295_v58, %v4067_v38  ;;  %v1297_v63 = vpop.f32.mrb[63].mxu0  ;;  %2039 = vmatmul.mubr.bf16.gmra.mrb[56].mxu1 %v4279_v44  ;;  %v4318_v38 = vld [vmem:[#allocation8] sm:$0xf] }
 0x29e   : > { %v1361_v0 = vmax.f32 %v3010_v55, 0.0  ;;  %v3012_v1 = vadd.f32 %v1297_v63, %v4071_v39  ;;  %v4324_v39 = vrot.slane %v4318_v38, %v586_v35  ;;  %v3357_v35 = vld [vmem:[%s3916_s13 + $0x8] sm:$0xff] }
 0x29f   : > { %1424 = vst [vmem:[%s4078_s18 + $0x1e0] sm:$0xff] %v1360_v61  ;;  %v1362_v2 = vmax.f32 %v3011_v62, 0.0 }
 0x2a0   : > { %1425 = vst [vmem:[%s4078_s18 + $0x1e8] sm:$0xff] %v1361_v0  ;;  %v1363_v5 = vmax.f32 %v3012_v1, 0.0 }
 0x2a1   : > { %1426 = vst [vmem:[%s4078_s18 + $0x1f0] sm:$0xff] %v1362_v2  ;;  %v4293_v8 = vpack.c.bf16 %v1362_v2, %v1360_v61 }
 0x2a2   : > { %1427 = vst [vmem:[%s4078_s18 + $0x1f8] sm:$0xff] %v1363_v5  ;;  %v1459_v9 = vpack.c.bf16 %v1363_v5, %v1361_v0 }
 0x2a4   : > { %2048 = vmatprep.mubr.bf16.mxu1 %v1459_v9 }
 0x2a5   : > { %2049 = vmatmul.mubr.bf16.gmra.mrb[60].mxu1 %v4293_v8 }
 0x2a6   : > { %2091 = vmatprep.mubr.bf16.mxu1 %v4086_v54 }
 0x2ad   : > { %2092 = vmatmul.mubr.bf16.vlgmr.msra.gmra.mrb[64].mxu1 %v4083_v52  ;;  %v4330_v52 = vrot.slane %v4318_v38, %v590_v37 }
 0x2ae   : > { %2101 = vmatprep.mubr.bf16.mxu1 %v4100_v7 }
 0x2b5   : > { %2102 = vmatmul.mubr.bf16.gmra.mrb[68].mxu1 %v4097_v6 }
 0x2b6   : > { %2111 = vmatprep.mubr.bf16.mxu1 %v4114_v25 }
 0x2bd   : > { %2112 = vmatmul.mubr.bf16.gmra.mrb[72].mxu1 %v4111_v24 }
 0x2be   : > { %2121 = vmatprep.mubr.bf16.mxu1 %v4128_v48 }
 0x2c5   : > { %2122 = vmatmul.mubr.bf16.gmra.mrb[76].mxu1 %v4125_v47  ;;  %v3356_v47 = vld [vmem:[%s3916_s13] sm:$0xff] }
 0x2c6   : > { %2131 = vmatprep.mubr.bf16.mxu1 %v4142_v4 }
 0x2cd   : > { %2132 = vmatmul.mubr.bf16.gmra.mrb[80].mxu1 %v4139_v3 }
 0x2ce   : > { %2141 = vmatprep.mubr.bf16.mxu1 %v4156_v26 }
 0x2d5   : > { %2142 = vmatmul.mubr.bf16.gmra.mrb[84].mxu1 %v4153_v23 }
 0x2d6   : > { %2151 = vmatprep.mubr.bf16.mxu1 %v4170_v51 }
 0x2dd   : > { %2152 = vmatmul.mubr.bf16.gmra.mrb[88].mxu1 %v4167_v50 }
 0x2de   : > { %2161 = vmatprep.mubr.bf16.mxu1 %v4184_v11 }
 0x2e5   : > { %2162 = vmatmul.mubr.bf16.gmra.mrb[92].mxu1 %v4181_v10 }
 0x2e6   : > { %2171 = vmatprep.mubr.bf16.mxu1 %v4198_v32 }
 0x2ed   : > { %2172 = vmatmul.mubr.bf16.gmra.mrb[96].mxu1 %v4195_v31 }
 0x2ee   : > { %2181 = vmatprep.mubr.bf16.mxu1 %v4212_v57 }
 0x2f5   : > { %2182 = vmatmul.mubr.bf16.gmra.mrb[100].mxu1 %v4209_v56 }
 0x2f6   : > { %2191 = vmatprep.mubr.bf16.mxu1 %v4226_v13 }
 0x2fd   : > { %2192 = vmatmul.mubr.bf16.gmra.mrb[104].mxu1 %v4223_v12 }
 0x2fe   : > { %2201 = vmatprep.mubr.bf16.mxu1 %v4240_v33 }
 0x300   : > { %v1900_v54 = vpop.f32.mrb[0].mxu1 }
 0x301   : > { %v1901_v6 = vadd.f32 %v1900_v54, %v4324_v39  ;;  %v1902_v7 = vpop.f32.mrb[1].mxu1 }
 0x302   : > { %v1903_v24 = vadd.f32 %v1902_v7, %v4330_v52  ;;  %v4334_v25 = vpop.f32.mrb[2].mxu1 }
 0x303   : > { %v2252_v48 = vsub.f32 %v3356_v47, %v1901_v6  ;;  %v4337_v3 = vpop.f32.mrb[3].mxu1 }
 0x304   : > { %v2253_v4 = vsub.f32 %v3357_v35, %v1903_v24 }
 0x305   : > { %v2380_v23 = vmul.f32 %v2252_v48, %v2252_v48  ;;  %2202 = vmatmul.mubr.bf16.gmra.mrb[108].mxu1 %v4237_v30 }
 0x306   : > { %v2381_v26 = vmul.f32 %v2253_v4, %v2253_v4  ;;  %2211 = vmatprep.mubr.bf16.mxu1 %v4254_v60 }
 0x308   : > { %v4342_v37 = vadd.f32 %v2381_v26, %v2380_v23  ;;  %v4344_v50 = vpop.f32.mrb[4].mxu1 }
 0x309   : > { %v4346_v51 = vpop.f32.mrb[5].mxu1 }
 0x30a   : > { %v4348_v10 = vpop.f32.mrb[6].mxu1 }
 0x30b   : > { %v4350_v11 = vpop.f32.mrb[7].mxu1 }
 0x30d   : > { %2212 = vmatmul.mubr.bf16.gmra.mrb[112].mxu1 %v4251_v59 }
 0x30e   : > { %2221 = vmatprep.mubr.bf16.mxu1 %v4268_v18 }
 0x310   : > { %v4354_v31 = vpop.f32.mrb[8].mxu1 }
 0x311   : > { %v4356_v32 = vpop.f32.mrb[9].mxu1 }
 0x312   : > { %v4358_v56 = vpop.f32.mrb[10].mxu1 }
 0x313   : > { %v4360_v57 = vpop.f32.mrb[11].mxu1 }
 0x315   : > { %2222 = vmatmul.mubr.bf16.gmra.mrb[116].mxu1 %v4265_v17 }
 0x316   : > { %2231 = vmatprep.mubr.bf16.mxu1 %v4282_v45 }
 0x318   : > { %v4364_v12 = vpop.f32.mrb[12].mxu1 }
 0x319   : > { %v4366_v13 = vpop.f32.mrb[13].mxu1 }
 0x31a   : > { %v4368_v30 = vpop.f32.mrb[14].mxu1 }
 0x31b   : > { %v4370_v33 = vpop.f32.mrb[15].mxu1 }
 0x31d   : > { %2232 = vmatmul.mubr.bf16.gmra.mrb[120].mxu1 %v4279_v44 }
 0x31e   : > { %2241 = vmatprep.mubr.bf16.mxu1 %v1459_v9 }
 0x320   : > { %v4373_v59 = vpop.f32.mrb[16].mxu1 }
 0x321   : > { %v4375_v60 = vpop.f32.mrb[17].mxu1 }
 0x322   : > { %v4377_v14 = vpop.f32.mrb[18].mxu1 }
 0x323   : > { %v4379_v15 = vpop.f32.mrb[19].mxu1 }
 0x325   : > { %2242 = vmatmul.mubr.bf16.gmra.mrb[124].mxu1 %v4293_v8 }
 0x328   : > { %v4382_v16 = vpop.f32.mrb[20].mxu1 }
 0x329   : > { %v4384_v17 = vpop.f32.mrb[21].mxu1 }
 0x32a   : > { %v4386_v18 = vpop.f32.mrb[22].mxu1 }
 0x32b   : > { %v4388_v19 = vpop.f32.mrb[23].mxu1 }
 0x330   : > { %v4390_v20 = vpop.f32.mrb[24].mxu1 }
 0x331   : > { %v4392_v21 = vpop.f32.mrb[25].mxu1 }
 0x332   : > { %v4394_v22 = vpop.f32.mrb[26].mxu1 }
 0x333   : > { %v4396_v27 = vpop.f32.mrb[27].mxu1 }
 0x338   : > { %v4398_v28 = vpop.f32.mrb[28].mxu1 }
 0x339   : > { %v4400_v29 = vpop.f32.mrb[29].mxu1 }
 0x33a   : > { %v4402_v36 = vpop.f32.mrb[30].mxu1 }
 0x33b   : > { %v4404_v40 = vpop.f32.mrb[31].mxu1 }
 0x340   : > { %v4406_v41 = vpop.f32.mrb[32].mxu1 }
 0x341   : > { %v4408_v42 = vpop.f32.mrb[33].mxu1 }
 0x342   : > { %v4410_v43 = vpop.f32.mrb[34].mxu1 }
 0x343   : > { %v4412_v44 = vpop.f32.mrb[35].mxu1 }
 0x348   : > { %v4414_v45 = vpop.f32.mrb[36].mxu1 }
 0x349   : > { %v4416_v46 = vpop.f32.mrb[37].mxu1 }
 0x34a   : > { %v4418_v49 = vpop.f32.mrb[38].mxu1 }
 0x34b   : > { %v4420_v53 = vpop.f32.mrb[39].mxu1 }
 0x350   : > { %v4422_v55 = vpop.f32.mrb[40].mxu1 }
 0x351   : > { %v4424_v58 = vpop.f32.mrb[41].mxu1 }
 0x352   : > { %5031 = vst [vmem:[#allocation15_spill] sm:$0xff] %v4424_v58  ;;  %v4426_v61 = vpop.f32.mrb[42].mxu1 }
 0x353   : > { %5032 = vst [vmem:[#allocation16_spill] sm:$0xff] %v4426_v61  ;;  %v4428_v62 = vpop.f32.mrb[43].mxu1 }
 0x354   : > { %5033 = vst [vmem:[#allocation17_spill] sm:$0xff] %v4428_v62 }
 0x358   : > { %v4430_v63 = vpop.f32.mrb[44].mxu1 }
 0x359   : > { %5034 = vst [vmem:[#allocation18_spill] sm:$0xff] %v4430_v63  ;;  %v4432_v0 = vpop.f32.mrb[45].mxu1 }
 0x35a   : > { %5035 = vst [vmem:[#allocation19_spill] sm:$0xff] %v4432_v0  ;;  %v4434_v1 = vpop.f32.mrb[46].mxu1 }
 0x35b   : > { %5036 = vst [vmem:[#allocation20_spill] sm:$0xff] %v4434_v1  ;;  %v4436_v2 = vpop.f32.mrb[47].mxu1 }
 0x35c   : > { %5037 = vst [vmem:[#allocation21_spill] sm:$0xff] %v4436_v2 }
 0x360   : > { %v4438_v5 = vpop.f32.mrb[48].mxu1 }
 0x361   : > { %5038 = vst [vmem:[#allocation22_spill] sm:$0xff] %v4438_v5  ;;  %v4440_v8 = vpop.f32.mrb[49].mxu1  ;;  %v3360_v5 = vld [vmem:[%s3916_s13 + $0x20] sm:$0xff] }
 0x362   : > { %5039 = vst [vmem:[#allocation23_spill] sm:$0xff] %v4440_v8  ;;  %v4442_v9 = vpop.f32.mrb[50].mxu1 }
 0x363   : > { %5040 = vst [vmem:[#allocation24_spill] sm:$0xff] %v4442_v9  ;;  %v4444_v54 = vpop.f32.mrb[51].mxu1  ;;  %v3358_v9 = vld [vmem:[%s3916_s13 + $0x10] sm:$0xff] }
 0x364   : > { %5041 = vst [vmem:[#allocation25_spill] sm:$0xff] %v4444_v54 }
 0x368   : > { %v4446_v6 = vpop.f32.mrb[52].mxu1 }
 0x369   : > { %5042 = vst [vmem:[#allocation26_spill] sm:$0xff] %v4446_v6  ;;  %v4448_v7 = vpop.f32.mrb[53].mxu1  ;;  %v1536_v6 = vsub.s32 2, %v4058_v34 }
 0x36a   : > { %5043 = vst [vmem:[#allocation27_spill] sm:$0xff] %v4448_v7  ;;  %v4450_v24 = vpop.f32.mrb[54].mxu1 }
 0x36b   : > { %5044 = vst [vmem:[#allocation28_spill] sm:$0xff] %v4450_v24  ;;  %v4452_v47 = vpop.f32.mrb[55].mxu1 }
 0x36c   : > { %5045 = vst [vmem:[#allocation29_spill] sm:$0xff] %v4452_v47  ;;  %v1540_v47 = vsub.s32 3, %v4058_v34 }
 0x370   : > { %v4454_v48 = vpop.f32.mrb[56].mxu1 }
 0x371   : > { %5046 = vst [vmem:[#allocation30_spill] sm:$0xff] %v4454_v48  ;;  %v4456_v35 = vpop.f32.mrb[57].mxu1 }
 0x372   : > { %5047 = vst [vmem:[#allocation31_spill] sm:$0xff] %v4456_v35  ;;  %v4458_v4 = vpop.f32.mrb[58].mxu1  ;;  %v4473_v35 = vrot.slane %v4318_v38, %v1536_v6 }
 0x373   : > { %5048 = vst [vmem:[#allocation32_spill] sm:$0xff] %v4458_v4  ;;  %v4460_v23 = vpop.f32.mrb[59].mxu1 }
 0x374   : > { %5049 = vst [vmem:[#allocation33_spill] sm:$0xff] %v4460_v23  ;;  %v4476_v23 = vrot.slane %v4318_v38, %v1540_v47  ;;  %v3359_v38 = vld [vmem:[%s3916_s13 + $0x18] sm:$0xff] }
 0x378   : > { %v4462_v26 = vpop.f32.mrb[60].mxu1 }
 0x379   : > { %5050 = vst [vmem:[#allocation34_spill] sm:$0xff] %v4462_v26  ;;  %v4464_v54 = vpop.f32.mrb[61].mxu1 }
 0x37a   : > { %5051 = vst [vmem:[#allocation35_spill] sm:$0xff] %v4464_v54  ;;  %v4467_v7 = vpop.f32.mrb[62].mxu1  ;;  %v1905_v54 = vadd.f32 %v4334_v25, %v4324_v39 }
 0x37b   : > { %5052 = vst [vmem:[#allocation36_spill] sm:$0xff] %v4467_v7  ;;  %v4470_v48 = vpop.f32.mrb[63].mxu1 }
 0x37c   : > { %5053 = vst [vmem:[#allocation37_spill] sm:$0xff] %v4470_v48  ;;  %v1907_v48 = vadd.f32 %v4337_v3, %v4330_v52  ;;  %v2256_v2 = vsub.f32 %v3360_v5, %v1905_v54  ;;  %v3362_v5 = vld [vmem:[%s3916_s13 + $0x30] sm:$0xff] }
 0x380   : > { %v2093_v4 = vpop.f32.mrb[64].mxu1 }
 0x381   : > { %v2094_v26 = vadd.f32 %v2093_v4, %v4473_v35  ;;  %v2095_v24 = vpop.f32.mrb[65].mxu1  ;;  %v3361_v4 = vld [vmem:[%s3916_s13 + $0x28] sm:$0xff] }
 0x382   : > { %v2096_v7 = vadd.f32 %v2095_v24, %v4476_v23  ;;  %v2097_v34 = vpop.f32.mrb[66].mxu1  ;;  %v2257_v63 = vsub.f32 %v3361_v4, %v1907_v48  ;;  %v1913_v48 = vadd.f32 %v4346_v51, %v4330_v52  ;;  %v3364_v4 = vld [vmem:[%s3916_s13 + $0x40] sm:$0xff] }
 0x383   : > { %v2254_v6 = vsub.f32 %v3358_v9, %v2094_v26  ;;  %v2099_v8 = vpop.f32.mrb[67].mxu1  ;;  %v2098_v25 = vadd.f32 %v2097_v34, %v4473_v35  ;;  %v2384_v9 = vmul.f32 %v2256_v2, %v2256_v2  ;;  %v1911_v26 = vadd.f32 %v4344_v50, %v4324_v39 }
 0x384   : > { %v2255_v47 = vsub.f32 %v3359_v38, %v2096_v7  ;;  %v2100_v3 = vadd.f32 %v2099_v8, %v4476_v23  ;;  %v2385_v38 = vmul.f32 %v2257_v63, %v2257_v63 }
 0x385   : > { %v2382_v1 = vmul.f32 %v2254_v6, %v2254_v6  ;;  %v2258_v54 = vsub.f32 %v3362_v5, %v2098_v25  ;;  %v2260_v2 = vsub.f32 %v3364_v4, %v1911_v26  ;;  %v3366_v26 = vld [vmem:[%s3916_s13 + $0x50] sm:$0xff] }
 0x386   : > { %v2383_v0 = vmul.f32 %v2255_v47, %v2255_v47 }
 0x387   : > { %v2509_v24 = vadd.f32 %v4342_v37, %v2382_v1  ;;  %v3363_v37 = vld [vmem:[%s3916_s13 + $0x38] sm:$0xff]  ;;  %v2386_v58 = vmul.f32 %v2258_v54, %v2258_v54 }
 0x388   : > { %v2103_v62 = vpop.f32.mrb[68].mxu1  ;;  %v2259_v1 = vsub.f32 %v3363_v37, %v2100_v3  ;;  %v1915_v3 = vadd.f32 %v4348_v10, %v4324_v39 }
 0x389   : > { %v2510_v7 = vadd.f32 %v2509_v24, %v2383_v0  ;;  %v2105_v6 = vpop.f32.mrb[69].mxu1  ;;  %v2104_v50 = vadd.f32 %v2103_v62, %v4473_v35  ;;  %v3365_v0 = vld [vmem:[%s3916_s13 + $0x48] sm:$0xff] }
 0x38a   : > { %v2107_v34 = vpop.f32.mrb[70].mxu1  ;;  %v2261_v25 = vsub.f32 %v3365_v0, %v1913_v48  ;;  %v2387_v5 = vmul.f32 %v2259_v1, %v2259_v1  ;;  %v2106_v63 = vadd.f32 %v2105_v6, %v4476_v23  ;;  %v1917_v48 = vadd.f32 %v4350_v11, %v4330_v52  ;;  %v3368_v1 = vld [vmem:[%s3916_s13 + $0x60] sm:$0xff] }
 0x38b   : > { %v2511_v47 = vadd.f32 %v2510_v7, %v2384_v9  ;;  %v2109_v8 = vpop.f32.mrb[71].mxu1  ;;  %v2388_v9 = vmul.f32 %v2260_v2, %v2260_v2  ;;  %v2264_v4 = vsub.f32 %v3368_v1, %v1915_v3  ;;  %v2108_v10 = vadd.f32 %v2107_v34, %v4473_v35  ;;  %v3370_v3 = vld [vmem:[%s3916_s13 + $0x70] sm:$0xff] }
 0x38c   : > { %v2389_v62 = vmul.f32 %v2261_v25, %v2261_v25  ;;  %v2110_v25 = vadd.f32 %v2109_v8, %v4476_v23  ;;  %v3371_v8 = vld [vmem:[%s3916_s13 + $0x78] sm:$0xff] }
 0x38d   : > { %v2512_v61 = vadd.f32 %v2511_v47, %v2385_v38  ;;  %v2262_v38 = vsub.f32 %v3366_v26, %v2104_v50 }
 0x38f   : > { %v2513_v24 = vadd.f32 %v2512_v61, %v2386_v58  ;;  %v3367_v61 = vld [vmem:[%s3916_s13 + $0x58] sm:$0xff]  ;;  %v2390_v0 = vmul.f32 %v2262_v38, %v2262_v38  ;;  %v2266_v38 = vsub.f32 %v3370_v3, %v2108_v10 }
 0x390   : > { %v2113_v51 = vpop.f32.mrb[72].mxu1  ;;  %v2263_v37 = vsub.f32 %v3367_v61, %v2106_v63  ;;  %v1921_v63 = vadd.f32 %v4354_v31, %v4324_v39 }
 0x391   : > { %v2514_v7 = vadd.f32 %v2513_v24, %v2387_v5  ;;  %v2115_v54 = vpop.f32.mrb[73].mxu1  ;;  %v3369_v24 = vld [vmem:[%s3916_s13 + $0x68] sm:$0xff]  ;;  %v2114_v10 = vadd.f32 %v2113_v51, %v4473_v35 }
 0x392   : > { %v2117_v47 = vpop.f32.mrb[74].mxu1  ;;  %v2265_v50 = vsub.f32 %v3369_v24, %v1917_v48  ;;  %v2391_v26 = vmul.f32 %v2263_v37, %v2263_v37  ;;  %v2267_v37 = vsub.f32 %v3371_v8, %v2110_v25  ;;  %v3373_v24 = vld [vmem:[%s3916_s13 + $0x88] sm:$0xff] }
 0x393   : > { %v2515_v58 = vadd.f32 %v2514_v7, %v2388_v9  ;;  %v2119_v6 = vpop.f32.mrb[75].mxu1  ;;  %v2392_v9 = vmul.f32 %v2264_v4, %v2264_v4  ;;  %v3372_v4 = vld [vmem:[%s3916_s13 + $0x80] sm:$0xff] }
 0x394   : > { %v2393_v48 = vmul.f32 %v2265_v50, %v2265_v50  ;;  %v2268_v31 = vsub.f32 %v3372_v4, %v1921_v63  ;;  %v2395_v50 = vmul.f32 %v2267_v37, %v2267_v37  ;;  %v3374_v63 = vld [vmem:[%s3916_s13 + $0x90] sm:$0xff] }
 0x395   : > { %v2516_v2 = vadd.f32 %v2515_v58, %v2389_v62  ;;  %v1923_v58 = vadd.f32 %v4356_v32, %v4330_v52  ;;  %v2116_v32 = vadd.f32 %v2115_v54, %v4476_v23  ;;  %v3375_v54 = vld [vmem:[%s3916_s13 + $0x98] sm:$0xff] }
 0x396   : > { %v2396_v25 = vmul.f32 %v2268_v31, %v2268_v31  ;;  %v3376_v31 = vld [vmem:[%s3916_s13 + $0xa0] sm:$0xff] }
 0x397   : > { %v2517_v5 = vadd.f32 %v2516_v2, %v2390_v0  ;;  %v2394_v0 = vmul.f32 %v2266_v38, %v2266_v38  ;;  %v2270_v38 = vsub.f32 %v3374_v63, %v2114_v10  ;;  %v2271_v37 = vsub.f32 %v3375_v54, %v2116_v32 }
 0x398   : > { %v4511_v11 = vpop.f32.mrb[76].mxu1  ;;  %v2118_v10 = vadd.f32 %v2117_v47, %v4473_v35 }
 0x399   : > { %v2518_v7 = vadd.f32 %v2517_v5, %v2391_v26  ;;  %v4516_v62 = vpop.f32.mrb[77].mxu1  ;;  %v2269_v5 = vsub.f32 %v3373_v24, %v1923_v58  ;;  %v3377_v24 = vld [vmem:[%s3916_s13 + $0xa8] sm:$0xff] }
 0x39a   : > { %v4518_v34 = vpop.f32.mrb[78].mxu1 }
 0x39b   : > { %v2519_v61 = vadd.f32 %v2518_v7, %v2392_v9  ;;  %v4523_v1 = vpop.f32.mrb[79].mxu1  ;;  %v1925_v7 = vadd.f32 %v4358_v56, %v4324_v39  ;;  %v2397_v58 = vmul.f32 %v2269_v5, %v2269_v5  ;;  %v2399_v5 = vmul.f32 %v2271_v37, %v2271_v37 }
 0x39d   : > { %v2520_v2 = vadd.f32 %v2519_v61, %v2393_v48  ;;  %v1927_v61 = vadd.f32 %v4360_v57, %v4330_v52  ;;  %v2272_v56 = vsub.f32 %v3376_v31, %v1925_v7  ;;  %v2120_v57 = vadd.f32 %v2119_v6, %v4476_v23  ;;  %v3378_v7 = vld [vmem:[%s3916_s13 + $0xb0] sm:$0xff]  ;;  %v3379_v6 = vld [vmem:[%s3916_s13 + $0xb8] sm:$0xff] }
 0x39f   : > { %v2521_v26 = vadd.f32 %v2520_v2, %v2394_v0  ;;  %v2398_v0 = vmul.f32 %v2270_v38, %v2270_v38  ;;  %v2400_v32 = vmul.f32 %v2272_v56, %v2272_v56  ;;  %v2274_v38 = vsub.f32 %v3378_v7, %v2118_v10  ;;  %v3380_v56 = vld [vmem:[%s3916_s13 + $0xc0] sm:$0xff]  ;;  %v3382_v7 = vld [vmem:[%s3916_s13 + $0xd0] sm:$0xff] }
 0x3a0   : > { %v4529_v9 = vpop.f32.mrb[80].mxu1  ;;  %v2275_v37 = vsub.f32 %v3379_v6, %v2120_v57  ;;  %v2124_v10 = vadd.f32 %v4511_v11, %v4473_v35 }
 0x3a1   : > { %v2522_v3 = vadd.f32 %v2521_v26, %v2395_v50  ;;  %v4534_v48 = vpop.f32.mrb[81].mxu1  ;;  %v2273_v26 = vsub.f32 %v3377_v24, %v1927_v61  ;;  %v3381_v24 = vld [vmem:[%s3916_s13 + $0xc8] sm:$0xff] }
 0x3a2   : > { %v4536_v51 = vpop.f32.mrb[82].mxu1 }
 0x3a3   : > { %v2523_v8 = vadd.f32 %v2522_v3, %v2396_v25  ;;  %v4541_v4 = vpop.f32.mrb[83].mxu1  ;;  %v1931_v3 = vadd.f32 %v4364_v12, %v4324_v39  ;;  %v2401_v61 = vmul.f32 %v2273_v26, %v2273_v26 }
 0x3a5   : > { %v2524_v2 = vadd.f32 %v2523_v8, %v2397_v58  ;;  %v1933_v8 = vadd.f32 %v4366_v13, %v4330_v52  ;;  %v2276_v12 = vsub.f32 %v3380_v56, %v1931_v3  ;;  %v2126_v13 = vadd.f32 %v4516_v62, %v4476_v23  ;;  %v3383_v62 = vld [vmem:[%s3916_s13 + $0xd8] sm:$0xff] }
 0x3a6   : > { %v1935_v3 = vadd.f32 %v4368_v30, %v4324_v39 }
 0x3a7   : > { %v2525_v50 = vadd.f32 %v2524_v2, %v2398_v0  ;;  %v2402_v0 = vmul.f32 %v2274_v38, %v2274_v38  ;;  %v2278_v38 = vsub.f32 %v3382_v7, %v2124_v10  ;;  %v2128_v10 = vadd.f32 %v4518_v34, %v4473_v35  ;;  %v3386_v7 = vld [vmem:[%s3916_s13 + $0xf0] sm:$0xff] }
 0x3a8   : > { %v4547_v25 = vpop.f32.mrb[84].mxu1 }
 0x3a9   : > { %v2526_v63 = vadd.f32 %v2525_v50, %v2399_v5  ;;  %v4552_v58 = vpop.f32.mrb[85].mxu1  ;;  %v2277_v50 = vsub.f32 %v3381_v24, %v1933_v8  ;;  %v2403_v5 = vmul.f32 %v2275_v37, %v2275_v37  ;;  %v2279_v37 = vsub.f32 %v3383_v62, %v2126_v13  ;;  %v3385_v24 = vld [vmem:[%s3916_s13 + $0xe8] sm:$0xff] }
 0x3aa   : > { %v4554_v47 = vpop.f32.mrb[86].mxu1 }
 0x3ab   : > { %v2527_v54 = vadd.f32 %v2526_v63, %v2400_v32  ;;  %v4559_v31 = vpop.f32.mrb[87].mxu1  ;;  %v2404_v32 = vmul.f32 %v2276_v12, %v2276_v12  ;;  %v2405_v8 = vmul.f32 %v2277_v50, %v2277_v50  ;;  %v3384_v12 = vld [vmem:[%s3916_s13 + $0xe0] sm:$0xff] }
 0x3ac   : > { %v2280_v30 = vsub.f32 %v3384_v12, %v1935_v3  ;;  %v1941_v3 = vadd.f32 %v4373_v59, %v4324_v39 }
 0x3ad   : > { %v2528_v2 = vadd.f32 %v2527_v54, %v2401_v61  ;;  %v1937_v54 = vadd.f32 %v4370_v33, %v4330_v52  ;;  %v2130_v33 = vadd.f32 %v4523_v1, %v4476_v23  ;;  %v3387_v1 = vld [vmem:[%s3916_s13 + $0xf8] sm:$0xff] }
 0x3af   : > { %v2529_v26 = vadd.f32 %v2528_v2, %v2402_v0  ;;  %v2406_v0 = vmul.f32 %v2278_v38, %v2278_v38  ;;  %v2282_v38 = vsub.f32 %v3386_v7, %v2128_v10  ;;  %v2134_v10 = vadd.f32 %v4529_v9, %v4473_v35  ;;  %v3390_v7 = vld [vmem:[%s3916_s13 + $0x110] sm:$0xff] }
 0x3b0   : > { %v4567_v57 = vpop.f32.mrb[88].mxu1 }
 0x3b1   : > { %v2530_v63 = vadd.f32 %v2529_v26, %v2403_v5  ;;  %v4572_v11 = vpop.f32.mrb[89].mxu1  ;;  %v2281_v26 = vsub.f32 %v3385_v24, %v1937_v54  ;;  %v2407_v5 = vmul.f32 %v2279_v37, %v2279_v37  ;;  %v2283_v37 = vsub.f32 %v3387_v1, %v2130_v33  ;;  %v3389_v24 = vld [vmem:[%s3916_s13 + $0x108] sm:$0xff] }
 0x3b2   : > { %v4574_v61 = vpop.f32.mrb[90].mxu1 }
 0x3b3   : > { %v2531_v6 = vadd.f32 %v2530_v63, %v2404_v32  ;;  %v4579_v56 = vpop.f32.mrb[91].mxu1  ;;  %v2408_v32 = vmul.f32 %v2280_v30, %v2280_v30  ;;  %v2409_v54 = vmul.f32 %v2281_v26, %v2281_v26  ;;  %v3388_v30 = vld [vmem:[%s3916_s13 + $0x100] sm:$0xff] }
 0x3b4   : > { %v2284_v59 = vsub.f32 %v3388_v30, %v1941_v3  ;;  %v1945_v3 = vadd.f32 %v4377_v14, %v4324_v39 }
 0x3b5   : > { %v2532_v2 = vadd.f32 %v2531_v6, %v2405_v8  ;;  %v1943_v6 = vadd.f32 %v4375_v60, %v4330_v52  ;;  %v2136_v60 = vadd.f32 %v4534_v48, %v4476_v23  ;;  %v3391_v48 = vld [vmem:[%s3916_s13 + $0x118] sm:$0xff] }
 0x3b7   : > { %v2533_v50 = vadd.f32 %v2532_v2, %v2406_v0  ;;  %v2410_v0 = vmul.f32 %v2282_v38, %v2282_v38  ;;  %v2286_v38 = vsub.f32 %v3390_v7, %v2134_v10  ;;  %v2138_v10 = vadd.f32 %v4536_v51, %v4473_v35  ;;  %v3394_v7 = vld [vmem:[%s3916_s13 + $0x130] sm:$0xff] }
 0x3b8   : > { %v4587_v13 = vpop.f32.mrb[92].mxu1 }
 0x3b9   : > { %v2534_v63 = vadd.f32 %v2533_v50, %v2407_v5  ;;  %v4592_v34 = vpop.f32.mrb[93].mxu1  ;;  %v2285_v50 = vsub.f32 %v3389_v24, %v1943_v6  ;;  %v2411_v5 = vmul.f32 %v2283_v37, %v2283_v37  ;;  %v2287_v37 = vsub.f32 %v3391_v48, %v2136_v60  ;;  %v3393_v24 = vld [vmem:[%s3916_s13 + $0x128] sm:$0xff] }
 0x3ba   : > { %v4594_v8 = vpop.f32.mrb[94].mxu1 }
 0x3bb   : > { %v2535_v62 = vadd.f32 %v2534_v63, %v2408_v32  ;;  %v4599_v12 = vpop.f32.mrb[95].mxu1  ;;  %v2412_v32 = vmul.f32 %v2284_v59, %v2284_v59  ;;  %v2413_v6 = vmul.f32 %v2285_v50, %v2285_v50  ;;  %v3392_v59 = vld [vmem:[%s3916_s13 + $0x120] sm:$0xff] }
 0x3bc   : > { %v2288_v14 = vsub.f32 %v3392_v59, %v1945_v3  ;;  %v1951_v3 = vadd.f32 %v4382_v16, %v4324_v39 }
 0x3bd   : > { %v2536_v2 = vadd.f32 %v2535_v62, %v2409_v54  ;;  %v1947_v62 = vadd.f32 %v4379_v15, %v4330_v52  ;;  %v2140_v15 = vadd.f32 %v4541_v4, %v4476_v23  ;;  %v3395_v4 = vld [vmem:[%s3916_s13 + $0x138] sm:$0xff] }
 0x3bf   : > { %v2537_v26 = vadd.f32 %v2536_v2, %v2410_v0  ;;  %v2414_v0 = vmul.f32 %v2286_v38, %v2286_v38  ;;  %v2290_v38 = vsub.f32 %v3394_v7, %v2138_v10  ;;  %v2144_v10 = vadd.f32 %v4547_v25, %v4473_v35  ;;  %v3398_v7 = vld [vmem:[%s3916_s13 + $0x150] sm:$0xff] }
 0x3c0   : > { %v4607_v33 = vpop.f32.mrb[96].mxu1 }
 0x3c1   : > { %v2538_v63 = vadd.f32 %v2537_v26, %v2411_v5  ;;  %v4612_v9 = vpop.f32.mrb[97].mxu1  ;;  %v2289_v26 = vsub.f32 %v3393_v24, %v1947_v62  ;;  %v2415_v5 = vmul.f32 %v2287_v37, %v2287_v37  ;;  %v2291_v37 = vsub.f32 %v3395_v4, %v2140_v15  ;;  %v3397_v24 = vld [vmem:[%s3916_s13 + $0x148] sm:$0xff] }
 0x3c2   : > { %v4614_v54 = vpop.f32.mrb[98].mxu1 }
 0x3c3   : > { %v2539_v1 = vadd.f32 %v2538_v63, %v2412_v32  ;;  %v4619_v30 = vpop.f32.mrb[99].mxu1  ;;  %v2416_v32 = vmul.f32 %v2288_v14, %v2288_v14  ;;  %v2417_v62 = vmul.f32 %v2289_v26, %v2289_v26  ;;  %v3396_v14 = vld [vmem:[%s3916_s13 + $0x140] sm:$0xff] }
 0x3c4   : > { %v2292_v16 = vsub.f32 %v3396_v14, %v1951_v3  ;;  %v1955_v3 = vadd.f32 %v4386_v18, %v4324_v39 }
 0x3c5   : > { %v2540_v2 = vadd.f32 %v2539_v1, %v2413_v6  ;;  %v1953_v1 = vadd.f32 %v4384_v17, %v4330_v52  ;;  %v2146_v17 = vadd.f32 %v4552_v58, %v4476_v23  ;;  %v3399_v58 = vld [vmem:[%s3916_s13 + $0x158] sm:$0xff] }
 0x3c7   : > { %v2541_v50 = vadd.f32 %v2540_v2, %v2414_v0  ;;  %v2418_v0 = vmul.f32 %v2290_v38, %v2290_v38  ;;  %v2294_v38 = vsub.f32 %v3398_v7, %v2144_v10  ;;  %v2148_v10 = vadd.f32 %v4554_v47, %v4473_v35  ;;  %v3402_v7 = vld [vmem:[%s3916_s13 + $0x170] sm:$0xff] }
 0x3c8   : > { %v4627_v60 = vpop.f32.mrb[100].mxu1 }
 0x3c9   : > { %v2542_v63 = vadd.f32 %v2541_v50, %v2415_v5  ;;  %v4632_v51 = vpop.f32.mrb[101].mxu1  ;;  %v2293_v50 = vsub.f32 %v3397_v24, %v1953_v1  ;;  %v2419_v5 = vmul.f32 %v2291_v37, %v2291_v37  ;;  %v2295_v37 = vsub.f32 %v3399_v58, %v2146_v17  ;;  %v3401_v24 = vld [vmem:[%s3916_s13 + $0x168] sm:$0xff] }
 0x3ca   : > { %v4634_v6 = vpop.f32.mrb[102].mxu1 }
 0x3cb   : > { %v2543_v48 = vadd.f32 %v2542_v63, %v2416_v32  ;;  %v4639_v59 = vpop.f32.mrb[103].mxu1  ;;  %v2420_v32 = vmul.f32 %v2292_v16, %v2292_v16  ;;  %v2421_v1 = vmul.f32 %v2293_v50, %v2293_v50  ;;  %v3400_v16 = vld [vmem:[%s3916_s13 + $0x160] sm:$0xff] }
 0x3cc   : > { %v2296_v18 = vsub.f32 %v3400_v16, %v1955_v3  ;;  %v1961_v3 = vadd.f32 %v4390_v20, %v4324_v39 }
 0x3cd   : > { %v2544_v2 = vadd.f32 %v2543_v48, %v2417_v62  ;;  %v1957_v48 = vadd.f32 %v4388_v19, %v4330_v52  ;;  %v2150_v19 = vadd.f32 %v4559_v31, %v4476_v23  ;;  %v3403_v31 = vld [vmem:[%s3916_s13 + $0x178] sm:$0xff] }
 0x3cf   : > { %v2545_v26 = vadd.f32 %v2544_v2, %v2418_v0  ;;  %v2422_v0 = vmul.f32 %v2294_v38, %v2294_v38  ;;  %v2298_v38 = vsub.f32 %v3402_v7, %v2148_v10  ;;  %v2154_v10 = vadd.f32 %v4567_v57, %v4473_v35  ;;  %v3406_v7 = vld [vmem:[%s3916_s13 + $0x190] sm:$0xff] }
 0x3d0   : > { %v4647_v15 = vpop.f32.mrb[104].mxu1 }
 0x3d1   : > { %v2546_v63 = vadd.f32 %v2545_v26, %v2419_v5  ;;  %v4652_v25 = vpop.f32.mrb[105].mxu1  ;;  %v2297_v26 = vsub.f32 %v3401_v24, %v1957_v48  ;;  %v2423_v5 = vmul.f32 %v2295_v37, %v2295_v37  ;;  %v2299_v37 = vsub.f32 %v3403_v31, %v2150_v19  ;;  %v3405_v24 = vld [vmem:[%s3916_s13 + $0x188] sm:$0xff] }
 0x3d2   : > { %v4654_v62 = vpop.f32.mrb[106].mxu1 }
 0x3d3   : > { %v2547_v4 = vadd.f32 %v2546_v63, %v2420_v32  ;;  %v4659_v14 = vpop.f32.mrb[107].mxu1  ;;  %v2424_v32 = vmul.f32 %v2296_v18, %v2296_v18  ;;  %v2425_v48 = vmul.f32 %v2297_v26, %v2297_v26  ;;  %v3404_v18 = vld [vmem:[%s3916_s13 + $0x180] sm:$0xff] }
 0x3d4   : > { %v2300_v20 = vsub.f32 %v3404_v18, %v1961_v3  ;;  %v1965_v3 = vadd.f32 %v4394_v22, %v4324_v39 }
 0x3d5   : > { %v2548_v2 = vadd.f32 %v2547_v4, %v2421_v1  ;;  %v1963_v4 = vadd.f32 %v4392_v21, %v4330_v52  ;;  %v2156_v21 = vadd.f32 %v4572_v11, %v4476_v23  ;;  %v3407_v11 = vld [vmem:[%s3916_s13 + $0x198] sm:$0xff] }
 0x3d7   : > { %v2549_v50 = vadd.f32 %v2548_v2, %v2422_v0  ;;  %v2426_v0 = vmul.f32 %v2298_v38, %v2298_v38  ;;  %v2302_v38 = vsub.f32 %v3406_v7, %v2154_v10  ;;  %v2158_v10 = vadd.f32 %v4574_v61, %v4473_v35  ;;  %v3410_v7 = vld [vmem:[%s3916_s13 + $0x1b0] sm:$0xff] }
 0x3d8   : > { %v4667_v17 = vpop.f32.mrb[108].mxu1 }
 0x3d9   : > { %v2550_v63 = vadd.f32 %v2549_v50, %v2423_v5  ;;  %v4672_v47 = vpop.f32.mrb[109].mxu1  ;;  %v2301_v50 = vsub.f32 %v3405_v24, %v1963_v4  ;;  %v2427_v5 = vmul.f32 %v2299_v37, %v2299_v37  ;;  %v2303_v37 = vsub.f32 %v3407_v11, %v2156_v21  ;;  %v3409_v24 = vld [vmem:[%s3916_s13 + $0x1a8] sm:$0xff] }
 0x3da   : > { %v4674_v1 = vpop.f32.mrb[110].mxu1 }
 0x3db   : > { %v2551_v58 = vadd.f32 %v2550_v63, %v2424_v32  ;;  %v4679_v16 = vpop.f32.mrb[111].mxu1  ;;  %v2428_v32 = vmul.f32 %v2300_v20, %v2300_v20  ;;  %v2429_v4 = vmul.f32 %v2301_v50, %v2301_v50  ;;  %v3408_v20 = vld [vmem:[%s3916_s13 + $0x1a0] sm:$0xff] }
 0x3dc   : > { %v2304_v22 = vsub.f32 %v3408_v20, %v1965_v3  ;;  %v1971_v3 = vadd.f32 %v4398_v28, %v4324_v39 }
 0x3dd   : > { %v2552_v2 = vadd.f32 %v2551_v58, %v2425_v48  ;;  %v1967_v58 = vadd.f32 %v4396_v27, %v4330_v52  ;;  %v2160_v27 = vadd.f32 %v4579_v56, %v4476_v23  ;;  %v3411_v56 = vld [vmem:[%s3916_s13 + $0x1b8] sm:$0xff] }
 0x3df   : > { %v2553_v26 = vadd.f32 %v2552_v2, %v2426_v0  ;;  %v2430_v0 = vmul.f32 %v2302_v38, %v2302_v38  ;;  %v2306_v38 = vsub.f32 %v3410_v7, %v2158_v10  ;;  %v2164_v10 = vadd.f32 %v4587_v13, %v4473_v35  ;;  %v3414_v7 = vld [vmem:[%s3916_s13 + $0x1d0] sm:$0xff] }
 0x3e0   : > { %v4687_v19 = vpop.f32.mrb[112].mxu1 }
 0x3e1   : > { %v2554_v63 = vadd.f32 %v2553_v26, %v2427_v5  ;;  %v4692_v57 = vpop.f32.mrb[113].mxu1  ;;  %v2305_v26 = vsub.f32 %v3409_v24, %v1967_v58  ;;  %v2431_v5 = vmul.f32 %v2303_v37, %v2303_v37  ;;  %v2307_v37 = vsub.f32 %v3411_v56, %v2160_v27  ;;  %v3413_v24 = vld [vmem:[%s3916_s13 + $0x1c8] sm:$0xff] }
 0x3e2   : > { %v4694_v48 = vpop.f32.mrb[114].mxu1 }
 0x3e3   : > { %v2555_v31 = vadd.f32 %v2554_v63, %v2428_v32  ;;  %v4699_v18 = vpop.f32.mrb[115].mxu1  ;;  %v2432_v32 = vmul.f32 %v2304_v22, %v2304_v22  ;;  %v2433_v58 = vmul.f32 %v2305_v26, %v2305_v26  ;;  %v3412_v22 = vld [vmem:[%s3916_s13 + $0x1c0] sm:$0xff] }
 0x3e4   : > { %v2308_v28 = vsub.f32 %v3412_v22, %v1971_v3  ;;  %v1975_v3 = vadd.f32 %v4402_v36, %v4324_v39 }
 0x3e5   : > { %v2556_v2 = vadd.f32 %v2555_v31, %v2429_v4  ;;  %v1973_v31 = vadd.f32 %v4400_v29, %v4330_v52  ;;  %v2166_v29 = vadd.f32 %v4592_v34, %v4476_v23  ;;  %v3415_v34 = vld [vmem:[%s3916_s13 + $0x1d8] sm:$0xff] }
 0x3e7   : > { %v2557_v50 = vadd.f32 %v2556_v2, %v2430_v0  ;;  %v2434_v0 = vmul.f32 %v2306_v38, %v2306_v38  ;;  %v2310_v38 = vsub.f32 %v3414_v7, %v2164_v10  ;;  %v2168_v10 = vadd.f32 %v4594_v8, %v4473_v35  ;;  %v3418_v7 = vld [vmem:[%s3916_s13 + $0x1f0] sm:$0xff] }
 0x3e8   : > { %v4707_v21 = vpop.f32.mrb[116].mxu1 }
 0x3e9   : > { %v2558_v63 = vadd.f32 %v2557_v50, %v2431_v5  ;;  %v4712_v61 = vpop.f32.mrb[117].mxu1  ;;  %v2309_v50 = vsub.f32 %v3413_v24, %v1973_v31  ;;  %v2435_v5 = vmul.f32 %v2307_v37, %v2307_v37  ;;  %v2311_v37 = vsub.f32 %v3415_v34, %v2166_v29  ;;  %v3417_v24 = vld [vmem:[%s3916_s13 + $0x1e8] sm:$0xff] }
 0x3ea   : > { %v4714_v4 = vpop.f32.mrb[118].mxu1 }
 0x3eb   : > { %v2559_v11 = vadd.f32 %v2558_v63, %v2432_v32  ;;  %v4719_v20 = vpop.f32.mrb[119].mxu1  ;;  %v2436_v32 = vmul.f32 %v2308_v28, %v2308_v28  ;;  %v2437_v31 = vmul.f32 %v2309_v50, %v2309_v50  ;;  %v3416_v28 = vld [vmem:[%s3916_s13 + $0x1e0] sm:$0xff] }
 0x3ec   : > { %v2312_v36 = vsub.f32 %v3416_v28, %v1975_v3  ;;  %v1981_v3 = vadd.f32 %v4406_v41, %v4324_v39 }
 0x3ed   : > { %v2560_v2 = vadd.f32 %v2559_v11, %v2433_v58  ;;  %v1977_v11 = vadd.f32 %v4404_v40, %v4330_v52  ;;  %v2170_v40 = vadd.f32 %v4599_v12, %v4476_v23  ;;  %v3419_v12 = vld [vmem:[%s3916_s13 + $0x1f8] sm:$0xff] }
 0x3ef   : > { %v2561_v26 = vadd.f32 %v2560_v2, %v2434_v0  ;;  %v2438_v0 = vmul.f32 %v2310_v38, %v2310_v38  ;;  %v2314_v38 = vsub.f32 %v3418_v7, %v2168_v10  ;;  %v2174_v10 = vadd.f32 %v4607_v33, %v4473_v35 }
 0x3f0   : > { %v4727_v27 = vpop.f32.mrb[120].mxu1  ;;  %v1987_v33 = vadd.f32 %v4412_v44, %v4330_v52  ;;  %v2180_v44 = vadd.f32 %v4619_v30, %v4476_v23 }
 0x3f1   : > { %v2562_v63 = vadd.f32 %v2561_v26, %v2435_v5  ;;  %v4732_v13 = vpop.f32.mrb[121].mxu1  ;;  %v2313_v26 = vsub.f32 %v3417_v24, %v1977_v11  ;;  %v2439_v5 = vmul.f32 %v2311_v37, %v2311_v37  ;;  %v2315_v37 = vsub.f32 %v3419_v12, %v2170_v40  ;;  %v3421_v24 = vld [vmem:[%s3916_s13 + $0x208] sm:$0xff]  ;;  %v3424_v12 = vld [vmem:[%s3916_s13 + $0x220] sm:$0xff] }
 0x3f2   : > { %v4734_v58 = vpop.f32.mrb[122].mxu1 }
 0x3f3   : > { %v2563_v56 = vadd.f32 %v2562_v63, %v2436_v32  ;;  %v4739_v22 = vpop.f32.mrb[123].mxu1  ;;  %v2440_v32 = vmul.f32 %v2312_v36, %v2312_v36  ;;  %v2441_v11 = vmul.f32 %v2313_v26, %v2313_v26  ;;  %v3420_v36 = vld [vmem:[%s3916_s13 + $0x200] sm:$0xff] }
 0x3f4   : > { %v2316_v41 = vsub.f32 %v3420_v36, %v1981_v3 }
 0x3f5   : > { %v2564_v2 = vadd.f32 %v2563_v56, %v2437_v31  ;;  %v1983_v56 = vadd.f32 %v4408_v42, %v4330_v52  ;;  %v2176_v42 = vadd.f32 %v4612_v9, %v4476_v23 }
 0x3f6   : > { %v2444_v40 = vmul.f32 %v2316_v41, %v2316_v41  ;;  %v2178_v41 = vadd.f32 %v4614_v54, %v4473_v35  ;;  %v1993_v54 = vadd.f32 %v4416_v46, %v4330_v52  ;;  %v2186_v46 = vadd.f32 %v4632_v51, %v4476_v23 }
 0x3f7   : > { %v2565_v50 = vadd.f32 %v2564_v2, %v2438_v0  ;;  %v2442_v0 = vmul.f32 %v2314_v38, %v2314_v38  ;;  %v2317_v26 = vsub.f32 %v3421_v24, %v1983_v56  ;;  %v3423_v56 = vld [vmem:[%s3916_s13 + $0x218] sm:$0xff] }
 0x3f8   : > { %v4747_v29 = vpop.f32.mrb[124].mxu1 }
 0x3f9   : > { %v2566_v63 = vadd.f32 %v2565_v50, %v2439_v5  ;;  %v4752_v8 = vpop.f32.mrb[125].mxu1  ;;  %v2443_v5 = vmul.f32 %v2315_v37, %v2315_v37  ;;  %v2445_v38 = vmul.f32 %v2317_v26, %v2317_v26  ;;  %v1991_v26 = vadd.f32 %v4414_v45, %v4324_v39  ;;  %v3429_v45 = vld [vmem:[%s3916_s13 + $0x248] sm:$0xff] }
 0x3fa   : > { %v4754_v31 = vpop.f32.mrb[126].mxu1 }
 0x3fb   : > { %v2567_v34 = vadd.f32 %v2566_v63, %v2440_v32  ;;  %v4759_v28 = vpop.f32.mrb[127].mxu1  ;;  %v1985_v32 = vadd.f32 %v4410_v43, %v4324_v39  ;;  %v3422_v63 = vld [vmem:[%s3916_s13 + $0x210] sm:$0xff]  ;;  %v3425_v43 = vld [vmem:[%s3916_s13 + $0x228] sm:$0xff] }
 0x3fc   : > { %v2318_v7 = vsub.f32 %v3422_v63, %v2174_v10 }
 0x3fd   : > { %v2568_v2 = vadd.f32 %v2567_v34, %v2441_v11  ;;  %v2319_v34 = vsub.f32 %v3423_v56, %v2176_v42  ;;  %v2320_v37 = vsub.f32 %v3424_v12, %v1985_v32  ;;  %v2325_v56 = vsub.f32 %v3429_v45, %v1993_v54  ;;  %v3435_v45 = vld [vmem:[%s3916_s13 + $0x278] sm:$0xff] }
 0x3fe   : > { %v2446_v36 = vmul.f32 %v2318_v7, %v2318_v7  ;;  %v3428_v7 = vld [vmem:[%s3916_s13 + $0x240] sm:$0xff] }
 0x3ff   : > { %v2569_v50 = vadd.f32 %v2568_v2, %v2442_v0  ;;  %v2321_v2 = vsub.f32 %v3425_v43, %v1987_v33  ;;  %v2447_v10 = vmul.f32 %v2319_v34, %v2319_v34  ;;  %v2448_v24 = vmul.f32 %v2320_v37, %v2320_v37 }
 0x401   : > { %v2570_v3 = vadd.f32 %v2569_v50, %v2443_v5  ;;  %v3426_v5 = vld [vmem:[%s3916_s13 + $0x230] sm:$0xff] }
 0x402   : > { %v2322_v42 = vsub.f32 %v3426_v5, %v2178_v41  ;;  %v3430_v41 = vld [vmem:[%s3916_s13 + $0x250] sm:$0xff]  ;;  %v2188_v5 = vadd.f32 %v4634_v6, %v4473_v35 }
 0x403   : > { %v2571_v11 = vadd.f32 %v2570_v3, %v2444_v40  ;;  %v2449_v40 = vmul.f32 %v2321_v2, %v2321_v2  ;;  %v3427_v3 = vld [vmem:[%s3916_s13 + $0x238] sm:$0xff]  ;;  %v2453_v2 = vmul.f32 %v2325_v56, %v2325_v56 }
 0x404   : > { %v2323_v63 = vsub.f32 %v3427_v3, %v2180_v44  ;;  %v2450_v33 = vmul.f32 %v2322_v42, %v2322_v42  ;;  %v2001_v3 = vadd.f32 %v4422_v55, %v4324_v39  ;;  %v3437_v55 = vld [vmem:[%s3916_s13 + $0x288] sm:$0xff] }
 0x405   : > { %v2572_v9 = vadd.f32 %v2571_v11, %v2445_v38  ;;  %v2324_v38 = vsub.f32 %v3428_v7, %v1991_v26  ;;  %v2184_v11 = vadd.f32 %v4627_v60, %v4473_v35  ;;  %v1997_v60 = vadd.f32 %v4420_v53, %v4330_v52  ;;  %v3434_v7 = vld [vmem:[%s3916_s13 + $0x270] sm:$0xff] }
 0x406   : > { %v2451_v12 = vmul.f32 %v2323_v63, %v2323_v63  ;;  %v2190_v53 = vadd.f32 %v4639_v59, %v4476_v23 }
 0x407   : > { %v2573_v0 = vadd.f32 %v2572_v9, %v2446_v36  ;;  %v2452_v37 = vmul.f32 %v2324_v38, %v2324_v38  ;;  %v1995_v36 = vadd.f32 %v4418_v49, %v4324_v39  ;;  %v2326_v43 = vsub.f32 %v3430_v41, %v2184_v11  ;;  %v3433_v49 = vld [vmem:[%s3916_s13 + $0x268] sm:$0xff] }
 0x408   : > { %v2329_v42 = vsub.f32 %v3433_v49, %v1997_v60  ;;  %v2330_v38 = vsub.f32 %v3434_v7, %v2188_v5  ;;  %v2331_v56 = vsub.f32 %v3435_v45, %v2190_v53  ;;  %v5055_v60 = vld [vmem:[#allocation16_spill] sm:$0xff]  ;;  %v3439_v5 = vld [vmem:[%s3916_s13 + $0x298] sm:$0xff]  ;;  %v2198_v53 = vadd.f32 %v4654_v62, %v4473_v35 }
 0x409   : > { %v2574_v50 = vadd.f32 %v2573_v0, %v2447_v10  ;;  %v3431_v10 = vld [vmem:[%s3916_s13 + $0x258] sm:$0xff]  ;;  %v3442_v45 = vld [vmem:[%s3916_s13 + $0x2b0] sm:$0xff] }
 0x40a   : > { %v2327_v44 = vsub.f32 %v3431_v10, %v2186_v46  ;;  %v2458_v46 = vmul.f32 %v2330_v38, %v2330_v38  ;;  %v2459_v41 = vmul.f32 %v2331_v56, %v2331_v56  ;;  %v2200_v38 = vadd.f32 %v4659_v14, %v4476_v23 }
 0x40b   : > { %v2575_v32 = vadd.f32 %v2574_v50, %v2448_v24  ;;  %v3432_v24 = vld [vmem:[%s3916_s13 + $0x260] sm:$0xff]  ;;  %v2454_v50 = vmul.f32 %v2326_v43, %v2326_v43  ;;  %v2196_v43 = vadd.f32 %v4652_v25, %v4476_v23  ;;  %v2338_v56 = vsub.f32 %v3442_v45, %v2198_v53 }
 0x40c   : > { %v2328_v26 = vsub.f32 %v3432_v24, %v1995_v36  ;;  %v2455_v54 = vmul.f32 %v2327_v44, %v2327_v44  ;;  %v3438_v44 = vld [vmem:[%s3916_s13 + $0x290] sm:$0xff] }
 0x40d   : > { %v2576_v30 = vadd.f32 %v2575_v32, %v2449_v40  ;;  %v2335_v49 = vsub.f32 %v3439_v5, %v2196_v43  ;;  %v3445_v43 = vld [vmem:[%s3916_s13 + $0x2c8] sm:$0xff] }
 0x40e   : > { %v2456_v32 = vmul.f32 %v2328_v26, %v2328_v26 }
 0x40f   : > { %v2577_v34 = vadd.f32 %v2576_v30, %v2450_v33  ;;  %v2457_v33 = vmul.f32 %v2329_v42, %v2329_v42  ;;  %v5054_v30 = vld [vmem:[#allocation15_spill] sm:$0xff]  ;;  %v2463_v7 = vmul.f32 %v2335_v49, %v2335_v49  ;;  %v5060_v49 = vld [vmem:[#allocation21_spill] sm:$0xff] }
 0x410   : > { %v2003_v6 = vadd.f32 %v5054_v30, %v4330_v52  ;;  %v3440_v42 = vld [vmem:[%s3916_s13 + $0x2a0] sm:$0xff] }
 0x411   : > { %v2578_v9 = vadd.f32 %v2577_v34, %v2451_v12  ;;  %v3436_v34 = vld [vmem:[%s3916_s13 + $0x280] sm:$0xff] }
 0x412   : > { %v2332_v12 = vsub.f32 %v3436_v34, %v2001_v3  ;;  %v2333_v36 = vsub.f32 %v3437_v55, %v2003_v6  ;;  %v5057_v30 = vld [vmem:[#allocation18_spill] sm:$0xff] }
 0x413   : > { %v2579_v0 = vadd.f32 %v2578_v9, %v2452_v37  ;;  %v2194_v37 = vadd.f32 %v4647_v15, %v4473_v35  ;;  %v2011_v6 = vadd.f32 %v5057_v30, %v4324_v39  ;;  %v3444_v55 = vld [vmem:[%s3916_s13 + $0x2c0] sm:$0xff]  ;;  %v2210_v30 = vadd.f32 %v4679_v16, %v4476_v23 }
 0x414   : > { %v2461_v26 = vmul.f32 %v2333_v36, %v2333_v36 }
 0x415   : > { %v2580_v51 = vadd.f32 %v2579_v0, %v2453_v2  ;;  %v2460_v2 = vmul.f32 %v2332_v12, %v2332_v12  ;;  %v2005_v0 = vadd.f32 %v5055_v60, %v4324_v39  ;;  %v2334_v24 = vsub.f32 %v3438_v44, %v2194_v37  ;;  %v5058_v12 = vld [vmem:[#allocation19_spill] sm:$0xff] }
 0x416   : > { %v2013_v62 = vadd.f32 %v5058_v12, %v4330_v52  ;;  %v2340_v36 = vsub.f32 %v3444_v55, %v2011_v6 }
 0x417   : > { %v2581_v40 = vadd.f32 %v2580_v51, %v2454_v50  ;;  %v5056_v50 = vld [vmem:[#allocation17_spill] sm:$0xff] }
 0x418   : > { %v2007_v15 = vadd.f32 %v5056_v50, %v4330_v52  ;;  %v2468_v44 = vmul.f32 %v2340_v36, %v2340_v36  ;;  %v3452_v36 = vld [vmem:[%s3916_s13 + $0x300] sm:$0xff] }
 0x419   : > { %v2582_v63 = vadd.f32 %v2581_v40, %v2455_v54  ;;  %v2336_v40 = vsub.f32 %v3440_v42, %v2005_v0  ;;  %v2462_v54 = vmul.f32 %v2334_v24, %v2334_v24  ;;  %v5059_v24 = vld [vmem:[#allocation20_spill] sm:$0xff] }
 0x41b   : > { %v2583_v11 = vadd.f32 %v2582_v63, %v2456_v32  ;;  %v3441_v32 = vld [vmem:[%s3916_s13 + $0x2a8] sm:$0xff] }
 0x41c   : > { %v2337_v3 = vsub.f32 %v3441_v32, %v2007_v15  ;;  %v3446_v15 = vld [vmem:[%s3916_s13 + $0x2d0] sm:$0xff] }
 0x41d   : > { %v2584_v59 = vadd.f32 %v2583_v11, %v2457_v33  ;;  %v2464_v33 = vmul.f32 %v2336_v40, %v2336_v40  ;;  %v3447_v40 = vld [vmem:[%s3916_s13 + $0x2d8] sm:$0xff] }
 0x41e   : > { %v2465_v34 = vmul.f32 %v2337_v3, %v2337_v3  ;;  %v2208_v3 = vadd.f32 %v4674_v1, %v4473_v35 }
 0x41f   : > { %v2585_v9 = vadd.f32 %v2584_v59, %v2458_v46  ;;  %v3443_v59 = vld [vmem:[%s3916_s13 + $0x2b8] sm:$0xff] }
 0x420   : > { %v2339_v37 = vsub.f32 %v3443_v59, %v2200_v38 }
 0x421   : > { %v2586_v10 = vadd.f32 %v2585_v9, %v2459_v41  ;;  %v2466_v9 = vmul.f32 %v2338_v56, %v2338_v56  ;;  %v2204_v41 = vadd.f32 %v4667_v17, %v4473_v35  ;;  %v2017_v17 = vadd.f32 %v5060_v49, %v4330_v52  ;;  %v5064_v49 = vld [vmem:[#allocation25_spill] sm:$0xff] }
 0x422   : > { %v2467_v0 = vmul.f32 %v2339_v37, %v2339_v37  ;;  %v3451_v37 = vld [vmem:[%s3916_s13 + $0x2f8] sm:$0xff] }
 0x423   : > { %v2587_v51 = vadd.f32 %v2586_v10, %v2460_v2  ;;  %v2341_v2 = vsub.f32 %v3445_v43, %v2013_v62  ;;  %v2206_v10 = vadd.f32 %v4672_v47, %v4476_v23  ;;  %v2347_v55 = vsub.f32 %v3451_v37, %v2210_v30  ;;  %v3453_v43 = vld [vmem:[%s3916_s13 + $0x308] sm:$0xff]  ;;  %v5065_v30 = vld [vmem:[#allocation26_spill] sm:$0xff] }
 0x425   : > { %v2588_v25 = vadd.f32 %v2587_v51, %v2461_v26  ;;  %v2015_v26 = vadd.f32 %v5059_v24, %v4324_v39  ;;  %v2342_v51 = vsub.f32 %v3446_v15, %v2204_v41  ;;  %v2469_v5 = vmul.f32 %v2341_v2, %v2341_v2  ;;  %v5063_v24 = vld [vmem:[#allocation24_spill] sm:$0xff] }
 0x426   : > { %v2214_v41 = vadd.f32 %v4687_v19, %v4473_v35  ;;  %v3454_v15 = vld [vmem:[%s3916_s13 + $0x310] sm:$0xff]  ;;  %v2027_v19 = vadd.f32 %v5064_v49, %v4330_v52  ;;  %v3464_v49 = vld [vmem:[%s3916_s13 + $0x360] sm:$0xff] }
 0x427   : > { %v2589_v63 = vadd.f32 %v2588_v25, %v2462_v54  ;;  %v2343_v54 = vsub.f32 %v3447_v40, %v2206_v10  ;;  %v3448_v25 = vld [vmem:[%s3916_s13 + $0x2e0] sm:$0xff]  ;;  %v2470_v32 = vmul.f32 %v2342_v51, %v2342_v51  ;;  %v2216_v10 = vadd.f32 %v4692_v57, %v4476_v23 }
 0x428   : > { %v2344_v53 = vsub.f32 %v3448_v25, %v2015_v26  ;;  %v2025_v26 = vadd.f32 %v5063_v24, %v4324_v39  ;;  %v2350_v51 = vsub.f32 %v3454_v15, %v2214_v41 }
 0x429   : > { %v2590_v11 = vadd.f32 %v2589_v63, %v2463_v7  ;;  %v3449_v63 = vld [vmem:[%s3916_s13 + $0x2e8] sm:$0xff] }
 0x42a   : > { %v2345_v7 = vsub.f32 %v3449_v63, %v2017_v17  ;;  %v2472_v6 = vmul.f32 %v2344_v53, %v2344_v53  ;;  %v2478_v53 = vmul.f32 %v2350_v51, %v2350_v51  ;;  %v3463_v51 = vld [vmem:[%s3916_s13 + $0x358] sm:$0xff] }
 0x42b   : > { %v2591_v46 = vadd.f32 %v2590_v11, %v2464_v33  ;;  %v2471_v33 = vmul.f32 %v2343_v54, %v2343_v54  ;;  %v5061_v11 = vld [vmem:[#allocation22_spill] sm:$0xff] }
 0x42c   : > { %v2021_v45 = vadd.f32 %v5061_v11, %v4324_v39  ;;  %v2473_v62 = vmul.f32 %v2345_v7, %v2345_v7  ;;  %v3456_v54 = vld [vmem:[%s3916_s13 + $0x320] sm:$0xff] }
 0x42d   : > { %v2592_v14 = vadd.f32 %v2591_v46, %v2465_v34  ;;  %v3450_v34 = vld [vmem:[%s3916_s13 + $0x2f0] sm:$0xff]  ;;  %v5062_v46 = vld [vmem:[#allocation23_spill] sm:$0xff]  ;;  %v2352_v25 = vsub.f32 %v3456_v54, %v2025_v26 }
 0x42e   : > { %v2346_v12 = vsub.f32 %v3450_v34, %v2208_v3  ;;  %v2023_v1 = vadd.f32 %v5062_v46, %v4330_v52  ;;  %v3459_v46 = vld [vmem:[%s3916_s13 + $0x338] sm:$0xff] }
 0x42f   : > { %v2593_v60 = vadd.f32 %v2592_v14, %v2466_v9  ;;  %v2348_v9 = vsub.f32 %v3452_v36, %v2021_v45  ;;  %v3458_v45 = vld [vmem:[%s3916_s13 + $0x330] sm:$0xff]  ;;  %v2224_v36 = vadd.f32 %v4707_v21, %v4473_v35 }
 0x430   : > { %v2474_v14 = vmul.f32 %v2346_v12, %v2346_v12  ;;  %v2349_v2 = vsub.f32 %v3453_v43, %v2023_v1  ;;  %v5066_v12 = vld [vmem:[#allocation27_spill] sm:$0xff]  ;;  %v2226_v43 = vadd.f32 %v4712_v61, %v4476_v23 }
 0x431   : > { %v2594_v50 = vadd.f32 %v2593_v60, %v2467_v0  ;;  %v2475_v0 = vmul.f32 %v2347_v55, %v2347_v55 }
 0x433   : > { %v2595_v42 = vadd.f32 %v2594_v50, %v2468_v44  ;;  %v2476_v44 = vmul.f32 %v2348_v9, %v2348_v9  ;;  %v3461_v9 = vld [vmem:[%s3916_s13 + $0x348] sm:$0xff] }
 0x435   : > { %v2596_v47 = vadd.f32 %v2595_v42, %v2469_v5  ;;  %v2477_v5 = vmul.f32 %v2349_v2, %v2349_v2  ;;  %v3455_v42 = vld [vmem:[%s3916_s13 + $0x318] sm:$0xff] }
 0x436   : > { %v2351_v40 = vsub.f32 %v3455_v42, %v2216_v10  ;;  %v2228_v42 = vadd.f32 %v4714_v4, %v4473_v35 }
 0x437   : > { %v2597_v38 = vadd.f32 %v2596_v47, %v2470_v32  ;;  %v2218_v32 = vadd.f32 %v4694_v48, %v4473_v35  ;;  %v3457_v47 = vld [vmem:[%s3916_s13 + $0x328] sm:$0xff]  ;;  %v2033_v48 = vadd.f32 %v5066_v12, %v4330_v52 }
 0x438   : > { %v2353_v3 = vsub.f32 %v3457_v47, %v2027_v19  ;;  %v2479_v7 = vmul.f32 %v2351_v40, %v2351_v40  ;;  %v3465_v40 = vld [vmem:[%s3916_s13 + $0x368] sm:$0xff]  ;;  %v5069_v47 = vld [vmem:[#allocation30_spill] sm:$0xff] }
 0x439   : > { %v2598_v56 = vadd.f32 %v2597_v38, %v2471_v33  ;;  %v2220_v38 = vadd.f32 %v4699_v18, %v4476_v23  ;;  %v2480_v33 = vmul.f32 %v2352_v25, %v2352_v25 }
 0x43a   : > { %v2481_v34 = vmul.f32 %v2353_v3, %v2353_v3  ;;  %v2041_v3 = vadd.f32 %v5069_v47, %v4324_v39  ;;  %v3476_v47 = vld [vmem:[%s3916_s13 + $0x3c0] sm:$0xff] }
 0x43b   : > { %v2599_v59 = vadd.f32 %v2598_v56, %v2472_v6  ;;  %v2031_v6 = vadd.f32 %v5065_v30, %v4324_v39  ;;  %v2354_v56 = vsub.f32 %v3458_v45, %v2218_v32  ;;  %v2355_v1 = vsub.f32 %v3459_v46, %v2220_v38  ;;  %v5070_v30 = vld [vmem:[#allocation31_spill] sm:$0xff] }
 0x43c   : > { %v2043_v4 = vadd.f32 %v5070_v30, %v4330_v52 }
 0x43d   : > { %v2600_v16 = vadd.f32 %v2599_v59, %v2473_v62  ;;  %v3460_v59 = vld [vmem:[%s3916_s13 + $0x340] sm:$0xff]  ;;  %v2482_v55 = vmul.f32 %v2354_v56, %v2354_v56  ;;  %v2483_v41 = vmul.f32 %v2355_v1, %v2355_v1 }
 0x43e   : > { %v2356_v37 = vsub.f32 %v3460_v59, %v2031_v6  ;;  %v3468_v56 = vld [vmem:[%s3916_s13 + $0x380] sm:$0xff] }
 0x43f   : > { %v2601_v60 = vadd.f32 %v2600_v16, %v2474_v14  ;;  %v2357_v14 = vsub.f32 %v3461_v9, %v2033_v48  ;;  %v2234_v48 = vadd.f32 %v4727_v27, %v4473_v35 }
 0x440   : > { %v2484_v2 = vmul.f32 %v2356_v37, %v2356_v37  ;;  %v2236_v37 = vadd.f32 %v4732_v13, %v4476_v23 }
 0x441   : > { %v2602_v50 = vadd.f32 %v2601_v60, %v2475_v0  ;;  %v5067_v60 = vld [vmem:[#allocation28_spill] sm:$0xff]  ;;  %v2485_v26 = vmul.f32 %v2357_v14, %v2357_v14 }
 0x442   : > { %v2035_v0 = vadd.f32 %v5067_v60, %v4324_v39  ;;  %v3470_v14 = vld [vmem:[%s3916_s13 + $0x390] sm:$0xff]  ;;  %v3471_v60 = vld [vmem:[%s3916_s13 + $0x398] sm:$0xff] }
 0x443   : > { %v2603_v17 = vadd.f32 %v2602_v50, %v2476_v44  ;;  %v3462_v44 = vld [vmem:[%s3916_s13 + $0x350] sm:$0xff] }
 0x444   : > { %v2358_v24 = vsub.f32 %v3462_v44, %v2224_v36  ;;  %v5068_v50 = vld [vmem:[#allocation29_spill] sm:$0xff]  ;;  %v2360_v19 = vsub.f32 %v3464_v49, %v2035_v0  ;;  %v2367_v0 = vsub.f32 %v3471_v60, %v2236_v37  ;;  %v3480_v37 = vld [vmem:[%s3916_s13 + $0x3e0] sm:$0xff] }
 0x445   : > { %v2604_v57 = vadd.f32 %v2603_v17, %v2477_v5  ;;  %v2037_v21 = vadd.f32 %v5068_v50, %v4330_v52  ;;  %v2359_v5 = vsub.f32 %v3463_v51, %v2226_v43  ;;  %v5072_v43 = vld [vmem:[#allocation33_spill] sm:$0xff]  ;;  %v3473_v50 = vld [vmem:[%s3916_s13 + $0x3a8] sm:$0xff] }
 0x446   : > { %v2486_v17 = vmul.f32 %v2358_v24, %v2358_v24  ;;  %v2488_v32 = vmul.f32 %v2360_v19, %v2360_v19  ;;  %v2047_v27 = vadd.f32 %v5072_v43, %v4330_v52  ;;  %v2495_v51 = vmul.f32 %v2367_v0, %v2367_v0  ;;  %v5073_v19 = vld [vmem:[#allocation34_spill] sm:$0xff] }
 0x447   : > { %v2605_v63 = vadd.f32 %v2604_v57, %v2478_v53  ;;  %v2361_v54 = vsub.f32 %v3465_v40, %v2037_v21  ;;  %v2487_v53 = vmul.f32 %v2359_v5, %v2359_v5  ;;  %v2230_v57 = vadd.f32 %v4719_v20, %v4476_v23  ;;  %v3483_v0 = vld [vmem:[%s3916_s13 + $0x3f8] sm:$0xff] }
 0x448   : > { %v2369_v21 = vsub.f32 %v3473_v50, %v2047_v27  ;;  %v2240_v5 = vadd.f32 %v4739_v22, %v4476_v23  ;;  %v3482_v27 = vld [vmem:[%s3916_s13 + $0x3f0] sm:$0xff] }
 0x449   : > { %v2606_v11 = vadd.f32 %v2605_v63, %v2479_v7  ;;  %v3466_v7 = vld [vmem:[%s3916_s13 + $0x370] sm:$0xff] }
 0x44a   : > { %v2362_v38 = vsub.f32 %v3466_v7, %v2228_v42  ;;  %v3474_v42 = vld [vmem:[%s3916_s13 + $0x3b0] sm:$0xff]  ;;  %v2244_v7 = vadd.f32 %v4747_v29, %v4473_v35 }
 0x44b   : > { %v2607_v62 = vadd.f32 %v2606_v11, %v2480_v33  ;;  %v2489_v33 = vmul.f32 %v2361_v54, %v2361_v54  ;;  %v3467_v11 = vld [vmem:[%s3916_s13 + $0x378] sm:$0xff]  ;;  %v2497_v54 = vmul.f32 %v2369_v21, %v2369_v21 }
 0x44c   : > { %v2363_v45 = vsub.f32 %v3467_v11, %v2230_v57  ;;  %v2490_v12 = vmul.f32 %v2362_v38, %v2362_v38  ;;  %v3475_v57 = vld [vmem:[%s3916_s13 + $0x3b8] sm:$0xff]  ;;  %v3477_v38 = vld [vmem:[%s3916_s13 + $0x3c8] sm:$0xff] }
 0x44d   : > { %v2608_v18 = vadd.f32 %v2607_v62, %v2481_v34  ;;  %v2364_v34 = vsub.f32 %v3468_v56, %v2041_v3  ;;  %v3469_v62 = vld [vmem:[%s3916_s13 + $0x388] sm:$0xff] }
 0x44e   : > { %v2365_v46 = vsub.f32 %v3469_v62, %v2043_v4  ;;  %v2491_v59 = vmul.f32 %v2363_v45, %v2363_v45  ;;  %v5075_v45 = vld [vmem:[#allocation36_spill] sm:$0xff]  ;;  %v5076_v62 = vld [vmem:[#allocation37_spill] sm:$0xff] }
 0x44f   : > { %v2609_v16 = vadd.f32 %v2608_v18, %v2482_v55  ;;  %v2492_v55 = vmul.f32 %v2364_v34, %v2364_v34  ;;  %v5071_v18 = vld [vmem:[#allocation32_spill] sm:$0xff]  ;;  %v2055_v56 = vadd.f32 %v5075_v45, %v4324_v39  ;;  %v2057_v29 = vadd.f32 %v5076_v62, %v4330_v52 }
 0x450   : > { %v2045_v36 = vadd.f32 %v5071_v18, %v4324_v39 }
 0x451   : > { %v2610_v10 = vadd.f32 %v2609_v16, %v2483_v41  ;;  %v2366_v16 = vsub.f32 %v3470_v14, %v2234_v48  ;;  %v2493_v41 = vmul.f32 %v2365_v46, %v2365_v46 }
 0x453   : > { %v2611_v15 = vadd.f32 %v2610_v10, %v2484_v2  ;;  %v3472_v10 = vld [vmem:[%s3916_s13 + $0x3a0] sm:$0xff]  ;;  %v2494_v24 = vmul.f32 %v2366_v16, %v2366_v16 }
 0x454   : > { %v2368_v44 = vsub.f32 %v3472_v10, %v2045_v36  ;;  %v2248_v36 = vadd.f32 %v4754_v31, %v4473_v35 }
 0x455   : > { %v2612_v61 = vadd.f32 %v2611_v15, %v2485_v26  ;;  %v2238_v26 = vadd.f32 %v4734_v58, %v4473_v35 }
 0x456   : > { %v2496_v49 = vmul.f32 %v2368_v44, %v2368_v44 }
 0x457   : > { %v2613_v25 = vadd.f32 %v2612_v61, %v2486_v17  ;;  %v2051_v17 = vadd.f32 %v5073_v19, %v4324_v39  ;;  %v2370_v40 = vsub.f32 %v3474_v42, %v2238_v26  ;;  %v3481_v39 = vld [vmem:[%s3916_s13 + $0x3e8] sm:$0xff] }
 0x459   : > { %v2614_v63 = vadd.f32 %v2613_v25, %v2487_v53  ;;  %v5074_v25 = vld [vmem:[#allocation35_spill] sm:$0xff]  ;;  %v2372_v3 = vsub.f32 %v3476_v47, %v2051_v17 }
 0x45a   : > { %v2053_v58 = vadd.f32 %v5074_v25, %v4330_v52  ;;  %v2250_v52 = vadd.f32 %v4759_v28, %v4476_v23 }
 0x45b   : > { %v2615_v6 = vadd.f32 %v2614_v63, %v2488_v32  ;;  %v2371_v32 = vsub.f32 %v3475_v57, %v2240_v5  ;;  %v2498_v63 = vmul.f32 %v2370_v40, %v2370_v40  ;;  %v2500_v11 = vmul.f32 %v2372_v3, %v2372_v3 }
 0x45c   : > { %v2379_v10 = vsub.f32 %v3483_v0, %v2250_v52 }
 0x45d   : > { %v2616_v20 = vadd.f32 %v2615_v6, %v2489_v33  ;;  %v2373_v33 = vsub.f32 %v3477_v38, %v2053_v58  ;;  %v2499_v4 = vmul.f32 %v2371_v32, %v2371_v32  ;;  %v2246_v6 = vadd.f32 %v4752_v8, %v4476_v23 }
 0x45f   : > { %v2617_v1 = vadd.f32 %v2616_v20, %v2490_v12  ;;  %v3478_v12 = vld [vmem:[%s3916_s13 + $0x3d0] sm:$0xff]  ;;  %v2501_v48 = vmul.f32 %v2373_v33, %v2373_v33 }
 0x460   : > { %v2374_v20 = vsub.f32 %v3478_v12, %v2244_v7 }
 0x461   : > { %v2618_v9 = vadd.f32 %v2617_v1, %v2491_v59  ;;  %v3479_v1 = vld [vmem:[%s3916_s13 + $0x3d8] sm:$0xff] }
 0x462   : > { %v2375_v59 = vsub.f32 %v3479_v1, %v2246_v6  ;;  %v2502_v8 = vmul.f32 %v2374_v20, %v2374_v20 }
 0x463   : > { %v2619_v2 = vadd.f32 %v2618_v9, %v2492_v55  ;;  %v2376_v55 = vsub.f32 %v3480_v37, %v2055_v56  ;;  %v2377_v9 = vsub.f32 %v3481_v39, %v2057_v29 }
 0x464   : > { %v2503_v16 = vmul.f32 %v2375_v59, %v2375_v59 }
 0x465   : > { %v2620_v13 = vadd.f32 %v2619_v2, %v2493_v41  ;;  %v2504_v41 = vmul.f32 %v2376_v55, %v2376_v55  ;;  %v2378_v2 = vsub.f32 %v3482_v27, %v2248_v36  ;;  %v2505_v60 = vmul.f32 %v2377_v9, %v2377_v9 }
 0x467   : > { %v2621_v15 = vadd.f32 %v2620_v13, %v2494_v24  ;;  %v2506_v35 = vmul.f32 %v2378_v2, %v2378_v2  ;;  %v2507_v24 = vmul.f32 %v2379_v10, %v2379_v10 }
 0x469   : > { %v2622_v61 = vadd.f32 %v2621_v15, %v2495_v51 }
 0x46b   : > { %v2623_v53 = vadd.f32 %v2622_v61, %v2496_v49 }
 0x46d   : > { %v2624_v22 = vadd.f32 %v2623_v53, %v2497_v54 }
 0x46f   : > { %v2625_v30 = vadd.f32 %v2624_v22, %v2498_v63 }
 0x471   : > { %v2626_v34 = vadd.f32 %v2625_v30, %v2499_v4 }
 0x473   : > { %v2627_v46 = vadd.f32 %v2626_v34, %v2500_v11 }
 0x475   : > { %v2628_v18 = vadd.f32 %v2627_v46, %v2501_v48 }
 0x477   : > { %v2629_v14 = vadd.f32 %v2628_v18, %v2502_v8 }
 0x479   : > { %v2630_v43 = vadd.f32 %v2629_v14, %v2503_v16 }
 0x47b   : > { %v2631_v44 = vadd.f32 %v2630_v43, %v2504_v41 }
 0x47d   : > { %v2632_v31 = vadd.f32 %v2631_v44, %v2505_v60 }
 0x47f   : > { %v2633_v13 = vadd.f32 %v2632_v31, %v2506_v35 }
 0x481   : > { %v2634_v26 = vadd.f32 %v2633_v13, %v2507_v24 }
 0x483   : > { %2635 = vadd.xlane.f32.xlu0 %v2634_v26 }
 0x484   : > { %3611 = shalt.err (!%p3608_p4)
}
 0x485   : > { %s3612_s13 = scalar_lea.hbm %s4954_s15, 8192  ;;  %s3616_s11 = scalar_lea.hbm %s5010_s5, 16384 }
 0x486   : > { %p3613_p9 = scmp.ne.s32.totalorder %s4954_s15, %s3612_s13  ;;  %p3617_p8 = scmp.lt.u32.totalorder %s4954_s15, %s5010_s5 }
 0x487   : > { %p3618_p13 = scmp.lt.u32.totalorder %s3616_s11, %s3612_s13  ;;  %p3620_p10 = scmp.lt.u32.totalorder %s3612_s13, %s4954_s15 }
 0x488   : > { %p3614_p0 = pnand %p3613_p9, %p3864_p5 }
 0x489   : > { %p3619_p6 = por %p3618_p13, %p3617_p8 }
 0x48a   : > { %p3615_p11 = pneg %p3614_p0 }
 0x48b   : > { %p3621_p3 = por %p3620_p10, %p3619_p6 }
 0x48d   : > { %p3622_p7 = pnand %p3621_p3, %p3615_p11 }
 0x48f   : > { %3625 = shalt.err (!%p3622_p7)
}
 0x490   : > { %s3685_s30 = smov 256   ;;  %s3686_s14 = smov 16  }
 0x491   : > { %3093 = dma.vmem_to_hbm [thread:$0]  (%p3864_p5), %s4956_s10, 8192, %s4954_s15, %s2647_s17, %s3685_s30, %s3685_s30, %s3686_s14  }
 0x492   : > { %p322_p12 = scmp.lt.s32.totalorder %s3743_s25, 1 }
 0x494   : > { %s5084_s25 = smov (!%p322_p12, %s3743_s25), 1 }
 0x495   : > { %s2810_s19 = sshll.u32 %s5084_s25, 3 }
 0x496   : > { %s325_s9 = scalar_lea.vmem %s5011_s6, %s2810_s19 }
 0x510   : > { %v2636_v23 = vpop.xlane.xlu0 %2635 }
 0x511   : > { %v2637_v28 = vrot.slane %v2636_v23, 4 }
 0x513   : > { %v2638_v50 = vadd.f32 %v2637_v28, %v2636_v23 }
 0x515   : > { %v2639_v21 = vrot.slane %v2638_v50, 2 }
 0x517   : > { %v2640_v15 = vadd.f32 %v2639_v21, %v2638_v50 }
 0x519   : > { %v2641_v51 = vrot.slane %v2640_v15, 1 }
 0x51b   : > { %v2642_v5 = vadd.f32 %v2641_v51, %v2640_v15 }
 0x51d   : > { %3077 = vpush %v2642_v5 }
 0x54e   : > { %s3078_s13 = spop %3077 }
 0x54f   : > { %v2644_v49 = vstv %s3078_s13 }
 0x550   : > { %2645 = vst [vmem:[%s325_s9] sm:$0xff] %v2644_v49 }
 0x551 PF: > { %s2683_s26 = sand.u32 1, %s3660_s21   ;;  %p5077_p5 = scmp.ne.s32.totalorder %s5017_s28, 0 }
 0x552   : > { %p5078_p2 = scmp.ge.s32.totalorder %s3672_s24, 2  ;;  %s2684_s1 = scalar_lea.sflag [#allocation4], %s2683_s26 }
 0x554   : > { %p3110_p1 = pnand %p5078_p2, %p5077_p5 }
 0x556   : > { %3655 = dma.done.wait (!%p3110_p1), %s2684_s1, 8192  }
 0x557   : > { %3657 = vsyncadd (!%p3110_p1), %s2684_s1, 4294959104  ;;  %p22_p4 = scmp.ge.s32.totalorder %s3832_s12, 4   ;;  %s5079_s21 = smov %s3664_s22 }
 0x558   : > { %s5080_s22 = smov %s3668_s23  ;;  %s5081_s23 = smov %s3860_s8 }
 0x559   : > { %s5082_s24 = smov %s3832_s12  ;;  %24 = sbr.rel (!%p22_p4) target bundleno = 9 (0x9), region = 109 }
 0x560   :  { %2696 = vsyncpa [#allocation3], 1 }
 0x561   :  { %2698 = vsyncpa [#allocation3 + $0x1], 1 }
 0x562   :  { %2699 = vsyncpa [#allocation6], 1 }
 0x563   :  { %2700 = vsyncpa [#allocation9], 1 }
 0x564   :  { %2701 = vsyncpa [#allocation4], 1 }
 0x565   :  { %2703 = vsyncpa [#allocation4 + $0x1], 1 }

</bundles_post_ra>
